<compile_context>
chip_gen: v7x
topology: tpu7x:2x2x1
jax: 0.10.0
libtpu: 0.0.40
codegen_flags: <defaults>
</compile_context>

<pallas_src>
import jax
import jax.numpy as jnp
from jax import lax
from jax.experimental import pallas as pl
from jax.experimental.pallas import tpu as pltpu


def basic_block_kernel(x_ref, w1_ref, w2_ref, s1_ref, b1_ref, s2_ref, b2_ref,
                       o_ref, pad_ref, col_ref):
    # x_ref  : (1, H, W, Cin)    this batch element (unpadded, NHWC)
    # w1_ref : (9*Cin, Cout)     conv1 weights, im2col-flattened (k-major)
    # w2_ref : (9*Cout, Cout)    conv2 weights, im2col-flattened
    # s*/b*  : (1, Cout)         folded BN scale / bias
    # o_ref  : (1, H, W, Cout)
    # pad_ref: (H+2, W+2, C)     VMEM scratch: zero-bordered padded slab (reused)
    # col_ref: (H, W, 9*C)       VMEM scratch: im2col patch slab
    H = o_ref.shape[1]
    W = o_ref.shape[2]
    Cin = x_ref.shape[3]
    Cout = o_ref.shape[3]

    # Zero only the 1-pixel halo (the interior is fully overwritten below).
    # Done every step (cheap, O(H+W) rows) instead of gating on
    # program_id(0) == 0, so it stays correct when the "parallel" batch axis
    # is sharded across TensorCores and a core never executes program_id 0.
    pad_ref[0:1, :, :] = jnp.zeros((1, W + 2, Cin), jnp.float32)
    pad_ref[H + 1:H + 2, :, :] = jnp.zeros((1, W + 2, Cin), jnp.float32)
    pad_ref[:, 0:1, :] = jnp.zeros((H + 2, 1, Cin), jnp.float32)
    pad_ref[:, W + 1:W + 2, :] = jnp.zeros((H + 2, 1, Cin), jnp.float32)

    x = x_ref[0].astype(jnp.float32)                      # (H, W, Cin)
    pad_ref[1:1 + H, 1:1 + W, :] = x

    # ---- conv1: im2col + ONE MXU matmul ----
    for k in range(9):
        dy, dx = divmod(k, 3)
        col_ref[:, :, k * Cin:(k + 1) * Cin] = pad_ref[dy:dy + H, dx:dx + W, :]
    p1 = col_ref[...].reshape(H * W, 9 * Cin)
    h1 = jnp.dot(p1, w1_ref[...], preferred_element_type=jnp.float32)
    h1 = jnp.maximum(h1 * s1_ref[...] + b1_ref[...], 0.0)  # bn1 + relu

    # ---- conv2: reuse pad_ref as the padded conv2 input ----
    pad_ref[1:1 + H, 1:1 + W, :] = h1.reshape(H, W, Cout)
    for k in range(9):
        dy, dx = divmod(k, 3)
        col_ref[:, :, k * Cout:(k + 1) * Cout] = pad_ref[dy:dy + H, dx:dx + W, :]
    p2 = col_ref[...].reshape(H * W, 9 * Cout)
    h2 = jnp.dot(p2, w2_ref[...], preferred_element_type=jnp.float32)
    h2 = h2 * s2_ref[...] + b2_ref[...]                     # bn2

    # ---- residual add + relu ----
    res = jnp.maximum(h2 + x.reshape(H * W, Cin), 0.0)
    o_ref[0] = res.reshape(H, W, Cout).astype(o_ref.dtype)


def basic_block_pallas(x_nchw, w1_oihw, w2_oihw,
                       gamma1, beta1, mean1, var1,
                       gamma2, beta2, mean2, var2,
                       eps=1e-5):
    """BasicBlock forward (stride=1, downsample=None), eval-mode BatchNorm."""
    N, Cin, H, W = x_nchw.shape
    Cout = w1_oihw.shape[0]
    assert Cin == Cout, "residual add requires in_channels == out_channels"

    # --- layout glue (plain JAX, outside the kernel) ---
    x_nhwc = jnp.transpose(x_nchw, (0, 2, 3, 1))                       # NCHW -> NHWC
    # OIHW -> HWIO -> flatten to (9*Cin, Cout), k-major (k = dy*3 + dx), pre-cast once.
    w1 = jnp.transpose(w1_oihw, (2, 3, 1, 0)).reshape(9 * Cin, Cout).astype(jnp.float32)
    w2 = jnp.transpose(w2_oihw, (2, 3, 1, 0)).reshape(9 * Cout, Cout).astype(jnp.float32)

    # Fold BN (eval semantics) into per-channel scale/bias.
    inv1 = gamma1 / jnp.sqrt(var1 + eps)
    s1 = inv1.reshape(1, Cout).astype(jnp.float32)
    b1 = (beta1 - mean1 * inv1).reshape(1, Cout).astype(jnp.float32)
    inv2 = gamma2 / jnp.sqrt(var2 + eps)
    s2 = inv2.reshape(1, Cout).astype(jnp.float32)
    b2 = (beta2 - mean2 * inv2).reshape(1, Cout).astype(jnp.float32)

    out_nhwc = pl.pallas_call(
        basic_block_kernel,
        out_shape=jax.ShapeDtypeStruct((N, H, W, Cout), x_nchw.dtype),
        grid_spec=pltpu.PrefetchScalarGridSpec(
            num_scalar_prefetch=0,
            grid=(N,),
            in_specs=[
                pl.BlockSpec((1, H, W, Cin), lambda n: (n, 0, 0, 0)),     # x (single copy)
                pl.BlockSpec((9 * Cin, Cout), lambda n: (0, 0)),          # w1 (resident)
                pl.BlockSpec((9 * Cout, Cout), lambda n: (0, 0)),         # w2 (resident)
                pl.BlockSpec((1, Cout), lambda n: (0, 0)),                # s1
                pl.BlockSpec((1, Cout), lambda n: (0, 0)),                # b1
                pl.BlockSpec((1, Cout), lambda n: (0, 0)),                # s2
                pl.BlockSpec((1, Cout), lambda n: (0, 0)),                # b2
            ],
            out_specs=pl.BlockSpec((1, H, W, Cout), lambda n: (n, 0, 0, 0)),
            scratch_shapes=[
                pltpu.VMEM((H + 2, W + 2, Cin), jnp.float32),   # padded slab (shared by both convs)
                pltpu.VMEM((H, W, 9 * Cin), jnp.float32),       # im2col patches
            ],
        ),
        compiler_params=pltpu.CompilerParams(
            dimension_semantics=("parallel",)),   # batch elems independent -> both v7x TCs
    )(x_nhwc, w1, w2, s1, b1, s2, b2)

    return jnp.transpose(out_nhwc, (0, 3, 1, 2))  # NHWC -> NCHW


# --- pure-JAX reference (NCHW, mirrors the PyTorch module, eval-mode BN) ---
def basic_block_ref(x, w1, w2, g1, be1, m1, v1, g2, be2, m2, v2, eps=1e-5):
    dn = lax.conv_dimension_numbers(x.shape, w1.shape, ("NCHW", "OIHW", "NCHW"))

    def bn(y, g, b, m, v):
        g = g.reshape(1, -1, 1, 1); b = b.reshape(1, -1, 1, 1)
        m = m.reshape(1, -1, 1, 1); v = v.reshape(1, -1, 1, 1)
        return g * (y - m) / jnp.sqrt(v + eps) + b

    out = lax.conv_general_dilated(x, w1, (1, 1), ((1, 1), (1, 1)), dimension_numbers=dn)
    out = jnp.maximum(bn(out, g1, be1, m1, v1), 0.0)
    out = lax.conv_general_dilated(out, w2, (1, 1), ((1, 1), (1, 1)), dimension_numbers=dn)
    out = bn(out, g2, be2, m2, v2) + x
    return jnp.maximum(out, 0.0)


if __name__ == "__main__":
    key = jax.random.PRNGKey(0)
    N, C, H, W = 2, 8, 16, 16  # in_channels == out_channels, stride=1, downsample=None

    ks = jax.random.split(key, 12)
    x = jax.random.normal(ks[0], (N, C, H, W), dtype=jnp.float32)
    w1 = jax.random.normal(ks[1], (C, C, 3, 3), dtype=jnp.float32) * 0.1
    w2 = jax.random.normal(ks[2], (C, C, 3, 3), dtype=jnp.float32) * 0.1
    gamma1 = 1.0 + 0.1 * jax.random.normal(ks[3], (C,), dtype=jnp.float32)
    beta1 = 0.1 * jax.random.normal(ks[4], (C,), dtype=jnp.float32)
    mean1 = 0.1 * jax.random.normal(ks[5], (C,), dtype=jnp.float32)
    var1 = 1.0 + 0.1 * jnp.abs(jax.random.normal(ks[6], (C,), dtype=jnp.float32))
    gamma2 = 1.0 + 0.1 * jax.random.normal(ks[7], (C,), dtype=jnp.float32)
    beta2 = 0.1 * jax.random.normal(ks[8], (C,), dtype=jnp.float32)
    mean2 = 0.1 * jax.random.normal(ks[9], (C,), dtype=jnp.float32)
    var2 = 1.0 + 0.1 * jnp.abs(jax.random.normal(ks[10], (C,), dtype=jnp.float32))

    out = basic_block_pallas(x, w1, w2,
                             gamma1, beta1, mean1, var1,
                             gamma2, beta2, mean2, var2)
    out = jax.block_until_ready(out)

    ref = basic_block_ref(x, w1, w2,
                          gamma1, beta1, mean1, var1,
                          gamma2, beta2, mean2, var2)
    assert out.shape == (N, C, H, W)
    err = float(jnp.max(jnp.abs(out - ref)))
    assert jnp.allclose(out, ref, atol=2e-4, rtol=2e-4), err
    print("KERNEL_OK")
</pallas_src>

<mosaic_0001>
module attributes {stable_mosaic.version = 11 : i64} {
  func.func @basic_block_kernel(%arg0: i32, %arg1: memref<1x16x16x8xf32, #tpu.memory_space<vmem>>, %arg2: memref<72x8xf32, #tpu.memory_space<vmem>>, %arg3: memref<72x8xf32, #tpu.memory_space<vmem>>, %arg4: memref<1x8xf32, #tpu.memory_space<vmem>>, %arg5: memref<1x8xf32, #tpu.memory_space<vmem>>, %arg6: memref<1x8xf32, #tpu.memory_space<vmem>>, %arg7: memref<1x8xf32, #tpu.memory_space<vmem>>, %arg8: memref<1x16x16x8xf32, #tpu.memory_space<vmem>>, %arg9: memref<18x18x8xf32, #tpu.memory_space<vmem>>, %arg10: memref<16x16x72xf32, #tpu.memory_space<vmem>>) attributes {dimension_semantics = [#tpu.dimension_semantics<parallel>], iteration_bounds = array<i64: 2>, scalar_prefetch = 0 : i64, scratch_operands = 2 : i64, tpu.core_type = #tpu.core_type<tc>, window_params = [{transform_indices = @transform_0, window_bounds = array<i64: 1, 16, 16, 8>}, {pipeline_mode = #tpu.pipeline_mode<synchronous>, transform_indices = @transform_1, window_bounds = array<i64: 72, 8>}, {pipeline_mode = #tpu.pipeline_mode<synchronous>, transform_indices = @transform_2, window_bounds = array<i64: 72, 8>}, {pipeline_mode = #tpu.pipeline_mode<synchronous>, transform_indices = @transform_3, window_bounds = array<i64: 1, 8>}, {pipeline_mode = #tpu.pipeline_mode<synchronous>, transform_indices = @transform_4, window_bounds = array<i64: 1, 8>}, {pipeline_mode = #tpu.pipeline_mode<synchronous>, transform_indices = @transform_5, window_bounds = array<i64: 1, 8>}, {pipeline_mode = #tpu.pipeline_mode<synchronous>, transform_indices = @transform_6, window_bounds = array<i64: 1, 8>}, {transform_indices = @transform_7, window_bounds = array<i64: 1, 16, 16, 8>}]} {
    %cst = arith.constant 0.000000e+00 : f32
    %0 = vector.broadcast %cst : f32 to vector<1x18x8xf32>
    %c0 = arith.constant 0 : index
    %c0_0 = arith.constant 0 : index
    %c0_1 = arith.constant 0 : index
    %1 = vector.load %arg9[%c0, %c0_0, %c0_1] : memref<18x18x8xf32, #tpu.memory_space<vmem>>, vector<1x18x8xf32>
    tpu.vector_store %arg9[%c0, %c0_0, %c0_1], %0 {strides = array<i32>} : memref<18x18x8xf32, #tpu.memory_space<vmem>>, vector<1x18x8xf32>,
    %cst_2 = arith.constant 0.000000e+00 : f32
    %2 = vector.broadcast %cst_2 : f32 to vector<1x18x8xf32>
    %c17 = arith.constant 17 : index
    %c0_3 = arith.constant 0 : index
    %c0_4 = arith.constant 0 : index
    %3 = vector.load %arg9[%c17, %c0_3, %c0_4] : memref<18x18x8xf32, #tpu.memory_space<vmem>>, vector<1x18x8xf32>
    tpu.vector_store %arg9[%c17, %c0_3, %c0_4], %2 {strides = array<i32>} : memref<18x18x8xf32, #tpu.memory_space<vmem>>, vector<1x18x8xf32>,
    %cst_5 = arith.constant 0.000000e+00 : f32
    %4 = vector.broadcast %cst_5 : f32 to vector<18x1x8xf32>
    %c0_6 = arith.constant 0 : index
    %c0_7 = arith.constant 0 : index
    %c0_8 = arith.constant 0 : index
    %5 = vector.load %arg9[%c0_6, %c0_7, %c0_8] : memref<18x18x8xf32, #tpu.memory_space<vmem>>, vector<18x1x8xf32>
    tpu.vector_store %arg9[%c0_6, %c0_7, %c0_8], %4 {strides = array<i32>} : memref<18x18x8xf32, #tpu.memory_space<vmem>>, vector<18x1x8xf32>,
    %cst_9 = arith.constant 0.000000e+00 : f32
    %6 = vector.broadcast %cst_9 : f32 to vector<18x1x8xf32>
    %c0_10 = arith.constant 0 : index
    %c17_11 = arith.constant 17 : index
    %c0_12 = arith.constant 0 : index
    %7 = vector.load %arg9[%c0_10, %c17_11, %c0_12] : memref<18x18x8xf32, #tpu.memory_space<vmem>>, vector<18x1x8xf32>
    tpu.vector_store %arg9[%c0_10, %c17_11, %c0_12], %6 {strides = array<i32>} : memref<18x18x8xf32, #tpu.memory_space<vmem>>, vector<18x1x8xf32>,
    %c0_13 = arith.constant 0 : index
    %c0_14 = arith.constant 0 : index
    %c0_15 = arith.constant 0 : index
    %c0_16 = arith.constant 0 : index
    %8 = vector.load %arg1[%c0_13, %c0_14, %c0_15, %c0_16] : memref<1x16x16x8xf32, #tpu.memory_space<vmem>>, vector<1x16x16x8xf32>
    %9 = vector.shape_cast %8 : vector<1x16x16x8xf32> to vector<16x16x8xf32>
    %c1 = arith.constant 1 : index
    %c1_17 = arith.constant 1 : index
    %c0_18 = arith.constant 0 : index
    %10 = vector.load %arg9[%c1, %c1_17, %c0_18] : memref<18x18x8xf32, #tpu.memory_space<vmem>>, vector<16x16x8xf32>
    tpu.vector_store %arg9[%c1, %c1_17, %c0_18], %9 {strides = array<i32>} : memref<18x18x8xf32, #tpu.memory_space<vmem>>, vector<16x16x8xf32>,
    %c0_19 = arith.constant 0 : index
    %c0_20 = arith.constant 0 : index
    %c0_21 = arith.constant 0 : index
    %11 = vector.load %arg9[%c0_19, %c0_20, %c0_21] : memref<18x18x8xf32, #tpu.memory_space<vmem>>, vector<16x16x8xf32>
    %c0_22 = arith.constant 0 : index
    %c0_23 = arith.constant 0 : index
    %c0_24 = arith.constant 0 : index
    %12 = vector.load %arg10[%c0_22, %c0_23, %c0_24] : memref<16x16x72xf32, #tpu.memory_space<vmem>>, vector<16x16x8xf32>
    tpu.vector_store %arg10[%c0_22, %c0_23, %c0_24], %11 {strides = array<i32>} : memref<16x16x72xf32, #tpu.memory_space<vmem>>, vector<16x16x8xf32>,
    %c0_25 = arith.constant 0 : index
    %c1_26 = arith.constant 1 : index
    %c0_27 = arith.constant 0 : index
    %13 = vector.load %arg9[%c0_25, %c1_26, %c0_27] : memref<18x18x8xf32, #tpu.memory_space<vmem>>, vector<16x16x8xf32>
    %c0_28 = arith.constant 0 : index
    %c0_29 = arith.constant 0 : index
    %c8 = arith.constant 8 : index
    %14 = vector.load %arg10[%c0_28, %c0_29, %c8] : memref<16x16x72xf32, #tpu.memory_space<vmem>>, vector<16x16x8xf32>
    tpu.vector_store %arg10[%c0_28, %c0_29, %c8], %13 {strides = array<i32>} : memref<16x16x72xf32, #tpu.memory_space<vmem>>, vector<16x16x8xf32>,
    %c0_30 = arith.constant 0 : index
    %c2 = arith.constant 2 : index
    %c0_31 = arith.constant 0 : index
    %15 = vector.load %arg9[%c0_30, %c2, %c0_31] : memref<18x18x8xf32, #tpu.memory_space<vmem>>, vector<16x16x8xf32>
    %c0_32 = arith.constant 0 : index
    %c0_33 = arith.constant 0 : index
    %c16 = arith.constant 16 : index
    %16 = vector.load %arg10[%c0_32, %c0_33, %c16] : memref<16x16x72xf32, #tpu.memory_space<vmem>>, vector<16x16x8xf32>
    tpu.vector_store %arg10[%c0_32, %c0_33, %c16], %15 {strides = array<i32>} : memref<16x16x72xf32, #tpu.memory_space<vmem>>, vector<16x16x8xf32>,
    %c1_34 = arith.constant 1 : index
    %c0_35 = arith.constant 0 : index
    %c0_36 = arith.constant 0 : index
    %17 = vector.load %arg9[%c1_34, %c0_35, %c0_36] : memref<18x18x8xf32, #tpu.memory_space<vmem>>, vector<16x16x8xf32>
    %c0_37 = arith.constant 0 : index
    %c0_38 = arith.constant 0 : index
    %c24 = arith.constant 24 : index
    %18 = vector.load %arg10[%c0_37, %c0_38, %c24] : memref<16x16x72xf32, #tpu.memory_space<vmem>>, vector<16x16x8xf32>
    tpu.vector_store %arg10[%c0_37, %c0_38, %c24], %17 {strides = array<i32>} : memref<16x16x72xf32, #tpu.memory_space<vmem>>, vector<16x16x8xf32>,
    %c1_39 = arith.constant 1 : index
    %c1_40 = arith.constant 1 : index
    %c0_41 = arith.constant 0 : index
    %19 = vector.load %arg9[%c1_39, %c1_40, %c0_41] : memref<18x18x8xf32, #tpu.memory_space<vmem>>, vector<16x16x8xf32>
    %c0_42 = arith.constant 0 : index
    %c0_43 = arith.constant 0 : index
    %c32 = arith.constant 32 : index
    %20 = vector.load %arg10[%c0_42, %c0_43, %c32] : memref<16x16x72xf32, #tpu.memory_space<vmem>>, vector<16x16x8xf32>
    tpu.vector_store %arg10[%c0_42, %c0_43, %c32], %19 {strides = array<i32>} : memref<16x16x72xf32, #tpu.memory_space<vmem>>, vector<16x16x8xf32>,
    %c1_44 = arith.constant 1 : index
    %c2_45 = arith.constant 2 : index
    %c0_46 = arith.constant 0 : index
    %21 = vector.load %arg9[%c1_44, %c2_45, %c0_46] : memref<18x18x8xf32, #tpu.memory_space<vmem>>, vector<16x16x8xf32>
    %c0_47 = arith.constant 0 : index
    %c0_48 = arith.constant 0 : index
    %c40 = arith.constant 40 : index
    %22 = vector.load %arg10[%c0_47, %c0_48, %c40] : memref<16x16x72xf32, #tpu.memory_space<vmem>>, vector<16x16x8xf32>
    tpu.vector_store %arg10[%c0_47, %c0_48, %c40], %21 {strides = array<i32>} : memref<16x16x72xf32, #tpu.memory_space<vmem>>, vector<16x16x8xf32>,
    %c2_49 = arith.constant 2 : index
    %c0_50 = arith.constant 0 : index
    %c0_51 = arith.constant 0 : index
    %23 = vector.load %arg9[%c2_49, %c0_50, %c0_51] : memref<18x18x8xf32, #tpu.memory_space<vmem>>, vector<16x16x8xf32>
    %c0_52 = arith.constant 0 : index
    %c0_53 = arith.constant 0 : index
    %c48 = arith.constant 48 : index
    %24 = vector.load %arg10[%c0_52, %c0_53, %c48] : memref<16x16x72xf32, #tpu.memory_space<vmem>>, vector<16x16x8xf32>
    tpu.vector_store %arg10[%c0_52, %c0_53, %c48], %23 {strides = array<i32>} : memref<16x16x72xf32, #tpu.memory_space<vmem>>, vector<16x16x8xf32>,
    %c2_54 = arith.constant 2 : index
    %c1_55 = arith.constant 1 : index
    %c0_56 = arith.constant 0 : index
    %25 = vector.load %arg9[%c2_54, %c1_55, %c0_56] : memref<18x18x8xf32, #tpu.memory_space<vmem>>, vector<16x16x8xf32>
    %c0_57 = arith.constant 0 : index
    %c0_58 = arith.constant 0 : index
    %c56 = arith.constant 56 : index
    %26 = vector.load %arg10[%c0_57, %c0_58, %c56] : memref<16x16x72xf32, #tpu.memory_space<vmem>>, vector<16x16x8xf32>
    tpu.vector_store %arg10[%c0_57, %c0_58, %c56], %25 {strides = array<i32>} : memref<16x16x72xf32, #tpu.memory_space<vmem>>, vector<16x16x8xf32>,
    %c2_59 = arith.constant 2 : index
    %c2_60 = arith.constant 2 : index
    %c0_61 = arith.constant 0 : index
    %27 = vector.load %arg9[%c2_59, %c2_60, %c0_61] : memref<18x18x8xf32, #tpu.memory_space<vmem>>, vector<16x16x8xf32>
    %c0_62 = arith.constant 0 : index
    %c0_63 = arith.constant 0 : index
    %c64 = arith.constant 64 : index
    %28 = vector.load %arg10[%c0_62, %c0_63, %c64] : memref<16x16x72xf32, #tpu.memory_space<vmem>>, vector<16x16x8xf32>
    tpu.vector_store %arg10[%c0_62, %c0_63, %c64], %27 {strides = array<i32>} : memref<16x16x72xf32, #tpu.memory_space<vmem>>, vector<16x16x8xf32>,
    %c0_64 = arith.constant 0 : index
    %c0_65 = arith.constant 0 : index
    %c0_66 = arith.constant 0 : index
    %29 = vector.load %arg10[%c0_64, %c0_65, %c0_66] : memref<16x16x72xf32, #tpu.memory_space<vmem>>, vector<16x16x72xf32>
    %30 = vector.shape_cast %29 : vector<16x16x72xf32> to vector<256x72xf32>
    %c0_67 = arith.constant 0 : index
    %c0_68 = arith.constant 0 : index
    %31 = vector.load %arg2[%c0_67, %c0_68] : memref<72x8xf32, #tpu.memory_space<vmem>>, vector<72x8xf32>
    %cst_69 = arith.constant dense<0.000000e+00> : vector<256x8xf32>
    %32 = tpu.matmul %30, %31, %cst_69 {dimension_numbers = #tpu.dot_dimension_numbers<[1], [0], [0], [1], [0, 0, 1, 1], [], []>} : vector<256x72xf32>, vector<72x8xf32>, vector<256x8xf32> -> vector<256x8xf32>
    %c0_70 = arith.constant 0 : index
    %c0_71 = arith.constant 0 : index
    %33 = vector.load %arg4[%c0_70, %c0_71] : memref<1x8xf32, #tpu.memory_space<vmem>>, vector<1x8xf32>
    %34 = vector.broadcast %33 : vector<1x8xf32> to vector<256x8xf32>
    %35 = arith.mulf %32, %34 : vector<256x8xf32>
    %c0_72 = arith.constant 0 : index
    %c0_73 = arith.constant 0 : index
    %36 = vector.load %arg5[%c0_72, %c0_73] : memref<1x8xf32, #tpu.memory_space<vmem>>, vector<1x8xf32>
    %37 = vector.broadcast %36 : vector<1x8xf32> to vector<256x8xf32>
    %38 = arith.addf %35, %37 : vector<256x8xf32>
    %cst_74 = arith.constant 0.000000e+00 : f32
    %39 = vector.broadcast %cst_74 : f32 to vector<256x8xf32>
    %40 = arith.maximumf %38, %39 : vector<256x8xf32>
    %41 = vector.shape_cast %40 : vector<256x8xf32> to vector<16x16x8xf32>
    %c1_75 = arith.constant 1 : index
    %c1_76 = arith.constant 1 : index
    %c0_77 = arith.constant 0 : index
    %42 = vector.load %arg9[%c1_75, %c1_76, %c0_77] : memref<18x18x8xf32, #tpu.memory_space<vmem>>, vector<16x16x8xf32>
    tpu.vector_store %arg9[%c1_75, %c1_76, %c0_77], %41 {strides = array<i32>} : memref<18x18x8xf32, #tpu.memory_space<vmem>>, vector<16x16x8xf32>,
    %c0_78 = arith.constant 0 : index
    %c0_79 = arith.constant 0 : index
    %c0_80 = arith.constant 0 : index
    %43 = vector.load %arg9[%c0_78, %c0_79, %c0_80] : memref<18x18x8xf32, #tpu.memory_space<vmem>>, vector<16x16x8xf32>
    %c0_81 = arith.constant 0 : index
    %c0_82 = arith.constant 0 : index
    %c0_83 = arith.constant 0 : index
    %44 = vector.load %arg10[%c0_81, %c0_82, %c0_83] : memref<16x16x72xf32, #tpu.memory_space<vmem>>, vector<16x16x8xf32>
    tpu.vector_store %arg10[%c0_81, %c0_82, %c0_83], %43 {strides = array<i32>} : memref<16x16x72xf32, #tpu.memory_space<vmem>>, vector<16x16x8xf32>,
    %c0_84 = arith.constant 0 : index
    %c1_85 = arith.constant 1 : index
    %c0_86 = arith.constant 0 : index
    %45 = vector.load %arg9[%c0_84, %c1_85, %c0_86] : memref<18x18x8xf32, #tpu.memory_space<vmem>>, vector<16x16x8xf32>
    %c0_87 = arith.constant 0 : index
    %c0_88 = arith.constant 0 : index
    %c8_89 = arith.constant 8 : index
    %46 = vector.load %arg10[%c0_87, %c0_88, %c8_89] : memref<16x16x72xf32, #tpu.memory_space<vmem>>, vector<16x16x8xf32>
    tpu.vector_store %arg10[%c0_87, %c0_88, %c8_89], %45 {strides = array<i32>} : memref<16x16x72xf32, #tpu.memory_space<vmem>>, vector<16x16x8xf32>,
    %c0_90 = arith.constant 0 : index
    %c2_91 = arith.constant 2 : index
    %c0_92 = arith.constant 0 : index
    %47 = vector.load %arg9[%c0_90, %c2_91, %c0_92] : memref<18x18x8xf32, #tpu.memory_space<vmem>>, vector<16x16x8xf32>
    %c0_93 = arith.constant 0 : index
    %c0_94 = arith.constant 0 : index
    %c16_95 = arith.constant 16 : index
    %48 = vector.load %arg10[%c0_93, %c0_94, %c16_95] : memref<16x16x72xf32, #tpu.memory_space<vmem>>, vector<16x16x8xf32>
    tpu.vector_store %arg10[%c0_93, %c0_94, %c16_95], %47 {strides = array<i32>} : memref<16x16x72xf32, #tpu.memory_space<vmem>>, vector<16x16x8xf32>,
    %c1_96 = arith.constant 1 : index
    %c0_97 = arith.constant 0 : index
    %c0_98 = arith.constant 0 : index
    %49 = vector.load %arg9[%c1_96, %c0_97, %c0_98] : memref<18x18x8xf32, #tpu.memory_space<vmem>>, vector<16x16x8xf32>
    %c0_99 = arith.constant 0 : index
    %c0_100 = arith.constant 0 : index
    %c24_101 = arith.constant 24 : index
    %50 = vector.load %arg10[%c0_99, %c0_100, %c24_101] : memref<16x16x72xf32, #tpu.memory_space<vmem>>, vector<16x16x8xf32>
    tpu.vector_store %arg10[%c0_99, %c0_100, %c24_101], %49 {strides = array<i32>} : memref<16x16x72xf32, #tpu.memory_space<vmem>>, vector<16x16x8xf32>,
    %c1_102 = arith.constant 1 : index
    %c1_103 = arith.constant 1 : index
    %c0_104 = arith.constant 0 : index
    %51 = vector.load %arg9[%c1_102, %c1_103, %c0_104] : memref<18x18x8xf32, #tpu.memory_space<vmem>>, vector<16x16x8xf32>
    %c0_105 = arith.constant 0 : index
    %c0_106 = arith.constant 0 : index
    %c32_107 = arith.constant 32 : index
    %52 = vector.load %arg10[%c0_105, %c0_106, %c32_107] : memref<16x16x72xf32, #tpu.memory_space<vmem>>, vector<16x16x8xf32>
    tpu.vector_store %arg10[%c0_105, %c0_106, %c32_107], %51 {strides = array<i32>} : memref<16x16x72xf32, #tpu.memory_space<vmem>>, vector<16x16x8xf32>,
    %c1_108 = arith.constant 1 : index
    %c2_109 = arith.constant 2 : index
    %c0_110 = arith.constant 0 : index
    %53 = vector.load %arg9[%c1_108, %c2_109, %c0_110] : memref<18x18x8xf32, #tpu.memory_space<vmem>>, vector<16x16x8xf32>
    %c0_111 = arith.constant 0 : index
    %c0_112 = arith.constant 0 : index
    %c40_113 = arith.constant 40 : index
    %54 = vector.load %arg10[%c0_111, %c0_112, %c40_113] : memref<16x16x72xf32, #tpu.memory_space<vmem>>, vector<16x16x8xf32>
    tpu.vector_store %arg10[%c0_111, %c0_112, %c40_113], %53 {strides = array<i32>} : memref<16x16x72xf32, #tpu.memory_space<vmem>>, vector<16x16x8xf32>,
    %c2_114 = arith.constant 2 : index
    %c0_115 = arith.constant 0 : index
    %c0_116 = arith.constant 0 : index
    %55 = vector.load %arg9[%c2_114, %c0_115, %c0_116] : memref<18x18x8xf32, #tpu.memory_space<vmem>>, vector<16x16x8xf32>
    %c0_117 = arith.constant 0 : index
    %c0_118 = arith.constant 0 : index
    %c48_119 = arith.constant 48 : index
    %56 = vector.load %arg10[%c0_117, %c0_118, %c48_119] : memref<16x16x72xf32, #tpu.memory_space<vmem>>, vector<16x16x8xf32>
    tpu.vector_store %arg10[%c0_117, %c0_118, %c48_119], %55 {strides = array<i32>} : memref<16x16x72xf32, #tpu.memory_space<vmem>>, vector<16x16x8xf32>,
    %c2_120 = arith.constant 2 : index
    %c1_121 = arith.constant 1 : index
    %c0_122 = arith.constant 0 : index
    %57 = vector.load %arg9[%c2_120, %c1_121, %c0_122] : memref<18x18x8xf32, #tpu.memory_space<vmem>>, vector<16x16x8xf32>
    %c0_123 = arith.constant 0 : index
    %c0_124 = arith.constant 0 : index
    %c56_125 = arith.constant 56 : index
    %58 = vector.load %arg10[%c0_123, %c0_124, %c56_125] : memref<16x16x72xf32, #tpu.memory_space<vmem>>, vector<16x16x8xf32>
    tpu.vector_store %arg10[%c0_123, %c0_124, %c56_125], %57 {strides = array<i32>} : memref<16x16x72xf32, #tpu.memory_space<vmem>>, vector<16x16x8xf32>,
    %c2_126 = arith.constant 2 : index
    %c2_127 = arith.constant 2 : index
    %c0_128 = arith.constant 0 : index
    %59 = vector.load %arg9[%c2_126, %c2_127, %c0_128] : memref<18x18x8xf32, #tpu.memory_space<vmem>>, vector<16x16x8xf32>
    %c0_129 = arith.constant 0 : index
    %c0_130 = arith.constant 0 : index
    %c64_131 = arith.constant 64 : index
    %60 = vector.load %arg10[%c0_129, %c0_130, %c64_131] : memref<16x16x72xf32, #tpu.memory_space<vmem>>, vector<16x16x8xf32>
    tpu.vector_store %arg10[%c0_129, %c0_130, %c64_131], %59 {strides = array<i32>} : memref<16x16x72xf32, #tpu.memory_space<vmem>>, vector<16x16x8xf32>,
    %c0_132 = arith.constant 0 : index
    %c0_133 = arith.constant 0 : index
    %c0_134 = arith.constant 0 : index
    %61 = vector.load %arg10[%c0_132, %c0_133, %c0_134] : memref<16x16x72xf32, #tpu.memory_space<vmem>>, vector<16x16x72xf32>
    %62 = vector.shape_cast %61 : vector<16x16x72xf32> to vector<256x72xf32>
    %c0_135 = arith.constant 0 : index
    %c0_136 = arith.constant 0 : index
    %63 = vector.load %arg3[%c0_135, %c0_136] : memref<72x8xf32, #tpu.memory_space<vmem>>, vector<72x8xf32>
    %cst_137 = arith.constant dense<0.000000e+00> : vector<256x8xf32>
    %64 = tpu.matmul %62, %63, %cst_137 {dimension_numbers = #tpu.dot_dimension_numbers<[1], [0], [0], [1], [0, 0, 1, 1], [], []>} : vector<256x72xf32>, vector<72x8xf32>, vector<256x8xf32> -> vector<256x8xf32>
    %c0_138 = arith.constant 0 : index
    %c0_139 = arith.constant 0 : index
    %65 = vector.load %arg6[%c0_138, %c0_139] : memref<1x8xf32, #tpu.memory_space<vmem>>, vector<1x8xf32>
    %66 = vector.broadcast %65 : vector<1x8xf32> to vector<256x8xf32>
    %67 = arith.mulf %64, %66 : vector<256x8xf32>
    %c0_140 = arith.constant 0 : index
    %c0_141 = arith.constant 0 : index
    %68 = vector.load %arg7[%c0_140, %c0_141] : memref<1x8xf32, #tpu.memory_space<vmem>>, vector<1x8xf32>
    %69 = vector.broadcast %68 : vector<1x8xf32> to vector<256x8xf32>
    %70 = arith.addf %67, %69 : vector<256x8xf32>
    %71 = vector.shape_cast %9 : vector<16x16x8xf32> to vector<256x8xf32>
    %72 = arith.addf %70, %71 : vector<256x8xf32>
    %cst_142 = arith.constant 0.000000e+00 : f32
    %73 = vector.broadcast %cst_142 : f32 to vector<256x8xf32>
    %74 = arith.maximumf %72, %73 : vector<256x8xf32>
    %75 = vector.shape_cast %74 : vector<256x8xf32> to vector<16x16x8xf32>
    %c0_143 = arith.constant 0 : index
    %c0_144 = arith.constant 0 : index
    %c0_145 = arith.constant 0 : index
    %c0_146 = arith.constant 0 : index
    %76 = vector.load %arg8[%c0_143, %c0_144, %c0_145, %c0_146] : memref<1x16x16x8xf32, #tpu.memory_space<vmem>>, vector<1x16x16x8xf32>
    %77 = vector.shape_cast %76 : vector<1x16x16x8xf32> to vector<16x16x8xf32>
    %78 = vector.shape_cast %75 : vector<16x16x8xf32> to vector<1x16x16x8xf32>
    tpu.vector_store %arg8[%c0_143, %c0_144, %c0_145, %c0_146], %78 {strides = array<i32>} : memref<1x16x16x8xf32, #tpu.memory_space<vmem>>, vector<1x16x16x8xf32>,
    return
  }
  func.func @transform_0(%arg0: i32) -> (i32, i32, i32, i32) {
    %c0_i32 = arith.constant 0 : i32
    %c0_i32_0 = arith.constant 0 : i32
    %c0_i32_1 = arith.constant 0 : i32
    %c0_i32_2 = arith.constant 0 : i32
    return %arg0, %c0_i32, %c0_i32_0, %c0_i32_1 : i32, i32, i32, i32
  }
  func.func @transform_1(%arg0: i32) -> (i32, i32) {
    %c0_i32 = arith.constant 0 : i32
    %c0_i32_0 = arith.constant 0 : i32
    %c0_i32_1 = arith.constant 0 : i32
    return %c0_i32, %c0_i32_0 : i32, i32
  }
  func.func @transform_2(%arg0: i32) -> (i32, i32) {
    %c0_i32 = arith.constant 0 : i32
    %c0_i32_0 = arith.constant 0 : i32
    %c0_i32_1 = arith.constant 0 : i32
    return %c0_i32, %c0_i32_0 : i32, i32
  }
  func.func @transform_3(%arg0: i32) -> (i32, i32) {
    %c0_i32 = arith.constant 0 : i32
    %c0_i32_0 = arith.constant 0 : i32
    %c0_i32_1 = arith.constant 0 : i32
    return %c0_i32, %c0_i32_0 : i32, i32
  }
  func.func @transform_4(%arg0: i32) -> (i32, i32) {
    %c0_i32 = arith.constant 0 : i32
    %c0_i32_0 = arith.constant 0 : i32
    %c0_i32_1 = arith.constant 0 : i32
    return %c0_i32, %c0_i32_0 : i32, i32
  }
  func.func @transform_5(%arg0: i32) -> (i32, i32) {
    %c0_i32 = arith.constant 0 : i32
    %c0_i32_0 = arith.constant 0 : i32
    %c0_i32_1 = arith.constant 0 : i32
    return %c0_i32, %c0_i32_0 : i32, i32
  }
  func.func @transform_6(%arg0: i32) -> (i32, i32) {
    %c0_i32 = arith.constant 0 : i32
    %c0_i32_0 = arith.constant 0 : i32
    %c0_i32_1 = arith.constant 0 : i32
    return %c0_i32, %c0_i32_0 : i32, i32
  }
  func.func @transform_7(%arg0: i32) -> (i32, i32, i32, i32) {
    %c0_i32 = arith.constant 0 : i32
    %c0_i32_0 = arith.constant 0 : i32
    %c0_i32_1 = arith.constant 0 : i32
    %c0_i32_2 = arith.constant 0 : i32
    return %arg0, %c0_i32, %c0_i32_0, %c0_i32_1 : i32, i32, i32, i32
  }
}

</mosaic_0001>

<bundles_post_ra>
// kernel: tpu_custom_call.1
= control target key start
LH: loop header
LB: loop body
LE: loop exit
PB: predicated region body
PF: predicated region fallthrough
CT: control target
= control target key end

     0   :  { %s5096_s24 = smov 0   ;;  %s7463_s0 = inlined_call_operand.vmem [shape: f32[2,16,16,8], index: 0, kind: input, shape index: {}]   ;;  %s7464_s1 = inlined_call_operand.vmem [shape: f32[72,8], index: 1, kind: input, shape index: {}]   ;;  %s7465_s2 = inlined_call_operand.vmem [shape: f32[72,8], index: 2, kind: input, shape index: {}]   ;;  %s7466_s3 = inlined_call_operand.vmem [shape: f32[1,8], index: 3, kind: input, shape index: {}]   ;;  %s7467_s4 = inlined_call_operand.vmem [shape: f32[1,8], index: 4, kind: input, shape index: {}]   ;;  %s7468_s5 = inlined_call_operand.vmem [shape: f32[1,8], index: 5, kind: input, shape index: {}]   ;;  %s7469_s6 = inlined_call_operand.vmem [shape: f32[1,8], index: 6, kind: input, shape index: {}]   ;;  %s7470_s7 = inlined_call_operand.vmem [shape: f32[2,16,16,8], index: 7, kind: output, shape index: {}]  }
   0x1 LB: > { %s4695_s25 = sadd.s32 4294967295, %s5045_s24   ;;  %p4699_p0 = scmp.ge.s32.totalorder %s5045_s24, 1  ;;  %s5045_s24 = sphi %s5096_s24, %s17_s24  }
   0x2   : > { %p237_p1 = scmp.lt.s32.totalorder %s5045_s24, 3 }
   0x4   : > { %p238_p2 = pnand %p4699_p0, %p237_p1 }
   0x6   : > { %241 = sbr.rel (%p238_p2) target bundleno = 1684 (0x694), region = 48 }
   0xd   : > { %vm279_vm0 = vcmask 64512   ;;  %p5106_p3 = scmp.lt.s32.totalorder %s4695_s25, 1  ;;  %vm282_vm1 = vcmask 58368   ;;  %vm288_vm2 = vcmask 57344   ;;  %v5047_v0 = vmov 0.0   ;;  %s5048_s8 = smov 8  }
   0xe   : > { %280 = vst.msk [vmem:[#allocation2] sm:$0xff] %vm279_vm0, %v5047_v0  ;;  %281 = vst.msk [vmem:[#allocation2 + $0x8] sm:$0xff] %vm279_vm0, %v5047_v0  ;;  %s5049_s9 = smov 16   ;;  %vm614_vm3 = vcmask 130112   ;;  %s5050_s10 = smov 24   ;;  %vm807_vm4 = vcmask 195712  }
   0xf   : > { %285 = vst.msk [vmem:[#allocation2 + $0x198] sm:$0xff] %vm279_vm0, %v5047_v0  ;;  %286 = vst.msk [vmem:[#allocation2 + $0x1a0] sm:$0xff] %vm279_vm0, %v5047_v0  ;;  %s7659_s25 = smov (!%p5106_p3, %s4695_s25), 1  ;;  %s5051_s11 = smov 32   ;;  %vm1000_vm5 = vcmask 261312   ;;  %vm1193_vm6 = vcmask 326912  }
  0x10   : > { %283 = vst.msk [vmem:[#allocation2 + $0x10] sm:$0x3] %vm282_vm1, %v5047_v0  ;;  %287 = vst.msk [vmem:[#allocation2 + $0x1a8] sm:$0x3] %vm282_vm1, %v5047_v0  ;;  %s4774_s27 = sshll.u32 %s7659_s25, 8  ;;  %s5052_s12 = smov 40  }
  0x11   : > { %290 = vst.msk [vmem:[#allocation2 + $0x18] sm:$0x1] %vm288_vm2, %v5047_v0  ;;  %291 = vst.msk [vmem:[#allocation2 + $0x30] sm:$0x1] %vm288_vm2, %v5047_v0  ;;  %s5162_s30 = scalar_lea.vmem %s7463_s0, %s4774_s27  ;;  %s5053_s13 = smov 48   ;;  %vm1386_vm7 = vcmask 392512  }
  0x12   : > { %292 = vst.msk [vmem:[#allocation2 + $0x48] sm:$0x1] %vm288_vm2, %v5047_v0  ;;  %293 = vst.msk [vmem:[#allocation2 + $0x60] sm:$0x1] %vm288_vm2, %v5047_v0  ;;  %v5165_v1 = vld [vmem:[%s5162_s30] sm:$0xff]  ;;  %v5168_v2 = vld [vmem:[%s5162_s30 + $0x8] sm:$0xff]  ;;  %s7243_s29 = scalar_lea.vmem %s7470_s7, %s4774_s27 }
  0x13   : > { %294 = vst.msk [vmem:[#allocation2 + $0x78] sm:$0x1] %vm288_vm2, %v5047_v0  ;;  %295 = vst.msk [vmem:[#allocation2 + $0x90] sm:$0x1] %vm288_vm2, %v5047_v0  ;;  %v5171_v3 = vld [vmem:[%s5162_s30 + $0x10] sm:$0xff]  ;;  %v5180_v4 = vld [vmem:[%s5162_s30 + $0x18] sm:$0xff] }
  0x14   : > { %296 = vst.msk [vmem:[#allocation2 + $0xa8] sm:$0x1] %vm288_vm2, %v5047_v0  ;;  %297 = vst.msk [vmem:[#allocation2 + $0xc0] sm:$0x1] %vm288_vm2, %v5047_v0  ;;  %v5183_v5 = vld [vmem:[%s5162_s30 + $0x20] sm:$0xff]  ;;  %v5186_v6 = vld [vmem:[%s5162_s30 + $0x28] sm:$0xff] }
  0x15   : > { %298 = vst.msk [vmem:[#allocation2 + $0xd8] sm:$0x1] %vm288_vm2, %v5047_v0  ;;  %299 = vst.msk [vmem:[#allocation2 + $0xf0] sm:$0x1] %vm288_vm2, %v5047_v0  ;;  %v454_v7 = vld [vmem:[#allocation2 + $0x1] sm:$0xff]  ;;  %v5195_v9 = vld [vmem:[%s5162_s30 + $0x30] sm:$0xff] }
  0x16   : > { %300 = vst.msk [vmem:[#allocation2 + $0x108] sm:$0x1] %vm288_vm2, %v5047_v0  ;;  %301 = vst.msk [vmem:[#allocation2 + $0x120] sm:$0x1] %vm288_vm2, %v5047_v0  ;;  %518 = vrot.lane.b32.xlu0 %v454_v7, %s5048_s8  ;;  %v5201_v10 = vld [vmem:[%s5162_s30 + $0x38] sm:$0xff]  ;;  %v5204_v11 = vld [vmem:[%s5162_s30 + $0x40] sm:$0xff] }
  0x17   : > { %302 = vst.msk [vmem:[#allocation2 + $0x138] sm:$0x1] %vm288_vm2, %v5047_v0  ;;  %303 = vst.msk [vmem:[#allocation2 + $0x150] sm:$0x1] %vm288_vm2, %v5047_v0  ;;  %v455_v8 = vld [vmem:[#allocation2 + $0x9] sm:$0xff]  ;;  %v5219_v14 = vld [vmem:[%s5162_s30 + $0x58] sm:$0xff] }
  0x18   : > { %304 = vst.msk [vmem:[#allocation2 + $0x168] sm:$0x1] %vm288_vm2, %v5047_v0  ;;  %305 = vst.msk [vmem:[#allocation2 + $0x180] sm:$0x1] %vm288_vm2, %v5047_v0  ;;  %v5207_v12 = vld [vmem:[%s5162_s30 + $0x48] sm:$0xff]  ;;  %v5216_v13 = vld [vmem:[%s5162_s30 + $0x50] sm:$0xff] }
  0x19   : > { %308 = vst.msk [vmem:[#allocation2 + $0x29] sm:$0x1] %vm288_vm2, %v5047_v0  ;;  %309 = vst.msk [vmem:[#allocation2 + $0x41] sm:$0x1] %vm288_vm2, %v5047_v0  ;;  %v5222_v15 = vld [vmem:[%s5162_s30 + $0x60] sm:$0xff]  ;;  %v5231_v16 = vld [vmem:[%s5162_s30 + $0x68] sm:$0xff] }
  0x1a   : > { %310 = vst.msk [vmem:[#allocation2 + $0x59] sm:$0x1] %vm288_vm2, %v5047_v0  ;;  %311 = vst.msk [vmem:[#allocation2 + $0x71] sm:$0x1] %vm288_vm2, %v5047_v0  ;;  %v5234_v17 = vld [vmem:[%s5162_s30 + $0x70] sm:$0xff]  ;;  %v5237_v18 = vld [vmem:[%s5162_s30 + $0x78] sm:$0xff]  ;;  %520 = vrot.lane.b32.xlu0 %v455_v8, %s5048_s8 }
  0x1b   : > { %312 = vst.msk [vmem:[#allocation2 + $0x89] sm:$0x1] %vm288_vm2, %v5047_v0  ;;  %313 = vst.msk [vmem:[#allocation2 + $0xa1] sm:$0x1] %vm288_vm2, %v5047_v0  ;;  %v5246_v19 = vld [vmem:[%s5162_s30 + $0x80] sm:$0xff]  ;;  %v5249_v20 = vld [vmem:[%s5162_s30 + $0x88] sm:$0xff] }
  0x1c   : > { %314 = vst.msk [vmem:[#allocation2 + $0xb9] sm:$0x1] %vm288_vm2, %v5047_v0  ;;  %315 = vst.msk [vmem:[#allocation2 + $0xd1] sm:$0x1] %vm288_vm2, %v5047_v0  ;;  %v5252_v21 = vld [vmem:[%s5162_s30 + $0x90] sm:$0xff]  ;;  %v5262_v22 = vld [vmem:[%s5162_s30 + $0x98] sm:$0xff] }
  0x1d   : > { %316 = vst.msk [vmem:[#allocation2 + $0xe9] sm:$0x1] %vm288_vm2, %v5047_v0  ;;  %317 = vst.msk [vmem:[#allocation2 + $0x101] sm:$0x1] %vm288_vm2, %v5047_v0  ;;  %v5265_v23 = vld [vmem:[%s5162_s30 + $0xa0] sm:$0xff]  ;;  %v5268_v24 = vld [vmem:[%s5162_s30 + $0xa8] sm:$0xff] }
  0x1e   : > { %318 = vst.msk [vmem:[#allocation2 + $0x119] sm:$0x1] %vm288_vm2, %v5047_v0  ;;  %319 = vst.msk [vmem:[#allocation2 + $0x131] sm:$0x1] %vm288_vm2, %v5047_v0  ;;  %v5285_v28 = vld [vmem:[%s5162_s30 + $0xb0] sm:$0xff]  ;;  %v5288_v29 = vld [vmem:[%s5162_s30 + $0xb8] sm:$0xff] }
  0x1f   : > { %320 = vst.msk [vmem:[#allocation2 + $0x149] sm:$0x1] %vm288_vm2, %v5047_v0  ;;  %321 = vst.msk [vmem:[#allocation2 + $0x161] sm:$0x1] %vm288_vm2, %v5047_v0  ;;  %v5307_v33 = vld [vmem:[%s5162_s30 + $0xc0] sm:$0xff]  ;;  %v5310_v34 = vld [vmem:[%s5162_s30 + $0xc8] sm:$0xff] }
  0x20   : > { %322 = vst.msk [vmem:[#allocation2 + $0x179] sm:$0x1] %vm288_vm2, %v5047_v0  ;;  %323 = vst.msk [vmem:[#allocation2 + $0x191] sm:$0x1] %vm288_vm2, %v5047_v0  ;;  %v5313_v35 = vld [vmem:[%s5162_s30 + $0xd0] sm:$0xff]  ;;  %v5324_v36 = vld [vmem:[%s5162_s30 + $0xd8] sm:$0xff] }
  0x21   : > { %307 = vst.msk [vmem:[#allocation2 + $0x11] sm:$0x1] %vm288_vm2, %v5047_v0  ;;  %289 = vst.msk [vmem:[#allocation2] sm:$0x1] %vm288_vm2, %v5047_v0  ;;  %v5327_v37 = vld [vmem:[%s5162_s30 + $0xe0] sm:$0xff]  ;;  %v5330_v38 = vld [vmem:[%s5162_s30 + $0xe8] sm:$0xff] }
  0x22   : > { %306 = vst.msk [vmem:[#allocation2 + $0x198] sm:$0x1] %vm288_vm2, %v5047_v0  ;;  %324 = vst.msk [vmem:[#allocation2 + $0x1a9] sm:$0x1] %vm288_vm2, %v5047_v0  ;;  %v391_v48 = vld [vmem:[#allocation2 + $0x8] sm:$0xff]  ;;  %s5054_s16 = smov 56  }
  0x23   : > { %7534 = vst [vmem:[#allocation4_spill] sm:$0xff] %v5165_v1  ;;  %7535 = vst [vmem:[#allocation5_spill] sm:$0xff] %v5168_v2  ;;  %s5055_s19 = smov 64   ;;  %vm1580_vm8 = vcmask 458112   ;;  %vm1773_vm9 = vcmask 523712   ;;  %vm1966_vm10 = vcmask 589312  }
  0x24   : > { %7536 = vst [vmem:[#allocation6_spill] sm:$0xff] %v5171_v3  ;;  %358 = vst.msk [vmem:[#allocation2 + $0x19] sm:$0xff] %vm279_vm0, %v5165_v1  ;;  %vm2040_vm11 = vcmask 588800  }
  0x25   : > { %359 = vst.msk [vmem:[#allocation2 + $0x21] sm:$0xff] %vm279_vm0, %v5168_v2  ;;  %360 = vst.msk [vmem:[#allocation2 + $0x31] sm:$0xff] %vm279_vm0, %v5171_v3 }
  0x26   : > { %7537 = vst [vmem:[#allocation7_spill] sm:$0xff] %v5180_v4  ;;  %7538 = vst [vmem:[#allocation8_spill] sm:$0xff] %v5183_v5 }
  0x27   : > { %7539 = vst [vmem:[#allocation9_spill] sm:$0xff] %v5186_v6  ;;  %361 = vst.msk [vmem:[#allocation2 + $0x39] sm:$0xff] %vm279_vm0, %v5180_v4  ;;  %v647_v4 = vld [vmem:[#allocation2 + $0x2] sm:$0xff] }
  0x28   : > { %362 = vst.msk [vmem:[#allocation2 + $0x49] sm:$0xff] %vm279_vm0, %v5183_v5  ;;  %363 = vst.msk [vmem:[#allocation2 + $0x51] sm:$0xff] %vm279_vm0, %v5186_v6  ;;  %v390_v45 = vld [vmem:[#allocation2] sm:$0xff]  ;;  %v5552_v6 = vld [vmem:[%s5162_s30 + $0xf8] sm:$0xff] }
  0x29   : > { %7540 = vst [vmem:[#allocation10_spill] sm:$0xff] %v5195_v9  ;;  %364 = vst.msk [vmem:[#allocation2 + $0x61] sm:$0xff] %vm279_vm0, %v5195_v9 }
  0x2a   : > { %7541 = vst [vmem:[#allocation11_spill] sm:$0xff] %v5201_v10  ;;  %7542 = vst [vmem:[#allocation12_spill] sm:$0xff] %v5204_v11 }
  0x2b   : > { %7543 = vst [vmem:[#allocation13_spill] sm:$0xff] %v5207_v12  ;;  %365 = vst.msk [vmem:[#allocation2 + $0x69] sm:$0xff] %vm279_vm0, %v5201_v10  ;;  %v5270_v25 = vld [vmem:[#allocation2 + $0x19] sm:$0xff]  ;;  %v5545_v10 = vld [vmem:[%s5162_s30 + $0xf0] sm:$0xff] }
  0x2c   : > { %366 = vst.msk [vmem:[#allocation2 + $0x79] sm:$0xff] %vm279_vm0, %v5204_v11  ;;  %367 = vst.msk [vmem:[#allocation2 + $0x81] sm:$0xff] %vm279_vm0, %v5207_v12  ;;  %v5272_v26 = vld [vmem:[#allocation2 + $0x31] sm:$0xff]  ;;  %522 = vrot.lane.b32.xlu1 %v5270_v25, %s5048_s8  ;;  %v5282_v27 = vld [vmem:[#allocation2 + $0x21] sm:$0xff] }
  0x2d   : > { %7544 = vst [vmem:[#allocation14_spill] sm:$0xff] %v5216_v13  ;;  %7545 = vst [vmem:[#allocation15_spill] sm:$0xff] %v5219_v14  ;;  %526 = vrot.lane.b32.xlu0 %v5272_v26, %s5048_s8  ;;  %v5362_v46 = vld [vmem:[#allocation2 + $0x18] sm:$0xff]  ;;  %v5372_v49 = vld [vmem:[#allocation2 + $0x20] sm:$0xff] }
  0x2e   : > { %7546 = vst [vmem:[#allocation16_spill] sm:$0xff] %v5222_v15  ;;  %368 = vst.msk [vmem:[#allocation2 + $0x91] sm:$0xff] %vm279_vm0, %v5216_v13  ;;  %v5300_v31 = vld [vmem:[#allocation2 + $0x39] sm:$0xff]  ;;  %v5378_v51 = vld [vmem:[#allocation2 + $0x30] sm:$0xff] }
  0x2f   : > { %369 = vst.msk [vmem:[#allocation2 + $0x99] sm:$0xff] %vm279_vm0, %v5219_v14  ;;  %370 = vst.msk [vmem:[#allocation2 + $0xa9] sm:$0xff] %vm279_vm0, %v5222_v15  ;;  %v5296_v30 = vld [vmem:[#allocation2 + $0x49] sm:$0xff]  ;;  %v5332_v39 = vld [vmem:[#allocation2 + $0x51] sm:$0xff] }
  0x30   : > { %7547 = vst [vmem:[#allocation17_spill] sm:$0xff] %v5231_v16  ;;  %7548 = vst [vmem:[#allocation18_spill] sm:$0xff] %v5234_v17  ;;  %524 = vrot.lane.b32.xlu1 %v5282_v27, %s5048_s8  ;;  %v5304_v32 = vld [vmem:[#allocation2 + $0x61] sm:$0xff]  ;;  %v5380_v52 = vld [vmem:[#allocation2 + $0x38] sm:$0xff] }
  0x31   : > { %7549 = vst [vmem:[#allocation19_spill] sm:$0xff] %v5237_v18  ;;  %371 = vst.msk [vmem:[#allocation2 + $0xb1] sm:$0xff] %vm279_vm0, %v5231_v16  ;;  %530 = vrot.lane.b32.xlu0 %v5296_v30, %s5048_s8  ;;  %v5390_v54 = vld [vmem:[#allocation2 + $0x48] sm:$0xff]  ;;  %v5392_v55 = vld [vmem:[#allocation2 + $0x50] sm:$0xff] }
  0x32   : > { %372 = vst.msk [vmem:[#allocation2 + $0xc1] sm:$0xff] %vm279_vm0, %v5234_v17  ;;  %373 = vst.msk [vmem:[#allocation2 + $0xc9] sm:$0xff] %vm279_vm0, %v5237_v18  ;;  %v5346_v41 = vld [vmem:[#allocation2 + $0x69] sm:$0xff]  ;;  %v5400_v57 = vld [vmem:[#allocation2 + $0x60] sm:$0xff] }
  0x33   : > { %7550 = vst [vmem:[#allocation20_spill] sm:$0xff] %v5246_v19  ;;  %7551 = vst [vmem:[#allocation21_spill] sm:$0xff] %v5249_v20  ;;  %v5342_v40 = vld [vmem:[#allocation2 + $0x79] sm:$0xff]  ;;  %v5354_v43 = vld [vmem:[#allocation2 + $0x81] sm:$0xff] }
  0x34   : > { %7552 = vst [vmem:[#allocation22_spill] sm:$0xff] %v5252_v21  ;;  %374 = vst.msk [vmem:[#allocation2 + $0xd9] sm:$0xff] %vm279_vm0, %v5246_v19  ;;  %528 = vrot.lane.b32.xlu1 %v5300_v31, %s5048_s8  ;;  %v5402_v58 = vld [vmem:[#allocation2 + $0x68] sm:$0xff]  ;;  %v5404_v59 = vld [vmem:[#allocation2 + $0x78] sm:$0xff] }
  0x35   : > { %375 = vst.msk [vmem:[#allocation2 + $0xe1] sm:$0xff] %vm279_vm0, %v5249_v20  ;;  %376 = vst.msk [vmem:[#allocation2 + $0xf1] sm:$0xff] %vm279_vm0, %v5252_v21  ;;  %534 = vrot.lane.b32.xlu0 %v5304_v32, %s5048_s8  ;;  %v5350_v42 = vld [vmem:[#allocation2 + $0x91] sm:$0xff]  ;;  %v5414_v60 = vld [vmem:[#allocation2 + $0x80] sm:$0xff] }
  0x36   : > { %7553 = vst [vmem:[#allocation23_spill] sm:$0xff] %v5262_v22  ;;  %7554 = vst [vmem:[#allocation24_spill] sm:$0xff] %v5265_v23  ;;  %v5358_v44 = vld [vmem:[#allocation2 + $0xa9] sm:$0xff]  ;;  %v5364_v47 = vld [vmem:[#allocation2 + $0x99] sm:$0xff] }
  0x37   : > { %7555 = vst [vmem:[#allocation25_spill] sm:$0xff] %v5268_v24  ;;  %377 = vst.msk [vmem:[#allocation2 + $0xf9] sm:$0xff] %vm279_vm0, %v5262_v22  ;;  %v5416_v61 = vld [vmem:[#allocation2 + $0x90] sm:$0xff]  ;;  %v5418_v62 = vld [vmem:[#allocation2 + $0x98] sm:$0xff] }
  0x38   : > { %378 = vst.msk [vmem:[#allocation2 + $0x109] sm:$0xff] %vm279_vm0, %v5265_v23  ;;  %379 = vst.msk [vmem:[#allocation2 + $0x111] sm:$0xff] %vm279_vm0, %v5268_v24  ;;  %532 = vrot.lane.b32.xlu1 %v5332_v39, %s5048_s8  ;;  %v5384_v53 = vld [vmem:[#allocation2 + $0xb1] sm:$0xff]  ;;  %v5428_v0 = vld [vmem:[#allocation2 + $0xa8] sm:$0xff] }
  0x39   : > { %7556 = vst [vmem:[#allocation26_spill] sm:$0xff] %v5285_v28  ;;  %7557 = vst [vmem:[#allocation27_spill] sm:$0xff] %v5288_v29  ;;  %538 = vrot.lane.b32.xlu0 %v5342_v40, %s5048_s8  ;;  %v5374_v50 = vld [vmem:[#allocation2 + $0xc1] sm:$0xff]  ;;  %v5420_v63 = vld [vmem:[#allocation2 + $0xc9] sm:$0xff] }
  0x3a   : > { %380 = vst.msk [vmem:[#allocation2 + $0x121] sm:$0xff] %vm279_vm0, %v5285_v28  ;;  %381 = vst.msk [vmem:[#allocation2 + $0x129] sm:$0xff] %vm279_vm0, %v5288_v29  ;;  %v5430_v7 = vld [vmem:[#allocation2 + $0xb0] sm:$0xff]  ;;  %v5432_v8 = vld [vmem:[#allocation2 + $0xc0] sm:$0xff] }
  0x3b   : > { %7558 = vst [vmem:[#allocation28_spill] sm:$0xff] %v5307_v33  ;;  %7559 = vst [vmem:[#allocation29_spill] sm:$0xff] %v5310_v34  ;;  %v5394_v56 = vld [vmem:[#allocation2 + $0xd9] sm:$0xff] }
  0x3c   : > { %7560 = vst [vmem:[#allocation30_spill] sm:$0xff] %v5313_v35  ;;  %382 = vst.msk [vmem:[#allocation2 + $0x139] sm:$0xff] %vm279_vm0, %v5307_v33  ;;  %536 = vrot.lane.b32.xlu1 %v5346_v41, %s5048_s8  ;;  %v5480_v23 = vld [vmem:[#allocation2 + $0xe1] sm:$0xff]  ;;  %v5573_v2 = vld [vmem:[#allocation2 + $0x32] sm:$0xff] }
  0x3d   : > { %383 = vst.msk [vmem:[#allocation2 + $0x141] sm:$0xff] %vm279_vm0, %v5310_v34  ;;  %384 = vst.msk [vmem:[#allocation2 + $0x151] sm:$0xff] %vm279_vm0, %v5313_v35  ;;  %542 = vrot.lane.b32.xlu0 %v5350_v42, %s5048_s8  ;;  %v5470_v34 = vld [vmem:[#allocation2 + $0xf1] sm:$0xff] }
  0x3e   : > { %7561 = vst [vmem:[#allocation31_spill] sm:$0xff] %v5324_v36  ;;  %7562 = vst [vmem:[#allocation32_spill] sm:$0xff] %v5327_v37  ;;  %v5456_v35 = vld [vmem:[#allocation2 + $0xf8] sm:$0xff] }
  0x3f   : > { %7563 = vst [vmem:[#allocation33_spill] sm:$0xff] %v5330_v38  ;;  %385 = vst.msk [vmem:[#allocation2 + $0x159] sm:$0xff] %vm279_vm0, %v5324_v36  ;;  %v5458_v36 = vld [vmem:[#allocation2 + $0x108] sm:$0xff]  ;;  %v5468_v33 = vld [vmem:[#allocation2 + $0x110] sm:$0xff] }
  0x40   : > { %386 = vst.msk [vmem:[#allocation2 + $0x169] sm:$0xff] %vm279_vm0, %v5327_v37  ;;  %387 = vst.msk [vmem:[#allocation2 + $0x171] sm:$0xff] %vm279_vm0, %v5330_v38  ;;  %540 = vrot.lane.b32.xlu1 %v5354_v43, %s5048_s8  ;;  %v5446_v37 = vld [vmem:[#allocation2 + $0xe0] sm:$0xff]  ;;  %v5454_v38 = vld [vmem:[#allocation2 + $0xf0] sm:$0xff] }
  0x41   : > { %422 = vst.msk [vmem:[#allocation3] sm:$0xff] %vm279_vm0, %v390_v45  ;;  %424 = vst.msk [vmem:[#allocation3 + $0x10] sm:$0xff] %vm279_vm0, %v5362_v46  ;;  %546 = vrot.lane.b32.xlu0 %v5358_v44, %s5048_s8  ;;  %v5442_v45 = vld [vmem:[#allocation2 + $0xc8] sm:$0xff]  ;;  %v5476_v28 = vld [vmem:[#allocation2 + $0x120] sm:$0xff] }
  0x42   : > { %423 = vst.msk [vmem:[#allocation3 + $0x8] sm:$0xff] %vm279_vm0, %v391_v48  ;;  %425 = vst.msk [vmem:[#allocation3 + $0x18] sm:$0xff] %vm279_vm0, %v5372_v49  ;;  %v5444_v48 = vld [vmem:[#allocation2 + $0xd8] sm:$0xff]  ;;  %v5478_v29 = vld [vmem:[#allocation2 + $0x128] sm:$0xff] }
  0x43   : > { %426 = vst.msk [vmem:[#allocation3 + $0x20] sm:$0xff] %vm279_vm0, %v5378_v51  ;;  %427 = vst.msk [vmem:[#allocation3 + $0x28] sm:$0xff] %vm279_vm0, %v5380_v52  ;;  %v5488_v24 = vld [vmem:[#allocation2 + $0x109] sm:$0xff]  ;;  %v5492_v21 = vld [vmem:[#allocation2 + $0x138] sm:$0xff] }
  0x44   : > { %544 = vrot.lane.b32.xlu1 %v5364_v47, %s5048_s8  ;;  %428 = vst.msk [vmem:[#allocation3 + $0x30] sm:$0xff] %vm279_vm0, %v5390_v54  ;;  %429 = vst.msk [vmem:[#allocation3 + $0x38] sm:$0xff] %vm279_vm0, %v5392_v55  ;;  %v5494_v22 = vld [vmem:[#allocation2 + $0x140] sm:$0xff]  ;;  %v5508_v17 = vld [vmem:[#allocation2 + $0x150] sm:$0xff] }
  0x45   : > { %550 = vrot.lane.b32.xlu0 %v5374_v50, %s5048_s8  ;;  %430 = vst.msk [vmem:[#allocation3 + $0x40] sm:$0xff] %vm279_vm0, %v5400_v57  ;;  %431 = vst.msk [vmem:[#allocation3 + $0x48] sm:$0xff] %vm279_vm0, %v5402_v58  ;;  %v5496_v19 = vld [vmem:[#allocation2 + $0xf9] sm:$0xff]  ;;  %v5504_v20 = vld [vmem:[#allocation2 + $0x121] sm:$0xff] }
  0x46   : > { %432 = vst.msk [vmem:[#allocation3 + $0x50] sm:$0xff] %vm279_vm0, %v5404_v59  ;;  %433 = vst.msk [vmem:[#allocation3 + $0x58] sm:$0xff] %vm279_vm0, %v5414_v60  ;;  %v5510_v18 = vld [vmem:[#allocation2 + $0x158] sm:$0xff]  ;;  %v5528_v11 = vld [vmem:[#allocation2 + $0x129] sm:$0xff] }
  0x47   : > { %434 = vst.msk [vmem:[#allocation3 + $0x60] sm:$0xff] %vm279_vm0, %v5416_v61  ;;  %435 = vst.msk [vmem:[#allocation3 + $0x68] sm:$0xff] %vm279_vm0, %v5418_v62  ;;  %v5512_v15 = vld [vmem:[#allocation2 + $0x111] sm:$0xff]  ;;  %v5520_v16 = vld [vmem:[#allocation2 + $0x139] sm:$0xff] }
  0x48   : > { %548 = vrot.lane.b32.xlu1 %v5384_v53, %s5048_s8  ;;  %436 = vst.msk [vmem:[#allocation3 + $0x70] sm:$0xff] %vm279_vm0, %v5428_v0  ;;  %437 = vst.msk [vmem:[#allocation3 + $0x78] sm:$0xff] %vm279_vm0, %v5430_v7  ;;  %v5524_v13 = vld [vmem:[#allocation2 + $0x168] sm:$0xff]  ;;  %v5526_v14 = vld [vmem:[#allocation2 + $0x170] sm:$0xff] }
  0x49   : > { %438 = vst.msk [vmem:[#allocation3 + $0x80] sm:$0xff] %vm279_vm0, %v5432_v8  ;;  %439 = vst.msk [vmem:[#allocation3 + $0x88] sm:$0xff] %vm279_vm0, %v5442_v45  ;;  %554 = vrot.lane.b32.xlu0 %v5394_v56, %s5048_s8  ;;  %v5536_v12 = vld [vmem:[#allocation2 + $0x151] sm:$0xff]  ;;  %v5540_v9 = vld [vmem:[#allocation2 + $0x141] sm:$0xff] }
  0x4a   : > { %440 = vst.msk [vmem:[#allocation3 + $0x90] sm:$0xff] %vm279_vm0, %v5444_v48  ;;  %441 = vst.msk [vmem:[#allocation3 + $0x98] sm:$0xff] %vm279_vm0, %v5446_v37  ;;  %v5547_v5 = vld [vmem:[#allocation2 + $0x169] sm:$0xff]  ;;  %v5558_v3 = vld [vmem:[#allocation2 + $0x159] sm:$0xff] }
  0x4b   : > { %442 = vst.msk [vmem:[#allocation3 + $0xa0] sm:$0xff] %vm279_vm0, %v5454_v38  ;;  %443 = vst.msk [vmem:[#allocation3 + $0xa8] sm:$0xff] %vm279_vm0, %v5456_v35  ;;  %v5564_v1 = vld [vmem:[#allocation2 + $0x171] sm:$0xff] }
  0x4c   : > { %444 = vst.msk [vmem:[#allocation3 + $0xb0] sm:$0xff] %vm279_vm0, %v5458_v36  ;;  %445 = vst.msk [vmem:[#allocation3 + $0xb8] sm:$0xff] %vm279_vm0, %v5468_v33  ;;  %552 = vrot.lane.b32.xlu1 %v5420_v63, %s5048_s8 }
  0x4d   : > { %446 = vst.msk [vmem:[#allocation3 + $0xc0] sm:$0xff] %vm279_vm0, %v5476_v28  ;;  %447 = vst.msk [vmem:[#allocation3 + $0xc8] sm:$0xff] %vm279_vm0, %v5478_v29  ;;  %558 = vrot.lane.b32.xlu0 %v5470_v34, %s5048_s8 }
  0x4e   : > { %448 = vst.msk [vmem:[#allocation3 + $0xd0] sm:$0xff] %vm279_vm0, %v5492_v21  ;;  %449 = vst.msk [vmem:[#allocation3 + $0xd8] sm:$0xff] %vm279_vm0, %v5494_v22 }
  0x4f   : > { %450 = vst.msk [vmem:[#allocation3 + $0xe0] sm:$0xff] %vm279_vm0, %v5508_v17  ;;  %451 = vst.msk [vmem:[#allocation3 + $0xe8] sm:$0xff] %vm279_vm0, %v5510_v18 }
  0x50   : > { %556 = vrot.lane.b32.xlu1 %v5480_v23, %s5048_s8  ;;  %452 = vst.msk [vmem:[#allocation3 + $0xf0] sm:$0xff] %vm279_vm0, %v5524_v13  ;;  %453 = vst.msk [vmem:[#allocation3 + $0xf8] sm:$0xff] %vm279_vm0, %v5526_v14 }
  0x51   : > { %562 = vrot.lane.b32.xlu0 %v5488_v24, %s5048_s8  ;;  %7564 = vst [vmem:[#allocation34_spill] sm:$0xff] %v5540_v9  ;;  %7565 = vst [vmem:[#allocation35_spill] sm:$0xff] %v5545_v10 }
  0x52   : > { %7566 = vst [vmem:[#allocation36_spill] sm:$0xff] %v5547_v5  ;;  %388 = vst.msk [vmem:[#allocation2 + $0x181] sm:$0xff] %vm279_vm0, %v5545_v10  ;;  %v5567_v10 = vld [vmem:[#allocation2 + $0x1a] sm:$0xff] }
  0x53   : > { %7567 = vst [vmem:[#allocation37_spill] sm:$0xff] %v5552_v6  ;;  %389 = vst.msk [vmem:[#allocation2 + $0x189] sm:$0xff] %vm279_vm0, %v5552_v6  ;;  %v648_v6 = vld [vmem:[#allocation2 + $0xa] sm:$0xff] }
  0x54   : > { %560 = vrot.lane.b32.xlu1 %v5496_v19, %s5048_s8  ;;  %7568 = vst [vmem:[#allocation38_spill] sm:$0xff] %v5558_v3  ;;  %7569 = vst [vmem:[#allocation39_spill] sm:$0xff] %v5564_v1 }
  0x55   : > { %566 = vrot.lane.b32.xlu0 %v5504_v20, %s5048_s8  ;;  %7570 = vst [vmem:[#allocation40_spill] sm:$0xff] %v5567_v10  ;;  %7571 = vst [vmem:[#allocation41_spill] sm:$0xff] %v5573_v2 }
  0x58   : > { %564 = vrot.lane.b32.xlu1 %v5512_v15, %s5048_s8 }
  0x59   : > { %570 = vrot.lane.b32.xlu0 %v5520_v16, %s5048_s8 }
  0x5c   : > { %568 = vrot.lane.b32.xlu1 %v5528_v11, %s5048_s8 }
  0x5d   : > { %574 = vrot.lane.b32.xlu0 %v5536_v12, %s5048_s8 }
  0x60   : > { %572 = vrot.lane.b32.xlu1 %v5540_v9, %s5048_s8 }
  0x61   : > { %578 = vrot.lane.b32.xlu0 %v5547_v5, %s5048_s8  ;;  %v5576_v5 = vld [vmem:[#allocation2 + $0x22] sm:$0xff] }
  0x62   : > { %7572 = vst [vmem:[#allocation42_spill] sm:$0xff] %v5576_v5 }
  0x64   : > { %576 = vrot.lane.b32.xlu1 %v5558_v3, %s5048_s8  ;;  %v5580_v3 = vld [vmem:[#allocation2 + $0x4a] sm:$0xff] }
  0x65   : > { %711 = vrot.lane.b32.xlu0 %v647_v4, %s5049_s9  ;;  %7573 = vst [vmem:[#allocation43_spill] sm:$0xff] %v5580_v3  ;;  %v5584_v4 = vld [vmem:[#allocation2 + $0x3a] sm:$0xff] }
  0x66   : > { %7574 = vst [vmem:[#allocation44_spill] sm:$0xff] %v5584_v4 }
  0x68   : > { %580 = vrot.lane.b32.xlu1 %v5564_v1, %s5048_s8  ;;  %v5664_v1 = vld [vmem:[#allocation2 + $0x12a] sm:$0xff] }
  0x69   : > { %715 = vrot.lane.b32.xlu0 %v5567_v10, %s5049_s9  ;;  %v5588_v10 = vld [vmem:[#allocation2 + $0x62] sm:$0xff]  ;;  %7594 = vst [vmem:[#allocation64_spill] sm:$0xff] %v5664_v1 }
  0x6a   : > { %7575 = vst [vmem:[#allocation45_spill] sm:$0xff] %v5588_v10 }
  0x6c   : > { %713 = vrot.lane.b32.xlu1 %v648_v6, %s5049_s9  ;;  %v5592_v6 = vld [vmem:[#allocation2 + $0x52] sm:$0xff] }
  0x6d   : > { %719 = vrot.lane.b32.xlu0 %v5573_v2, %s5049_s9  ;;  %7576 = vst [vmem:[#allocation46_spill] sm:$0xff] %v5592_v6  ;;  %v5596_v2 = vld [vmem:[#allocation2 + $0x7a] sm:$0xff] }
  0x6e   : > { %7577 = vst [vmem:[#allocation47_spill] sm:$0xff] %v5596_v2 }
  0x70   : > { %717 = vrot.lane.b32.xlu1 %v5576_v5, %s5049_s9  ;;  %v5600_v5 = vld [vmem:[#allocation2 + $0x6a] sm:$0xff] }
  0x71   : > { %723 = vrot.lane.b32.xlu0 %v5580_v3, %s5049_s9  ;;  %7578 = vst [vmem:[#allocation48_spill] sm:$0xff] %v5600_v5  ;;  %v5604_v3 = vld [vmem:[#allocation2 + $0x92] sm:$0xff] }
  0x72   : > { %7579 = vst [vmem:[#allocation49_spill] sm:$0xff] %v5604_v3 }
  0x74   : > { %721 = vrot.lane.b32.xlu1 %v5584_v4, %s5049_s9  ;;  %v5608_v4 = vld [vmem:[#allocation2 + $0x82] sm:$0xff] }
  0x75   : > { %727 = vrot.lane.b32.xlu0 %v5588_v10, %s5049_s9  ;;  %7580 = vst [vmem:[#allocation50_spill] sm:$0xff] %v5608_v4  ;;  %v5612_v10 = vld [vmem:[#allocation2 + $0xaa] sm:$0xff] }
  0x76   : > { %7581 = vst [vmem:[#allocation51_spill] sm:$0xff] %v5612_v10 }
  0x78   : > { %725 = vrot.lane.b32.xlu1 %v5592_v6, %s5049_s9  ;;  %v5616_v6 = vld [vmem:[#allocation2 + $0x9a] sm:$0xff] }
  0x79   : > { %731 = vrot.lane.b32.xlu0 %v5596_v2, %s5049_s9  ;;  %7582 = vst [vmem:[#allocation52_spill] sm:$0xff] %v5616_v6  ;;  %v5620_v2 = vld [vmem:[#allocation2 + $0xc2] sm:$0xff] }
  0x7a   : > { %7583 = vst [vmem:[#allocation53_spill] sm:$0xff] %v5620_v2 }
  0x7c   : > { %729 = vrot.lane.b32.xlu1 %v5600_v5, %s5049_s9  ;;  %v5624_v5 = vld [vmem:[#allocation2 + $0xb2] sm:$0xff] }
  0x7d   : > { %735 = vrot.lane.b32.xlu0 %v5604_v3, %s5049_s9  ;;  %7584 = vst [vmem:[#allocation54_spill] sm:$0xff] %v5624_v5  ;;  %v5628_v3 = vld [vmem:[#allocation2 + $0xda] sm:$0xff] }
  0x7e   : > { %7585 = vst [vmem:[#allocation55_spill] sm:$0xff] %v5628_v3 }
  0x80   : > { %733 = vrot.lane.b32.xlu1 %v5608_v4, %s5049_s9  ;;  %v5632_v4 = vld [vmem:[#allocation2 + $0xca] sm:$0xff] }
  0x81   : > { %739 = vrot.lane.b32.xlu0 %v5612_v10, %s5049_s9  ;;  %7586 = vst [vmem:[#allocation56_spill] sm:$0xff] %v5632_v4  ;;  %v5636_v10 = vld [vmem:[#allocation2 + $0xf2] sm:$0xff] }
  0x82   : > { %7587 = vst [vmem:[#allocation57_spill] sm:$0xff] %v5636_v10 }
  0x84   : > { %737 = vrot.lane.b32.xlu1 %v5616_v6, %s5049_s9  ;;  %v5640_v6 = vld [vmem:[#allocation2 + $0xe2] sm:$0xff] }
  0x85   : > { %743 = vrot.lane.b32.xlu0 %v5620_v2, %s5049_s9  ;;  %7588 = vst [vmem:[#allocation58_spill] sm:$0xff] %v5640_v6  ;;  %v5644_v2 = vld [vmem:[#allocation2 + $0x10a] sm:$0xff] }
  0x86   : > { %7589 = vst [vmem:[#allocation59_spill] sm:$0xff] %v5644_v2 }
  0x88   : > { %741 = vrot.lane.b32.xlu1 %v5624_v5, %s5049_s9  ;;  %v5648_v5 = vld [vmem:[#allocation2 + $0xfa] sm:$0xff] }
  0x89   : > { %747 = vrot.lane.b32.xlu0 %v5628_v3, %s5049_s9  ;;  %7590 = vst [vmem:[#allocation60_spill] sm:$0xff] %v5648_v5  ;;  %v5652_v3 = vld [vmem:[#allocation2 + $0x122] sm:$0xff] }
  0x8a   : > { %7591 = vst [vmem:[#allocation61_spill] sm:$0xff] %v5652_v3 }
  0x8c   : > { %745 = vrot.lane.b32.xlu1 %v5632_v4, %s5049_s9  ;;  %v5656_v4 = vld [vmem:[#allocation2 + $0x112] sm:$0xff] }
  0x8d   : > { %751 = vrot.lane.b32.xlu0 %v5636_v10, %s5049_s9  ;;  %7592 = vst [vmem:[#allocation62_spill] sm:$0xff] %v5656_v4  ;;  %v5660_v10 = vld [vmem:[#allocation2 + $0x13a] sm:$0xff] }
  0x8e   : > { %7593 = vst [vmem:[#allocation63_spill] sm:$0xff] %v5660_v10 }
  0x90   : > { %749 = vrot.lane.b32.xlu1 %v5640_v6, %s5049_s9  ;;  %v519_v6 = vpop.permute.xlu0 %518 }
  0x91   : > { %755 = vrot.lane.b32.xlu0 %v5644_v2, %s5049_s9  ;;  %615 = vst.msk [vmem:[#allocation3] sm:$0xff] %vm614_vm3, %v519_v6  ;;  %v5673_v2 = vld [vmem:[#allocation2 + $0x142] sm:$0xff]  ;;  %v5679_v6 = vld [vmem:[#allocation2 + $0x16a] sm:$0xff] }
  0x92   : > { %7595 = vst [vmem:[#allocation65_spill] sm:$0xff] %v5673_v2 }
  0x94   : > { %753 = vrot.lane.b32.xlu1 %v5648_v5, %s5049_s9  ;;  %v5669_v5 = vld [vmem:[#allocation2 + $0x152] sm:$0xff] }
  0x95   : > { %759 = vrot.lane.b32.xlu0 %v5652_v3, %s5049_s9  ;;  %v521_v3 = vpop.permute.xlu0 %520 }
  0x96   : > { %616 = vst.msk [vmem:[#allocation3 + $0x8] sm:$0xff] %vm614_vm3, %v521_v3 }
  0x98   : > { %757 = vrot.lane.b32.xlu1 %v5656_v4, %s5049_s9  ;;  %v5683_v4 = vld [vmem:[#allocation2 + $0x15a] sm:$0xff] }
  0x99   : > { %763 = vrot.lane.b32.xlu0 %v5660_v10, %s5049_s9 }
  0x9c   : > { %761 = vrot.lane.b32.xlu1 %v5664_v1, %s5049_s9 }
  0x9d   : > { %767 = vrot.lane.b32.xlu0 %v5669_v5, %s5049_s9 }
  0x9e   : > { %v523_v9 = vpop.permute.xlu1 %522 }
  0x9f   : > { %617 = vst.msk [vmem:[#allocation3 + $0x10] sm:$0xff] %vm614_vm3, %v523_v9  ;;  %v527_v10 = vpop.permute.xlu0 %526  ;;  %v5691_v9 = vld [vmem:[#allocation2 + $0x172] sm:$0xff] }
  0xa0   : > { %765 = vrot.lane.b32.xlu1 %v5673_v2, %s5049_s9  ;;  %619 = vst.msk [vmem:[#allocation3 + $0x20] sm:$0xff] %vm614_vm3, %v527_v10 }
  0xa1   : > { %771 = vrot.lane.b32.xlu0 %v5679_v6, %s5049_s9 }
  0xa2   : > { %v525_v1 = vpop.permute.xlu1 %524 }
  0xa3   : > { %618 = vst.msk [vmem:[#allocation3 + $0x18] sm:$0xff] %vm614_vm3, %v525_v1  ;;  %v531_v3 = vpop.permute.xlu0 %530 }
  0xa4   : > { %769 = vrot.lane.b32.xlu1 %v5683_v4, %s5049_s9  ;;  %621 = vst.msk [vmem:[#allocation3 + $0x30] sm:$0xff] %vm614_vm3, %v531_v3 }
  0xa5   : > { %904 = vrot.lane.b32.xlu0 %v5362_v46, %s5050_s10 }
  0xa6   : > { %v529_v2 = vpop.permute.xlu1 %528 }
  0xa7   : > { %620 = vst.msk [vmem:[#allocation3 + $0x28] sm:$0xff] %vm614_vm3, %v529_v2  ;;  %v535_v10 = vpop.permute.xlu0 %534 }
  0xa8   : > { %773 = vrot.lane.b32.xlu1 %v5691_v9, %s5049_s9  ;;  %623 = vst.msk [vmem:[#allocation3 + $0x40] sm:$0xff] %vm614_vm3, %v535_v10 }
  0xa9   : > { %908 = vrot.lane.b32.xlu0 %v5378_v51, %s5050_s10 }
  0xaa   : > { %v533_v1 = vpop.permute.xlu1 %532 }
  0xab   : > { %622 = vst.msk [vmem:[#allocation3 + $0x38] sm:$0xff] %vm614_vm3, %v533_v1  ;;  %v539_v3 = vpop.permute.xlu0 %538 }
  0xac   : > { %906 = vrot.lane.b32.xlu1 %v5372_v49, %s5050_s10  ;;  %625 = vst.msk [vmem:[#allocation3 + $0x50] sm:$0xff] %vm614_vm3, %v539_v3 }
  0xad   : > { %912 = vrot.lane.b32.xlu0 %v5390_v54, %s5050_s10 }
  0xae   : > { %v537_v46 = vpop.permute.xlu1 %536 }
  0xaf   : > { %624 = vst.msk [vmem:[#allocation3 + $0x48] sm:$0xff] %vm614_vm3, %v537_v46  ;;  %v543_v2 = vpop.permute.xlu0 %542 }
  0xb0   : > { %910 = vrot.lane.b32.xlu1 %v5380_v52, %s5050_s10  ;;  %627 = vst.msk [vmem:[#allocation3 + $0x60] sm:$0xff] %vm614_vm3, %v543_v2 }
  0xb1   : > { %916 = vrot.lane.b32.xlu0 %v5400_v57, %s5050_s10 }
  0xb2   : > { %v541_v10 = vpop.permute.xlu1 %540 }
  0xb3   : > { %626 = vst.msk [vmem:[#allocation3 + $0x58] sm:$0xff] %vm614_vm3, %v541_v10  ;;  %v547_v49 = vpop.permute.xlu0 %546 }
  0xb4   : > { %914 = vrot.lane.b32.xlu1 %v5392_v55, %s5050_s10  ;;  %629 = vst.msk [vmem:[#allocation3 + $0x70] sm:$0xff] %vm614_vm3, %v547_v49 }
  0xb5   : > { %920 = vrot.lane.b32.xlu0 %v5404_v59, %s5050_s10 }
  0xb6   : > { %v545_v1 = vpop.permute.xlu1 %544 }
  0xb7   : > { %628 = vst.msk [vmem:[#allocation3 + $0x68] sm:$0xff] %vm614_vm3, %v545_v1  ;;  %v551_v3 = vpop.permute.xlu0 %550 }
  0xb8   : > { %918 = vrot.lane.b32.xlu1 %v5402_v58, %s5050_s10  ;;  %631 = vst.msk [vmem:[#allocation3 + $0x80] sm:$0xff] %vm614_vm3, %v551_v3 }
  0xb9   : > { %924 = vrot.lane.b32.xlu0 %v5416_v61, %s5050_s10 }
  0xba   : > { %v549_v46 = vpop.permute.xlu1 %548 }
  0xbb   : > { %630 = vst.msk [vmem:[#allocation3 + $0x78] sm:$0xff] %vm614_vm3, %v549_v46  ;;  %v555_v2 = vpop.permute.xlu0 %554 }
  0xbc   : > { %922 = vrot.lane.b32.xlu1 %v5414_v60, %s5050_s10  ;;  %633 = vst.msk [vmem:[#allocation3 + $0x90] sm:$0xff] %vm614_vm3, %v555_v2 }
  0xbd   : > { %928 = vrot.lane.b32.xlu0 %v5428_v0, %s5050_s10 }
  0xbe   : > { %v553_v10 = vpop.permute.xlu1 %552 }
  0xbf   : > { %632 = vst.msk [vmem:[#allocation3 + $0x88] sm:$0xff] %vm614_vm3, %v553_v10  ;;  %v559_v49 = vpop.permute.xlu0 %558 }
  0xc0   : > { %926 = vrot.lane.b32.xlu1 %v5418_v62, %s5050_s10  ;;  %635 = vst.msk [vmem:[#allocation3 + $0xa0] sm:$0xff] %vm614_vm3, %v559_v49 }
  0xc1   : > { %932 = vrot.lane.b32.xlu0 %v5432_v8, %s5050_s10 }
  0xc2   : > { %v557_v1 = vpop.permute.xlu1 %556 }
  0xc3   : > { %634 = vst.msk [vmem:[#allocation3 + $0x98] sm:$0xff] %vm614_vm3, %v557_v1  ;;  %v563_v3 = vpop.permute.xlu0 %562 }
  0xc4   : > { %930 = vrot.lane.b32.xlu1 %v5430_v7, %s5050_s10  ;;  %637 = vst.msk [vmem:[#allocation3 + $0xb0] sm:$0xff] %vm614_vm3, %v563_v3 }
  0xc5   : > { %936 = vrot.lane.b32.xlu0 %v5444_v48, %s5050_s10 }
  0xc6   : > { %v561_v46 = vpop.permute.xlu1 %560 }
  0xc7   : > { %636 = vst.msk [vmem:[#allocation3 + $0xa8] sm:$0xff] %vm614_vm3, %v561_v46  ;;  %v567_v2 = vpop.permute.xlu0 %566 }
  0xc8   : > { %934 = vrot.lane.b32.xlu1 %v5442_v45, %s5050_s10  ;;  %639 = vst.msk [vmem:[#allocation3 + $0xc0] sm:$0xff] %vm614_vm3, %v567_v2 }
  0xc9   : > { %940 = vrot.lane.b32.xlu0 %v5454_v38, %s5050_s10 }
  0xca   : > { %v565_v10 = vpop.permute.xlu1 %564 }
  0xcb   : > { %638 = vst.msk [vmem:[#allocation3 + $0xb8] sm:$0xff] %vm614_vm3, %v565_v10  ;;  %v571_v49 = vpop.permute.xlu0 %570 }
  0xcc   : > { %938 = vrot.lane.b32.xlu1 %v5446_v37, %s5050_s10  ;;  %641 = vst.msk [vmem:[#allocation3 + $0xd0] sm:$0xff] %vm614_vm3, %v571_v49 }
  0xcd   : > { %944 = vrot.lane.b32.xlu0 %v5458_v36, %s5050_s10 }
  0xce   : > { %v569_v1 = vpop.permute.xlu1 %568 }
  0xcf   : > { %640 = vst.msk [vmem:[#allocation3 + $0xc8] sm:$0xff] %vm614_vm3, %v569_v1  ;;  %v575_v3 = vpop.permute.xlu0 %574 }
  0xd0   : > { %942 = vrot.lane.b32.xlu1 %v5456_v35, %s5050_s10  ;;  %643 = vst.msk [vmem:[#allocation3 + $0xe0] sm:$0xff] %vm614_vm3, %v575_v3 }
  0xd1   : > { %948 = vrot.lane.b32.xlu0 %v5476_v28, %s5050_s10 }
  0xd2   : > { %v573_v46 = vpop.permute.xlu1 %572 }
  0xd3   : > { %642 = vst.msk [vmem:[#allocation3 + $0xd8] sm:$0xff] %vm614_vm3, %v573_v46  ;;  %v579_v2 = vpop.permute.xlu0 %578 }
  0xd4   : > { %946 = vrot.lane.b32.xlu1 %v5468_v33, %s5050_s10  ;;  %645 = vst.msk [vmem:[#allocation3 + $0xf0] sm:$0xff] %vm614_vm3, %v579_v2  ;;  %v870_v2 = vld [vmem:[#allocation2 + $0x180] sm:$0xff] }
  0xd5   : > { %952 = vrot.lane.b32.xlu0 %v5492_v21, %s5050_s10 }
  0xd6   : > { %v577_v10 = vpop.permute.xlu1 %576 }
  0xd7   : > { %644 = vst.msk [vmem:[#allocation3 + $0xe8] sm:$0xff] %vm614_vm3, %v577_v10  ;;  %v712_v49 = vpop.permute.xlu0 %711 }
  0xd8   : > { %950 = vrot.lane.b32.xlu1 %v5478_v29, %s5050_s10  ;;  %808 = vst.msk [vmem:[#allocation3] sm:$0xff] %vm807_vm4, %v712_v49 }
  0xd9   : > { %956 = vrot.lane.b32.xlu0 %v5508_v17, %s5050_s10 }
  0xda   : > { %v581_v1 = vpop.permute.xlu1 %580 }
  0xdb   : > { %646 = vst.msk [vmem:[#allocation3 + $0xf8] sm:$0xff] %vm614_vm3, %v581_v1  ;;  %v716_v3 = vpop.permute.xlu0 %715 }
  0xdc   : > { %954 = vrot.lane.b32.xlu1 %v5494_v22, %s5050_s10  ;;  %810 = vst.msk [vmem:[#allocation3 + $0x10] sm:$0xff] %vm807_vm4, %v716_v3  ;;  %v871_v3 = vld [vmem:[#allocation2 + $0x188] sm:$0xff] }
  0xdd   : > { %960 = vrot.lane.b32.xlu0 %v5524_v13, %s5050_s10 }
  0xde   : > { %v714_v46 = vpop.permute.xlu1 %713 }
  0xdf   : > { %809 = vst.msk [vmem:[#allocation3 + $0x8] sm:$0xff] %vm807_vm4, %v714_v46  ;;  %v720_v10 = vpop.permute.xlu0 %719 }
  0xe0   : > { %958 = vrot.lane.b32.xlu1 %v5510_v18, %s5050_s10  ;;  %812 = vst.msk [vmem:[#allocation3 + $0x20] sm:$0xff] %vm807_vm4, %v720_v10 }
  0xe1   : > { %964 = vrot.lane.b32.xlu0 %v870_v2, %s5050_s10 }
  0xe2   : > { %v718_v49 = vpop.permute.xlu1 %717 }
  0xe3   : > { %811 = vst.msk [vmem:[#allocation3 + $0x18] sm:$0xff] %vm807_vm4, %v718_v49  ;;  %v724_v1 = vpop.permute.xlu0 %723 }
  0xe4   : > { %962 = vrot.lane.b32.xlu1 %v5526_v14, %s5050_s10  ;;  %814 = vst.msk [vmem:[#allocation3 + $0x30] sm:$0xff] %vm807_vm4, %v724_v1 }
  0xe5   : > { %1097 = vrot.lane.b32.xlu0 %v5270_v25, %s5051_s11 }
  0xe6   : > { %v722_v46 = vpop.permute.xlu1 %721 }
  0xe7   : > { %813 = vst.msk [vmem:[#allocation3 + $0x28] sm:$0xff] %vm807_vm4, %v722_v46  ;;  %v728_v10 = vpop.permute.xlu0 %727  ;;  %v7597_v46 = vld [vmem:[#allocation36_spill] sm:$0xff] }
  0xe8   : > { %966 = vrot.lane.b32.xlu1 %v871_v3, %s5050_s10  ;;  %816 = vst.msk [vmem:[#allocation3 + $0x40] sm:$0xff] %vm807_vm4, %v728_v10  ;;  %v7598_v10 = vld [vmem:[#allocation38_spill] sm:$0xff] }
  0xe9   : > { %1101 = vrot.lane.b32.xlu0 %v5272_v26, %s5051_s11 }
  0xea   : > { %v726_v2 = vpop.permute.xlu1 %725 }
  0xeb   : > { %815 = vst.msk [vmem:[#allocation3 + $0x38] sm:$0xff] %vm807_vm4, %v726_v2  ;;  %v732_v49 = vpop.permute.xlu0 %731 }
  0xec   : > { %1099 = vrot.lane.b32.xlu1 %v5282_v27, %s5051_s11  ;;  %818 = vst.msk [vmem:[#allocation3 + $0x50] sm:$0xff] %vm807_vm4, %v732_v49  ;;  %v7599_v49 = vld [vmem:[#allocation39_spill] sm:$0xff] }
  0xed   : > { %1105 = vrot.lane.b32.xlu0 %v5296_v30, %s5051_s11 }
  0xee   : > { %v730_v25 = vpop.permute.xlu1 %729 }
  0xef   : > { %817 = vst.msk [vmem:[#allocation3 + $0x48] sm:$0xff] %vm807_vm4, %v730_v25  ;;  %v736_v1 = vpop.permute.xlu0 %735 }
  0xf0   : > { %1103 = vrot.lane.b32.xlu1 %v5300_v31, %s5051_s11  ;;  %820 = vst.msk [vmem:[#allocation3 + $0x60] sm:$0xff] %vm807_vm4, %v736_v1  ;;  %v5885_v1 = vld [vmem:[#allocation2 + $0x189] sm:$0xff] }
  0xf1   : > { %1109 = vrot.lane.b32.xlu0 %v5304_v32, %s5051_s11 }
  0xf2   : > { %v734_v26 = vpop.permute.xlu1 %733 }
  0xf3   : > { %819 = vst.msk [vmem:[#allocation3 + $0x58] sm:$0xff] %vm807_vm4, %v734_v26  ;;  %v740_v27 = vpop.permute.xlu0 %739 }
  0xf4   : > { %1107 = vrot.lane.b32.xlu1 %v5332_v39, %s5051_s11  ;;  %822 = vst.msk [vmem:[#allocation3 + $0x70] sm:$0xff] %vm807_vm4, %v740_v27  ;;  %v7600_v27 = vld [vmem:[#allocation40_spill] sm:$0xff] }
  0xf5   : > { %1113 = vrot.lane.b32.xlu0 %v5342_v40, %s5051_s11 }
  0xf6   : > { %v738_v30 = vpop.permute.xlu1 %737 }
  0xf7   : > { %821 = vst.msk [vmem:[#allocation3 + $0x68] sm:$0xff] %vm807_vm4, %v738_v30  ;;  %v744_v31 = vpop.permute.xlu0 %743 }
  0xf8   : > { %1111 = vrot.lane.b32.xlu1 %v5346_v41, %s5051_s11  ;;  %824 = vst.msk [vmem:[#allocation3 + $0x80] sm:$0xff] %vm807_vm4, %v744_v31 }
  0xf9   : > { %1117 = vrot.lane.b32.xlu0 %v5350_v42, %s5051_s11 }
  0xfa   : > { %v742_v32 = vpop.permute.xlu1 %741 }
  0xfb   : > { %823 = vst.msk [vmem:[#allocation3 + $0x78] sm:$0xff] %vm807_vm4, %v742_v32  ;;  %v748_v39 = vpop.permute.xlu0 %747  ;;  %v7601_v32 = vld [vmem:[#allocation41_spill] sm:$0xff] }
  0xfc   : > { %1115 = vrot.lane.b32.xlu1 %v5354_v43, %s5051_s11  ;;  %826 = vst.msk [vmem:[#allocation3 + $0x90] sm:$0xff] %vm807_vm4, %v748_v39  ;;  %v7602_v39 = vld [vmem:[#allocation42_spill] sm:$0xff] }
  0xfd   : > { %1121 = vrot.lane.b32.xlu0 %v5358_v44, %s5051_s11 }
  0xfe   : > { %v746_v40 = vpop.permute.xlu1 %745 }
  0xff   : > { %825 = vst.msk [vmem:[#allocation3 + $0x88] sm:$0xff] %vm807_vm4, %v746_v40  ;;  %v752_v41 = vpop.permute.xlu0 %751 }
 0x100   : > { %1119 = vrot.lane.b32.xlu1 %v5364_v47, %s5051_s11  ;;  %828 = vst.msk [vmem:[#allocation3 + $0xa0] sm:$0xff] %vm807_vm4, %v752_v41 }
 0x101   : > { %1125 = vrot.lane.b32.xlu0 %v5374_v50, %s5051_s11 }
 0x102   : > { %v750_v42 = vpop.permute.xlu1 %749 }
 0x103   : > { %827 = vst.msk [vmem:[#allocation3 + $0x98] sm:$0xff] %vm807_vm4, %v750_v42  ;;  %v756_v43 = vpop.permute.xlu0 %755  ;;  %v7603_v42 = vld [vmem:[#allocation43_spill] sm:$0xff] }
 0x104   : > { %1123 = vrot.lane.b32.xlu1 %v5384_v53, %s5051_s11  ;;  %830 = vst.msk [vmem:[#allocation3 + $0xb0] sm:$0xff] %vm807_vm4, %v756_v43  ;;  %v7604_v43 = vld [vmem:[#allocation44_spill] sm:$0xff] }
 0x105   : > { %1129 = vrot.lane.b32.xlu0 %v5394_v56, %s5051_s11 }
 0x106   : > { %v754_v44 = vpop.permute.xlu1 %753 }
 0x107   : > { %829 = vst.msk [vmem:[#allocation3 + $0xa8] sm:$0xff] %vm807_vm4, %v754_v44  ;;  %v760_v47 = vpop.permute.xlu0 %759 }
 0x108   : > { %1127 = vrot.lane.b32.xlu1 %v5420_v63, %s5051_s11  ;;  %832 = vst.msk [vmem:[#allocation3 + $0xc0] sm:$0xff] %vm807_vm4, %v760_v47 }
 0x109   : > { %1133 = vrot.lane.b32.xlu0 %v5470_v34, %s5051_s11 }
 0x10a   : > { %v758_v50 = vpop.permute.xlu1 %757 }
 0x10b   : > { %831 = vst.msk [vmem:[#allocation3 + $0xb8] sm:$0xff] %vm807_vm4, %v758_v50  ;;  %v764_v53 = vpop.permute.xlu0 %763  ;;  %v7605_v50 = vld [vmem:[#allocation45_spill] sm:$0xff] }
 0x10c   : > { %1131 = vrot.lane.b32.xlu1 %v5480_v23, %s5051_s11  ;;  %834 = vst.msk [vmem:[#allocation3 + $0xd0] sm:$0xff] %vm807_vm4, %v764_v53  ;;  %v7606_v53 = vld [vmem:[#allocation46_spill] sm:$0xff] }
 0x10d   : > { %1137 = vrot.lane.b32.xlu0 %v5488_v24, %s5051_s11 }
 0x10e   : > { %v762_v56 = vpop.permute.xlu1 %761 }
 0x10f   : > { %833 = vst.msk [vmem:[#allocation3 + $0xc8] sm:$0xff] %vm807_vm4, %v762_v56  ;;  %v768_v63 = vpop.permute.xlu0 %767 }
 0x110   : > { %1135 = vrot.lane.b32.xlu1 %v5496_v19, %s5051_s11  ;;  %836 = vst.msk [vmem:[#allocation3 + $0xe0] sm:$0xff] %vm807_vm4, %v768_v63 }
 0x111   : > { %1141 = vrot.lane.b32.xlu0 %v5504_v20, %s5051_s11 }
 0x112   : > { %v766_v34 = vpop.permute.xlu1 %765 }
 0x113   : > { %835 = vst.msk [vmem:[#allocation3 + $0xd8] sm:$0xff] %vm807_vm4, %v766_v34  ;;  %v772_v23 = vpop.permute.xlu0 %771  ;;  %v7607_v34 = vld [vmem:[#allocation47_spill] sm:$0xff] }
 0x114   : > { %1139 = vrot.lane.b32.xlu1 %v5512_v15, %s5051_s11  ;;  %838 = vst.msk [vmem:[#allocation3 + $0xf0] sm:$0xff] %vm807_vm4, %v772_v23  ;;  %v7596_v15 = vld [vmem:[#allocation34_spill] sm:$0xff]  ;;  %v7608_v23 = vld [vmem:[#allocation48_spill] sm:$0xff] }
 0x115   : > { %1145 = vrot.lane.b32.xlu0 %v5520_v16, %s5051_s11 }
 0x116   : > { %v770_v24 = vpop.permute.xlu1 %769 }
 0x117   : > { %837 = vst.msk [vmem:[#allocation3 + $0xe8] sm:$0xff] %vm807_vm4, %v770_v24  ;;  %v905_v19 = vpop.permute.xlu0 %904 }
 0x118   : > { %1143 = vrot.lane.b32.xlu1 %v5528_v11, %s5051_s11  ;;  %1001 = vst.msk [vmem:[#allocation3] sm:$0xff] %vm1000_vm5, %v905_v19  ;;  %v5875_v11 = vld [vmem:[#allocation2 + $0x181] sm:$0xff] }
 0x119   : > { %1149 = vrot.lane.b32.xlu0 %v5536_v12, %s5051_s11 }
 0x11a   : > { %v774_v20 = vpop.permute.xlu1 %773 }
 0x11b   : > { %839 = vst.msk [vmem:[#allocation3 + $0xf8] sm:$0xff] %vm807_vm4, %v774_v20  ;;  %v909_v3 = vpop.permute.xlu0 %908  ;;  %v7609_v20 = vld [vmem:[#allocation49_spill] sm:$0xff] }
 0x11c   : > { %1147 = vrot.lane.b32.xlu1 %v7596_v15, %s5051_s11  ;;  %1003 = vst.msk [vmem:[#allocation3 + $0x10] sm:$0xff] %vm1000_vm5, %v909_v3  ;;  %v7610_v15 = vld [vmem:[#allocation50_spill] sm:$0xff] }
 0x11d   : > { %1153 = vrot.lane.b32.xlu0 %v7597_v46, %s5051_s11  ;;  %v7611_v46 = vld [vmem:[#allocation51_spill] sm:$0xff] }
 0x11e   : > { %v907_v16 = vpop.permute.xlu1 %906 }
 0x11f   : > { %1002 = vst.msk [vmem:[#allocation3 + $0x8] sm:$0xff] %vm1000_vm5, %v907_v16  ;;  %v913_v12 = vpop.permute.xlu0 %912 }
 0x120   : > { %1151 = vrot.lane.b32.xlu1 %v7598_v10, %s5051_s11  ;;  %1005 = vst.msk [vmem:[#allocation3 + $0x20] sm:$0xff] %vm1000_vm5, %v913_v12  ;;  %v7612_v10 = vld [vmem:[#allocation52_spill] sm:$0xff] }
 0x121   : > { %1157 = vrot.lane.b32.xlu0 %v5875_v11, %s5051_s11 }
 0x122   : > { %v911_v2 = vpop.permute.xlu1 %910 }
 0x123   : > { %1004 = vst.msk [vmem:[#allocation3 + $0x18] sm:$0xff] %vm1000_vm5, %v911_v2  ;;  %v917_v25 = vpop.permute.xlu0 %916 }
 0x124   : > { %1155 = vrot.lane.b32.xlu1 %v7599_v49, %s5051_s11  ;;  %1007 = vst.msk [vmem:[#allocation3 + $0x30] sm:$0xff] %vm1000_vm5, %v917_v25  ;;  %v7613_v49 = vld [vmem:[#allocation53_spill] sm:$0xff]  ;;  %v7614_v25 = vld [vmem:[#allocation54_spill] sm:$0xff] }
 0x125   : > { %1290 = vrot.lane.b32.xlu0 %v7600_v27, %s5052_s12 }
 0x126   : > { %v915_v26 = vpop.permute.xlu1 %914 }
 0x127   : > { %1006 = vst.msk [vmem:[#allocation3 + $0x28] sm:$0xff] %vm1000_vm5, %v915_v26  ;;  %v921_v30 = vpop.permute.xlu0 %920 }
 0x128   : > { %1159 = vrot.lane.b32.xlu1 %v5885_v1, %s5051_s11  ;;  %1009 = vst.msk [vmem:[#allocation3 + $0x40] sm:$0xff] %vm1000_vm5, %v921_v30  ;;  %v7615_v30 = vld [vmem:[#allocation55_spill] sm:$0xff] }
 0x129   : > { %1294 = vrot.lane.b32.xlu0 %v7601_v32, %s5052_s12 }
 0x12a   : > { %v919_v31 = vpop.permute.xlu1 %918 }
 0x12b   : > { %1008 = vst.msk [vmem:[#allocation3 + $0x38] sm:$0xff] %vm1000_vm5, %v919_v31  ;;  %v925_v40 = vpop.permute.xlu0 %924  ;;  %v7616_v31 = vld [vmem:[#allocation56_spill] sm:$0xff] }
 0x12c   : > { %1292 = vrot.lane.b32.xlu1 %v7602_v39, %s5052_s12  ;;  %1011 = vst.msk [vmem:[#allocation3 + $0x50] sm:$0xff] %vm1000_vm5, %v925_v40  ;;  %v7617_v40 = vld [vmem:[#allocation57_spill] sm:$0xff] }
 0x12d   : > { %1298 = vrot.lane.b32.xlu0 %v7603_v42, %s5052_s12 }
 0x12e   : > { %v923_v41 = vpop.permute.xlu1 %922 }
 0x12f   : > { %1010 = vst.msk [vmem:[#allocation3 + $0x48] sm:$0xff] %vm1000_vm5, %v923_v41  ;;  %v929_v44 = vpop.permute.xlu0 %928  ;;  %v7618_v41 = vld [vmem:[#allocation58_spill] sm:$0xff] }
 0x130   : > { %1296 = vrot.lane.b32.xlu1 %v7604_v43, %s5052_s12  ;;  %1013 = vst.msk [vmem:[#allocation3 + $0x60] sm:$0xff] %vm1000_vm5, %v929_v44  ;;  %v7619_v44 = vld [vmem:[#allocation59_spill] sm:$0xff] }
 0x131   : > { %1302 = vrot.lane.b32.xlu0 %v7605_v50, %s5052_s12 }
 0x132   : > { %v927_v47 = vpop.permute.xlu1 %926 }
 0x133   : > { %1012 = vst.msk [vmem:[#allocation3 + $0x58] sm:$0xff] %vm1000_vm5, %v927_v47  ;;  %v933_v56 = vpop.permute.xlu0 %932  ;;  %v7620_v47 = vld [vmem:[#allocation60_spill] sm:$0xff] }
 0x134   : > { %1300 = vrot.lane.b32.xlu1 %v7606_v53, %s5052_s12  ;;  %1015 = vst.msk [vmem:[#allocation3 + $0x70] sm:$0xff] %vm1000_vm5, %v933_v56  ;;  %v7621_v56 = vld [vmem:[#allocation61_spill] sm:$0xff] }
 0x135   : > { %1306 = vrot.lane.b32.xlu0 %v7607_v34, %s5052_s12 }
 0x136   : > { %v931_v63 = vpop.permute.xlu1 %930 }
 0x137   : > { %1014 = vst.msk [vmem:[#allocation3 + $0x68] sm:$0xff] %vm1000_vm5, %v931_v63  ;;  %v937_v24 = vpop.permute.xlu0 %936  ;;  %v7622_v63 = vld [vmem:[#allocation62_spill] sm:$0xff] }
 0x138   : > { %1304 = vrot.lane.b32.xlu1 %v7608_v23, %s5052_s12  ;;  %1017 = vst.msk [vmem:[#allocation3 + $0x80] sm:$0xff] %vm1000_vm5, %v937_v24  ;;  %v7623_v24 = vld [vmem:[#allocation63_spill] sm:$0xff] }
 0x139   : > { %1310 = vrot.lane.b32.xlu0 %v7609_v20, %s5052_s12 }
 0x13a   : > { %v935_v19 = vpop.permute.xlu1 %934 }
 0x13b   : > { %1016 = vst.msk [vmem:[#allocation3 + $0x78] sm:$0xff] %vm1000_vm5, %v935_v19  ;;  %v941_v3 = vpop.permute.xlu0 %940  ;;  %v7624_v19 = vld [vmem:[#allocation64_spill] sm:$0xff] }
 0x13c   : > { %1308 = vrot.lane.b32.xlu1 %v7610_v15, %s5052_s12  ;;  %1019 = vst.msk [vmem:[#allocation3 + $0x90] sm:$0xff] %vm1000_vm5, %v941_v3  ;;  %v7625_v3 = vld [vmem:[#allocation65_spill] sm:$0xff] }
 0x13d   : > { %1314 = vrot.lane.b32.xlu0 %v7611_v46, %s5052_s12 }
 0x13e   : > { %v939_v16 = vpop.permute.xlu1 %938 }
 0x13f   : > { %1018 = vst.msk [vmem:[#allocation3 + $0x88] sm:$0xff] %vm1000_vm5, %v939_v16  ;;  %v945_v12 = vpop.permute.xlu0 %944 }
 0x140   : > { %1312 = vrot.lane.b32.xlu1 %v7612_v10, %s5052_s12  ;;  %1021 = vst.msk [vmem:[#allocation3 + $0xa0] sm:$0xff] %vm1000_vm5, %v945_v12  ;;  %v5975_v10 = vld [vmem:[#allocation2 + $0x182] sm:$0xff] }
 0x141   : > { %1318 = vrot.lane.b32.xlu0 %v7613_v49, %s5052_s12 }
 0x142   : > { %v943_v2 = vpop.permute.xlu1 %942 }
 0x143   : > { %1020 = vst.msk [vmem:[#allocation3 + $0x98] sm:$0xff] %vm1000_vm5, %v943_v2  ;;  %v949_v26 = vpop.permute.xlu0 %948  ;;  %v5985_v2 = vld [vmem:[#allocation2 + $0x18a] sm:$0xff] }
 0x144   : > { %1316 = vrot.lane.b32.xlu1 %v7614_v25, %s5052_s12  ;;  %1023 = vst.msk [vmem:[#allocation3 + $0xb0] sm:$0xff] %vm1000_vm5, %v949_v26 }
 0x145   : > { %1322 = vrot.lane.b32.xlu0 %v7615_v30, %s5052_s12 }
 0x146   : > { %v947_v27 = vpop.permute.xlu1 %946 }
 0x147   : > { %1022 = vst.msk [vmem:[#allocation3 + $0xa8] sm:$0xff] %vm1000_vm5, %v947_v27  ;;  %v953_v32 = vpop.permute.xlu0 %952 }
 0x148   : > { %1320 = vrot.lane.b32.xlu1 %v7616_v31, %s5052_s12  ;;  %1025 = vst.msk [vmem:[#allocation3 + $0xc0] sm:$0xff] %vm1000_vm5, %v953_v32  ;;  %v2034_v31 = vld [vmem:[%s7464_s1 + $0x18] sm:$0xff] }
 0x149   : > { %1326 = vrot.lane.b32.xlu0 %v7617_v40, %s5052_s12  ;;  %v2036_v40 = vld [vmem:[%s7464_s1 + $0x28] sm:$0xff] }
 0x14a   : > { %v951_v39 = vpop.permute.xlu1 %950 }
 0x14b   : > { %1024 = vst.msk [vmem:[#allocation3 + $0xb8] sm:$0xff] %vm1000_vm5, %v951_v39  ;;  %v957_v42 = vpop.permute.xlu0 %956  ;;  %v2035_v39 = vld [vmem:[%s7464_s1 + $0x20] sm:$0xff] }
 0x14c   : > { %1324 = vrot.lane.b32.xlu1 %v7618_v41, %s5052_s12  ;;  %1027 = vst.msk [vmem:[#allocation3 + $0xd0] sm:$0xff] %vm1000_vm5, %v957_v42  ;;  %v2037_v42 = vld [vmem:[%s7464_s1 + $0x30] sm:$0xff] }
 0x14d   : > { %1330 = vrot.lane.b32.xlu0 %v7619_v44, %s5052_s12 }
 0x14e   : > { %v955_v43 = vpop.permute.xlu1 %954 }
 0x14f   : > { %1026 = vst.msk [vmem:[#allocation3 + $0xc8] sm:$0xff] %vm1000_vm5, %v955_v43  ;;  %v961_v50 = vpop.permute.xlu0 %960  ;;  %v2038_v43 = vld [vmem:[%s7464_s1 + $0x38] sm:$0xff] }
 0x150   : > { %1328 = vrot.lane.b32.xlu1 %v7620_v47, %s5052_s12  ;;  %1029 = vst.msk [vmem:[#allocation3 + $0xe0] sm:$0xff] %vm1000_vm5, %v961_v50  ;;  %v5002_v44 = vpack.c.bf16 %v2038_v43, %v2037_v42  ;;  %v1806_v50 = vld [vmem:[#allocation2 + $0x32] sm:$0xff]  ;;  %v1819_v43 = vld [vmem:[#allocation2 + $0xca] sm:$0xff] }
 0x151   : > { %1334 = vrot.lane.b32.xlu0 %v7621_v56, %s5052_s12  ;;  %v1614_v56 = vld [vmem:[#allocation2 + $0x39] sm:$0xff] }
 0x152   : > { %v959_v53 = vpop.permute.xlu1 %958 }
 0x153   : > { %1028 = vst.msk [vmem:[#allocation3 + $0xd8] sm:$0xff] %vm1000_vm5, %v959_v53  ;;  %v965_v34 = vpop.permute.xlu0 %964  ;;  %v2039_v53 = vld [vmem:[%s7464_s1 + $0x40] sm:$0xff] }
 0x154   : > { %1332 = vrot.lane.b32.xlu1 %v7622_v63, %s5052_s12  ;;  %1031 = vst.msk [vmem:[#allocation3 + $0xf0] sm:$0xff] %vm1000_vm5, %v965_v34  ;;  %v1615_v34 = vld [vmem:[#allocation2 + $0x49] sm:$0xff] }
 0x155   : > { %1338 = vrot.lane.b32.xlu0 %v7623_v24, %s5052_s12  ;;  %v1807_v24 = vld [vmem:[#allocation2 + $0x3a] sm:$0xff] }
 0x156   : > { %v963_v23 = vpop.permute.xlu1 %962 }
 0x157   : > { %1030 = vst.msk [vmem:[#allocation3 + $0xe8] sm:$0xff] %vm1000_vm5, %v963_v23  ;;  %v1098_v20 = vpop.permute.xlu0 %1097 }
 0x158   : > { %1336 = vrot.lane.b32.xlu1 %v7624_v19, %s5052_s12  ;;  %1194 = vst.msk [vmem:[#allocation3] sm:$0xff] %vm1193_vm6, %v1098_v20  ;;  %v1808_v19 = vld [vmem:[#allocation2 + $0x4a] sm:$0xff] }
 0x159   : > { %1342 = vrot.lane.b32.xlu0 %v5669_v5, %s5052_s12 }
 0x15a   : > { %v967_v15 = vpop.permute.xlu1 %966 }
 0x15b   : > { %1032 = vst.msk [vmem:[#allocation3 + $0xf8] sm:$0xff] %vm1000_vm5, %v967_v15  ;;  %v1102_v16 = vpop.permute.xlu0 %1101  ;;  %v1616_v15 = vld [vmem:[#allocation2 + $0x51] sm:$0xff] }
 0x15c   : > { %1340 = vrot.lane.b32.xlu1 %v7625_v3, %s5052_s12  ;;  %1196 = vst.msk [vmem:[#allocation3 + $0x10] sm:$0xff] %vm1193_vm6, %v1102_v16  ;;  %v1617_v16 = vld [vmem:[#allocation2 + $0x61] sm:$0xff] }
 0x15d   : > { %1346 = vrot.lane.b32.xlu0 %v5679_v6, %s5052_s12 }
 0x15e   : > { %v1100_v46 = vpop.permute.xlu1 %1099 }
 0x15f   : > { %1195 = vst.msk [vmem:[#allocation3 + $0x8] sm:$0xff] %vm1193_vm6, %v1100_v46  ;;  %v1106_v5 = vpop.permute.xlu0 %1105 }
 0x160   : > { %1344 = vrot.lane.b32.xlu1 %v5683_v4, %s5052_s12  ;;  %1198 = vst.msk [vmem:[#allocation3 + $0x20] sm:$0xff] %vm1193_vm6, %v1106_v5  ;;  %v1809_v5 = vld [vmem:[#allocation2 + $0x52] sm:$0xff] }
 0x161   : > { %1350 = vrot.lane.b32.xlu0 %v5975_v10, %s5052_s12 }
 0x162   : > { %v1104_v12 = vpop.permute.xlu1 %1103 }
 0x163   : > { %1197 = vst.msk [vmem:[#allocation3 + $0x18] sm:$0xff] %vm1193_vm6, %v1104_v12  ;;  %v1110_v6 = vpop.permute.xlu0 %1109 }
 0x164   : > { %1348 = vrot.lane.b32.xlu1 %v5691_v9, %s5052_s12  ;;  %1200 = vst.msk [vmem:[#allocation3 + $0x30] sm:$0xff] %vm1193_vm6, %v1110_v6  ;;  %v1810_v6 = vld [vmem:[#allocation2 + $0x62] sm:$0xff] }
 0x165   : > { %1484 = vrot.lane.b32.xlu0 %v5378_v51, %s5053_s13 }
 0x166   : > { %v1108_v49 = vpop.permute.xlu1 %1107 }
 0x167   : > { %1199 = vst.msk [vmem:[#allocation3 + $0x28] sm:$0xff] %vm1193_vm6, %v1108_v49  ;;  %v1114_v4 = vpop.permute.xlu0 %1113 }
 0x168   : > { %1352 = vrot.lane.b32.xlu1 %v5985_v2, %s5052_s12  ;;  %1202 = vst.msk [vmem:[#allocation3 + $0x40] sm:$0xff] %vm1193_vm6, %v1114_v4  ;;  %v1618_v4 = vld [vmem:[#allocation2 + $0x69] sm:$0xff] }
 0x169   : > { %1488 = vrot.lane.b32.xlu0 %v5390_v54, %s5053_s13 }
 0x16a   : > { %v1112_v25 = vpop.permute.xlu1 %1111 }
 0x16b   : > { %1201 = vst.msk [vmem:[#allocation3 + $0x38] sm:$0xff] %vm1193_vm6, %v1112_v25  ;;  %v1118_v9 = vpop.permute.xlu0 %1117 }
 0x16c   : > { %1486 = vrot.lane.b32.xlu1 %v5380_v52, %s5053_s13  ;;  %1204 = vst.msk [vmem:[#allocation3 + $0x50] sm:$0xff] %vm1193_vm6, %v1118_v9  ;;  %v1619_v9 = vld [vmem:[#allocation2 + $0x79] sm:$0xff] }
 0x16d   : > { %1492 = vrot.lane.b32.xlu0 %v5400_v57, %s5053_s13 }
 0x16e   : > { %v1116_v51 = vpop.permute.xlu1 %1115 }
 0x16f   : > { %1203 = vst.msk [vmem:[#allocation3 + $0x48] sm:$0xff] %vm1193_vm6, %v1116_v51  ;;  %v1122_v26 = vpop.permute.xlu0 %1121 }
 0x170   : > { %1490 = vrot.lane.b32.xlu1 %v5392_v55, %s5053_s13  ;;  %1206 = vst.msk [vmem:[#allocation3 + $0x60] sm:$0xff] %vm1193_vm6, %v1122_v26  ;;  %v1811_v26 = vld [vmem:[#allocation2 + $0x6a] sm:$0xff] }
 0x171   : > { %1496 = vrot.lane.b32.xlu0 %v5404_v59, %s5053_s13 }
 0x172   : > { %v1120_v54 = vpop.permute.xlu1 %1119 }
 0x173   : > { %1205 = vst.msk [vmem:[#allocation3 + $0x58] sm:$0xff] %vm1193_vm6, %v1120_v54  ;;  %v1126_v52 = vpop.permute.xlu0 %1125 }
 0x174   : > { %1494 = vrot.lane.b32.xlu1 %v5402_v58, %s5053_s13  ;;  %1208 = vst.msk [vmem:[#allocation3 + $0x70] sm:$0xff] %vm1193_vm6, %v1126_v52  ;;  %v1812_v52 = vld [vmem:[#allocation2 + $0x7a] sm:$0xff] }
 0x175   : > { %1500 = vrot.lane.b32.xlu0 %v5416_v61, %s5053_s13 }
 0x176   : > { %v1124_v57 = vpop.permute.xlu1 %1123 }
 0x177   : > { %1207 = vst.msk [vmem:[#allocation3 + $0x68] sm:$0xff] %vm1193_vm6, %v1124_v57  ;;  %v1130_v55 = vpop.permute.xlu0 %1129 }
 0x178   : > { %1498 = vrot.lane.b32.xlu1 %v5414_v60, %s5053_s13  ;;  %1210 = vst.msk [vmem:[#allocation3 + $0x80] sm:$0xff] %vm1193_vm6, %v1130_v55  ;;  %v1620_v55 = vld [vmem:[#allocation2 + $0x81] sm:$0xff] }
 0x179   : > { %1504 = vrot.lane.b32.xlu0 %v5428_v0, %s5053_s13 }
 0x17a   : > { %v1128_v59 = vpop.permute.xlu1 %1127 }
 0x17b   : > { %1209 = vst.msk [vmem:[#allocation3 + $0x78] sm:$0xff] %vm1193_vm6, %v1128_v59  ;;  %v1134_v58 = vpop.permute.xlu0 %1133 }
 0x17c   : > { %1502 = vrot.lane.b32.xlu1 %v5418_v62, %s5053_s13  ;;  %1212 = vst.msk [vmem:[#allocation3 + $0x90] sm:$0xff] %vm1193_vm6, %v1134_v58  ;;  %v1621_v58 = vld [vmem:[#allocation2 + $0x91] sm:$0xff] }
 0x17d   : > { %1508 = vrot.lane.b32.xlu0 %v5432_v8, %s5053_s13 }
 0x17e   : > { %v1132_v61 = vpop.permute.xlu1 %1131 }
 0x17f   : > { %1211 = vst.msk [vmem:[#allocation3 + $0x88] sm:$0xff] %vm1193_vm6, %v1132_v61  ;;  %v1138_v60 = vpop.permute.xlu0 %1137 }
 0x180   : > { %1506 = vrot.lane.b32.xlu1 %v5430_v7, %s5053_s13  ;;  %1214 = vst.msk [vmem:[#allocation3 + $0xa0] sm:$0xff] %vm1193_vm6, %v1138_v60  ;;  %v1813_v60 = vld [vmem:[#allocation2 + $0x82] sm:$0xff] }
 0x181   : > { %1512 = vrot.lane.b32.xlu0 %v5444_v48, %s5053_s13 }
 0x182   : > { %v1136_v0 = vpop.permute.xlu1 %1135 }
 0x183   : > { %1213 = vst.msk [vmem:[#allocation3 + $0x98] sm:$0xff] %vm1193_vm6, %v1136_v0  ;;  %v1142_v62 = vpop.permute.xlu0 %1141 }
 0x184   : > { %1510 = vrot.lane.b32.xlu1 %v5442_v45, %s5053_s13  ;;  %1216 = vst.msk [vmem:[#allocation3 + $0xb0] sm:$0xff] %vm1193_vm6, %v1142_v62  ;;  %v1814_v62 = vld [vmem:[#allocation2 + $0x92] sm:$0xff] }
 0x185   : > { %1516 = vrot.lane.b32.xlu0 %v5454_v38, %s5053_s13 }
 0x186   : > { %v1140_v8 = vpop.permute.xlu1 %1139 }
 0x187   : > { %1215 = vst.msk [vmem:[#allocation3 + $0xa8] sm:$0xff] %vm1193_vm6, %v1140_v8  ;;  %v1146_v7 = vpop.permute.xlu0 %1145 }
 0x188   : > { %1514 = vrot.lane.b32.xlu1 %v5446_v37, %s5053_s13  ;;  %1218 = vst.msk [vmem:[#allocation3 + $0xc0] sm:$0xff] %vm1193_vm6, %v1146_v7  ;;  %v2031_v37 = vld [vmem:[%s7464_s1] sm:$0xff] }
 0x189   : > { %1520 = vrot.lane.b32.xlu0 %v5458_v36, %s5053_s13  ;;  %v2032_v36 = vld [vmem:[%s7464_s1 + $0x8] sm:$0xff]  ;;  %v1622_v7 = vld [vmem:[#allocation2 + $0x99] sm:$0xff] }
 0x18a   : > { %v1144_v48 = vpop.permute.xlu1 %1143  ;;  %v4990_v27 = vpack.c.bf16 %v2032_v36, %v2031_v37  ;;  %v1815_v37 = vld [vmem:[#allocation2 + $0x9a] sm:$0xff] }
 0x18b   : > { %1217 = vst.msk [vmem:[#allocation3 + $0xb8] sm:$0xff] %vm1193_vm6, %v1144_v48  ;;  %v1150_v45 = vpop.permute.xlu0 %1149 }
 0x18c   : > { %1518 = vrot.lane.b32.xlu1 %v5456_v35, %s5053_s13  ;;  %1220 = vst.msk [vmem:[#allocation3 + $0xd0] sm:$0xff] %vm1193_vm6, %v1150_v45  ;;  %4991 = vmatprep.subr.bf16.mxu0 %v4990_v27  ;;  %v1623_v45 = vld [vmem:[#allocation2 + $0xa9] sm:$0xff] }
 0x18d   : > { %1524 = vrot.lane.b32.xlu0 %v5476_v28, %s5053_s13  ;;  %4993 = vmatpush3.bf16.msra.mxu0 %v4990_v27  ;;  %v2033_v28 = vld [vmem:[%s7464_s1 + $0x10] sm:$0xff] }
 0x18e   : > { %v1148_v38 = vpop.permute.xlu1 %1147  ;;  %v1816_v27 = vld [vmem:[#allocation2 + $0xaa] sm:$0xff] }
 0x18f   : > { %1219 = vst.msk [vmem:[#allocation3 + $0xc8] sm:$0xff] %vm1193_vm6, %v1148_v38  ;;  %v1154_v35 = vpop.permute.xlu0 %1153 }
 0x190   : > { %1522 = vrot.lane.b32.xlu1 %v5468_v33, %s5053_s13  ;;  %1222 = vst.msk [vmem:[#allocation3 + $0xe0] sm:$0xff] %vm1193_vm6, %v1154_v35  ;;  %v4994_v33 = vpack.c.bf16 %v2034_v31, %v2033_v28  ;;  %v1625_v31 = vld [vmem:[#allocation2 + $0xc1] sm:$0xff] }
 0x191   : > { %1528 = vrot.lane.b32.xlu0 %v5492_v21, %s5053_s13 }
 0x192   : > { %v1152_v30 = vpop.permute.xlu1 %1151  ;;  %4995 = vmatprep.subr.bf16.mxu0 %v4994_v33 }
 0x193   : > { %1221 = vst.msk [vmem:[#allocation3 + $0xd8] sm:$0xff] %vm1193_vm6, %v1152_v30  ;;  %v1158_v32 = vpop.permute.xlu0 %1157  ;;  %4997 = vmatpush3.bf16.msra.mxu0 %v4994_v33  ;;  %v1624_v30 = vld [vmem:[#allocation2 + $0xb1] sm:$0xff] }
 0x194   : > { %1526 = vrot.lane.b32.xlu1 %v5478_v29, %s5053_s13  ;;  %1224 = vst.msk [vmem:[#allocation3 + $0xf0] sm:$0xff] %vm1193_vm6, %v1158_v32  ;;  %v4998_v29 = vpack.c.bf16 %v2036_v40, %v2035_v39  ;;  %v1817_v32 = vld [vmem:[#allocation2 + $0xb2] sm:$0xff]  ;;  %v1818_v39 = vld [vmem:[#allocation2 + $0xc2] sm:$0xff] }
 0x195   : > { %1532 = vrot.lane.b32.xlu0 %v5508_v17, %s5053_s13 }
 0x196   : > { %v1156_v21 = vpop.permute.xlu1 %1155  ;;  %4999 = vmatprep.subr.bf16.mxu0 %v4998_v29 }
 0x197   : > { %1223 = vst.msk [vmem:[#allocation3 + $0xe8] sm:$0xff] %vm1193_vm6, %v1156_v21  ;;  %v1291_v41 = vpop.permute.xlu0 %1290  ;;  %5001 = vmatpush3.bf16.msra.mxu0 %v4998_v29  ;;  %v1626_v29 = vld [vmem:[#allocation2 + $0xc9] sm:$0xff] }
 0x198   : > { %1530 = vrot.lane.b32.xlu1 %v5494_v22, %s5053_s13  ;;  %1387 = vst.msk [vmem:[#allocation3] sm:$0xff] %vm1386_vm7, %v1291_v41  ;;  %v1613_v22 = vld [vmem:[#allocation2 + $0x31] sm:$0xff]  ;;  %5003 = vmatprep.subr.bf16.mxu0 %v5002_v44 }
 0x199   : > { %1536 = vrot.lane.b32.xlu0 %v5524_v13, %s5053_s13 }
 0x19a   : > { %v1160_v17 = vpop.permute.xlu1 %1159 }
 0x19b   : > { %1225 = vst.msk [vmem:[#allocation3 + $0xf8] sm:$0xff] %vm1193_vm6, %v1160_v17  ;;  %v1295_v47 = vpop.permute.xlu0 %1294  ;;  %5005 = vmatpush3.bf16.msra.mxu0 %v5002_v44  ;;  %v1627_v17 = vld [vmem:[#allocation2 + $0xd9] sm:$0xff] }
 0x19c   : > { %1534 = vrot.lane.b32.xlu1 %v5510_v18, %s5053_s13  ;;  %1389 = vst.msk [vmem:[#allocation3 + $0x10] sm:$0xff] %vm1386_vm7, %v1295_v47  ;;  %4874 = vmatprep.subr.mxu0 %v2039_v53  ;;  %v1820_v44 = vld [vmem:[#allocation2 + $0xda] sm:$0xff] }
 0x19d   : > { %1677 = vrot.lane.b32.xlu0 %v1613_v22, %s5054_s16 }
 0x19e   : > { %v1293_v13 = vpop.permute.xlu1 %1292 }
 0x19f   : > { %1388 = vst.msk [vmem:[#allocation3 + $0x8] sm:$0xff] %vm1386_vm7, %v1293_v13  ;;  %v1299_v18 = vpop.permute.xlu0 %1298  ;;  %4875 = vmatpush3.msra.mxu0 %v2039_v53  ;;  %v1628_v13 = vld [vmem:[#allocation2 + $0xe1] sm:$0xff]  ;;  %v1629_v53 = vld [vmem:[#allocation2 + $0xf1] sm:$0xff] }
 0x1a0   : > { %1538 = vrot.lane.b32.xlu1 %v5526_v14, %s5053_s13  ;;  %1391 = vst.msk [vmem:[#allocation3 + $0x20] sm:$0xff] %vm1386_vm7, %v1299_v18 }
 0x1a1   : > { %1870 = vrot.lane.b32.xlu0 %v1806_v50, %s5055_s19 }
 0x1a2   : > { %v1297_v63 = vpop.permute.xlu1 %1296 }
 0x1a3   : > { %1390 = vst.msk [vmem:[#allocation3 + $0x18] sm:$0xff] %vm1386_vm7, %v1297_v63  ;;  %v1303_v23 = vpop.permute.xlu0 %1302 }
 0x1a4   : > { %1679 = vrot.lane.b32.xlu1 %v1614_v56, %s5054_s16  ;;  %1393 = vst.msk [vmem:[#allocation3 + $0x30] sm:$0xff] %vm1386_vm7, %v1303_v23  ;;  %v1821_v56 = vld [vmem:[#allocation2 + $0xe2] sm:$0xff] }
 0x1a5   : > { %1681 = vrot.lane.b32.xlu0 %v1615_v34, %s5054_s16  ;;  %v1822_v34 = vld [vmem:[#allocation2 + $0xf2] sm:$0xff] }
 0x1a6   : > { %v1301_v14 = vpop.permute.xlu1 %1300 }
 0x1a7   : > { %1392 = vst.msk [vmem:[#allocation3 + $0x28] sm:$0xff] %vm1386_vm7, %v1301_v14  ;;  %v1307_v20 = vpop.permute.xlu0 %1306 }
 0x1a8   : > { %1872 = vrot.lane.b32.xlu1 %v1807_v24, %s5055_s19  ;;  %1395 = vst.msk [vmem:[#allocation3 + $0x40] sm:$0xff] %vm1386_vm7, %v1307_v20  ;;  %v1630_v24 = vld [vmem:[#allocation2 + $0xf9] sm:$0xff] }
 0x1a9   : > { %1874 = vrot.lane.b32.xlu0 %v1808_v19, %s5055_s19  ;;  %v1631_v19 = vld [vmem:[#allocation2 + $0x109] sm:$0xff] }
 0x1aa   : > { %v1305_v3 = vpop.permute.xlu1 %1304 }
 0x1ab   : > { %1394 = vst.msk [vmem:[#allocation3 + $0x38] sm:$0xff] %vm1386_vm7, %v1305_v3  ;;  %v1311_v46 = vpop.permute.xlu0 %1310 }
 0x1ac   : > { %1683 = vrot.lane.b32.xlu1 %v1616_v15, %s5054_s16  ;;  %1397 = vst.msk [vmem:[#allocation3 + $0x50] sm:$0xff] %vm1386_vm7, %v1311_v46  ;;  %v1823_v15 = vld [vmem:[#allocation2 + $0xfa] sm:$0xff] }
 0x1ad   : > { %1685 = vrot.lane.b32.xlu0 %v1617_v16, %s5054_s16  ;;  %v1824_v16 = vld [vmem:[#allocation2 + $0x10a] sm:$0xff] }
 0x1ae   : > { %v1309_v12 = vpop.permute.xlu1 %1308 }
 0x1af   : > { %1396 = vst.msk [vmem:[#allocation3 + $0x48] sm:$0xff] %vm1386_vm7, %v1309_v12  ;;  %v1315_v49 = vpop.permute.xlu0 %1314 }
 0x1b0   : > { %1876 = vrot.lane.b32.xlu1 %v1809_v5, %s5055_s19  ;;  %1399 = vst.msk [vmem:[#allocation3 + $0x60] sm:$0xff] %vm1386_vm7, %v1315_v49  ;;  %v1632_v5 = vld [vmem:[#allocation2 + $0x111] sm:$0xff] }
 0x1b1   : > { %1878 = vrot.lane.b32.xlu0 %v1810_v6, %s5055_s19  ;;  %v1633_v6 = vld [vmem:[#allocation2 + $0x121] sm:$0xff] }
 0x1b2   : > { %v1313_v25 = vpop.permute.xlu1 %1312 }
 0x1b3   : > { %1398 = vst.msk [vmem:[#allocation3 + $0x58] sm:$0xff] %vm1386_vm7, %v1313_v25  ;;  %v1319_v51 = vpop.permute.xlu0 %1318 }
 0x1b4   : > { %1687 = vrot.lane.b32.xlu1 %v1618_v4, %s5054_s16  ;;  %1401 = vst.msk [vmem:[#allocation3 + $0x70] sm:$0xff] %vm1386_vm7, %v1319_v51  ;;  %v1825_v4 = vld [vmem:[#allocation2 + $0x112] sm:$0xff] }
 0x1b5   : > { %1689 = vrot.lane.b32.xlu0 %v1619_v9, %s5054_s16  ;;  %v1826_v9 = vld [vmem:[#allocation2 + $0x122] sm:$0xff] }
 0x1b6   : > { %v1317_v54 = vpop.permute.xlu1 %1316 }
 0x1b7   : > { %1400 = vst.msk [vmem:[#allocation3 + $0x68] sm:$0xff] %vm1386_vm7, %v1317_v54  ;;  %v1323_v57 = vpop.permute.xlu0 %1322 }
 0x1b8   : > { %1880 = vrot.lane.b32.xlu1 %v1811_v26, %s5055_s19  ;;  %1403 = vst.msk [vmem:[#allocation3 + $0x80] sm:$0xff] %vm1386_vm7, %v1323_v57  ;;  %v1634_v26 = vld [vmem:[#allocation2 + $0x129] sm:$0xff] }
 0x1b9   : > { %1882 = vrot.lane.b32.xlu0 %v1812_v52, %s5055_s19  ;;  %v1635_v52 = vld [vmem:[#allocation2 + $0x139] sm:$0xff] }
 0x1ba   : > { %v1321_v59 = vpop.permute.xlu1 %1320 }
 0x1bb   : > { %1402 = vst.msk [vmem:[#allocation3 + $0x78] sm:$0xff] %vm1386_vm7, %v1321_v59  ;;  %v1327_v61 = vpop.permute.xlu0 %1326 }
 0x1bc   : > { %1691 = vrot.lane.b32.xlu1 %v1620_v55, %s5054_s16  ;;  %1405 = vst.msk [vmem:[#allocation3 + $0x90] sm:$0xff] %vm1386_vm7, %v1327_v61  ;;  %v1827_v55 = vld [vmem:[#allocation2 + $0x12a] sm:$0xff] }
 0x1bd   : > { %1693 = vrot.lane.b32.xlu0 %v1621_v58, %s5054_s16  ;;  %v1828_v58 = vld [vmem:[#allocation2 + $0x13a] sm:$0xff] }
 0x1be   : > { %v1325_v0 = vpop.permute.xlu1 %1324 }
 0x1bf   : > { %1404 = vst.msk [vmem:[#allocation3 + $0x88] sm:$0xff] %vm1386_vm7, %v1325_v0  ;;  %v1331_v8 = vpop.permute.xlu0 %1330 }
 0x1c0   : > { %1884 = vrot.lane.b32.xlu1 %v1813_v60, %s5055_s19  ;;  %1407 = vst.msk [vmem:[#allocation3 + $0xa0] sm:$0xff] %vm1386_vm7, %v1331_v8  ;;  %v1636_v60 = vld [vmem:[#allocation2 + $0x141] sm:$0xff] }
 0x1c1   : > { %1886 = vrot.lane.b32.xlu0 %v1814_v62, %s5055_s19  ;;  %v1637_v62 = vld [vmem:[#allocation2 + $0x151] sm:$0xff] }
 0x1c2   : > { %v1329_v48 = vpop.permute.xlu1 %1328 }
 0x1c3   : > { %1406 = vst.msk [vmem:[#allocation3 + $0x98] sm:$0xff] %vm1386_vm7, %v1329_v48  ;;  %v1335_v38 = vpop.permute.xlu0 %1334 }
 0x1c4   : > { %1695 = vrot.lane.b32.xlu1 %v1622_v7, %s5054_s16  ;;  %1409 = vst.msk [vmem:[#allocation3 + $0xb0] sm:$0xff] %vm1386_vm7, %v1335_v38  ;;  %v1829_v7 = vld [vmem:[#allocation2 + $0x142] sm:$0xff] }
 0x1c5   : > { %1697 = vrot.lane.b32.xlu0 %v1623_v45, %s5054_s16  ;;  %v1830_v45 = vld [vmem:[#allocation2 + $0x152] sm:$0xff] }
 0x1c6   : > { %v1333_v36 = vpop.permute.xlu1 %1332 }
 0x1c7   : > { %1408 = vst.msk [vmem:[#allocation3 + $0xa8] sm:$0xff] %vm1386_vm7, %v1333_v36  ;;  %v1339_v35 = vpop.permute.xlu0 %1338 }
 0x1c8   : > { %1888 = vrot.lane.b32.xlu1 %v1815_v37, %s5055_s19  ;;  %1411 = vst.msk [vmem:[#allocation3 + $0xc0] sm:$0xff] %vm1386_vm7, %v1339_v35  ;;  %v1638_v37 = vld [vmem:[#allocation2 + $0x159] sm:$0xff] }
 0x1c9   : > { %1890 = vrot.lane.b32.xlu0 %v1816_v27, %s5055_s19  ;;  %v1639_v27 = vld [vmem:[#allocation2 + $0x169] sm:$0xff] }
 0x1ca   : > { %v1337_v28 = vpop.permute.xlu1 %1336 }
 0x1cb   : > { %1410 = vst.msk [vmem:[#allocation3 + $0xb8] sm:$0xff] %vm1386_vm7, %v1337_v28  ;;  %v1343_v33 = vpop.permute.xlu0 %1342 }
 0x1cc   : > { %1699 = vrot.lane.b32.xlu1 %v1624_v30, %s5054_s16  ;;  %1413 = vst.msk [vmem:[#allocation3 + $0xd0] sm:$0xff] %vm1386_vm7, %v1343_v33  ;;  %v1831_v30 = vld [vmem:[#allocation2 + $0x15a] sm:$0xff] }
 0x1cd   : > { %1701 = vrot.lane.b32.xlu0 %v1625_v31, %s5054_s16  ;;  %v1832_v31 = vld [vmem:[#allocation2 + $0x16a] sm:$0xff] }
 0x1ce   : > { %v1341_v21 = vpop.permute.xlu1 %1340 }
 0x1cf   : > { %1412 = vst.msk [vmem:[#allocation3 + $0xc8] sm:$0xff] %vm1386_vm7, %v1341_v21  ;;  %v1347_v40 = vpop.permute.xlu0 %1346 }
 0x1d0   : > { %1892 = vrot.lane.b32.xlu1 %v1817_v32, %s5055_s19  ;;  %1415 = vst.msk [vmem:[#allocation3 + $0xe0] sm:$0xff] %vm1386_vm7, %v1347_v40  ;;  %v1640_v32 = vld [vmem:[#allocation2 + $0x171] sm:$0xff] }
 0x1d1   : > { %1894 = vrot.lane.b32.xlu0 %v1818_v39, %s5055_s19  ;;  %v1448_v39 = vld [vmem:[#allocation2 + $0x180] sm:$0xff] }
 0x1d2   : > { %v1345_v41 = vpop.permute.xlu1 %1344 }
 0x1d3   : > { %1414 = vst.msk [vmem:[#allocation3 + $0xd8] sm:$0xff] %vm1386_vm7, %v1345_v41  ;;  %v1351_v42 = vpop.permute.xlu0 %1350 }
 0x1d4   : > { %1703 = vrot.lane.b32.xlu1 %v1626_v29, %s5054_s16  ;;  %1417 = vst.msk [vmem:[#allocation3 + $0xf0] sm:$0xff] %vm1386_vm7, %v1351_v42  ;;  %v1833_v29 = vld [vmem:[#allocation2 + $0x172] sm:$0xff]  ;;  %v1449_v42 = vld [vmem:[#allocation2 + $0x188] sm:$0xff] }
 0x1d5   : > { %1705 = vrot.lane.b32.xlu0 %v1627_v17, %s5054_s16 }
 0x1d6   : > { %v1349_v22 = vpop.permute.xlu1 %1348 }
 0x1d7   : > { %1416 = vst.msk [vmem:[#allocation3 + $0xe8] sm:$0xff] %vm1386_vm7, %v1349_v22  ;;  %v1485_v47 = vpop.permute.xlu0 %1484 }
 0x1d8   : > { %1896 = vrot.lane.b32.xlu1 %v1819_v43, %s5055_s19  ;;  %1581 = vst.msk [vmem:[#allocation3] sm:$0xff] %vm1580_vm8, %v1485_v47  ;;  %v1450_v47 = vld [vmem:[#allocation2 + $0x198] sm:$0xff] }
 0x1d9   : > { %1898 = vrot.lane.b32.xlu0 %v1820_v44, %s5055_s19 }
 0x1da   : > { %v1353_v50 = vpop.permute.xlu1 %1352 }
 0x1db   : > { %1418 = vst.msk [vmem:[#allocation3 + $0xf8] sm:$0xff] %vm1386_vm7, %v1353_v50  ;;  %v1489_v18 = vpop.permute.xlu0 %1488 }
 0x1dc   : > { %1707 = vrot.lane.b32.xlu1 %v1628_v13, %s5054_s16  ;;  %1583 = vst.msk [vmem:[#allocation3 + $0x10] sm:$0xff] %vm1580_vm8, %v1489_v18 }
 0x1dd   : > { %1709 = vrot.lane.b32.xlu0 %v1629_v53, %s5054_s16  ;;  %v1451_v53 = vld [vmem:[#allocation2 + $0x1a0] sm:$0xff] }
 0x1de   : > { %v1487_v63 = vpop.permute.xlu1 %1486 }
 0x1df   : > { %1582 = vst.msk [vmem:[#allocation3 + $0x8] sm:$0xff] %vm1580_vm8, %v1487_v63  ;;  %v1493_v23 = vpop.permute.xlu0 %1492 }
 0x1e0   : > { %1900 = vrot.lane.b32.xlu1 %v1821_v56, %s5055_s19  ;;  %1585 = vst.msk [vmem:[#allocation3 + $0x20] sm:$0xff] %vm1580_vm8, %v1493_v23 }
 0x1e1   : > { %1902 = vrot.lane.b32.xlu0 %v1822_v34, %s5055_s19 }
 0x1e2   : > { %v1491_v14 = vpop.permute.xlu1 %1490 }
 0x1e3   : > { %1584 = vst.msk [vmem:[#allocation3 + $0x18] sm:$0xff] %vm1580_vm8, %v1491_v14  ;;  %v1497_v20 = vpop.permute.xlu0 %1496 }
 0x1e4   : > { %1711 = vrot.lane.b32.xlu1 %v1630_v24, %s5054_s16  ;;  %1587 = vst.msk [vmem:[#allocation3 + $0x30] sm:$0xff] %vm1580_vm8, %v1497_v20 }
 0x1e5   : > { %1713 = vrot.lane.b32.xlu0 %v1631_v19, %s5054_s16 }
 0x1e6   : > { %v1495_v3 = vpop.permute.xlu1 %1494 }
 0x1e7   : > { %1586 = vst.msk [vmem:[#allocation3 + $0x28] sm:$0xff] %vm1580_vm8, %v1495_v3  ;;  %v1501_v46 = vpop.permute.xlu0 %1500 }
 0x1e8   : > { %1904 = vrot.lane.b32.xlu1 %v1823_v15, %s5055_s19  ;;  %1589 = vst.msk [vmem:[#allocation3 + $0x40] sm:$0xff] %vm1580_vm8, %v1501_v46 }
 0x1e9   : > { %1906 = vrot.lane.b32.xlu0 %v1824_v16, %s5055_s19 }
 0x1ea   : > { %v1499_v12 = vpop.permute.xlu1 %1498 }
 0x1eb   : > { %1588 = vst.msk [vmem:[#allocation3 + $0x38] sm:$0xff] %vm1580_vm8, %v1499_v12  ;;  %v1505_v49 = vpop.permute.xlu0 %1504 }
 0x1ec   : > { %1715 = vrot.lane.b32.xlu1 %v1632_v5, %s5054_s16  ;;  %1591 = vst.msk [vmem:[#allocation3 + $0x50] sm:$0xff] %vm1580_vm8, %v1505_v49 }
 0x1ed   : > { %1717 = vrot.lane.b32.xlu0 %v1633_v6, %s5054_s16 }
 0x1ee   : > { %v1503_v25 = vpop.permute.xlu1 %1502 }
 0x1ef   : > { %1590 = vst.msk [vmem:[#allocation3 + $0x48] sm:$0xff] %vm1580_vm8, %v1503_v25  ;;  %v1509_v51 = vpop.permute.xlu0 %1508 }
 0x1f0   : > { %1908 = vrot.lane.b32.xlu1 %v1825_v4, %s5055_s19  ;;  %1593 = vst.msk [vmem:[#allocation3 + $0x60] sm:$0xff] %vm1580_vm8, %v1509_v51 }
 0x1f1   : > { %1910 = vrot.lane.b32.xlu0 %v1826_v9, %s5055_s19 }
 0x1f2   : > { %v1507_v54 = vpop.permute.xlu1 %1506 }
 0x1f3   : > { %1592 = vst.msk [vmem:[#allocation3 + $0x58] sm:$0xff] %vm1580_vm8, %v1507_v54  ;;  %v1513_v57 = vpop.permute.xlu0 %1512 }
 0x1f4   : > { %1719 = vrot.lane.b32.xlu1 %v1634_v26, %s5054_s16  ;;  %1595 = vst.msk [vmem:[#allocation3 + $0x70] sm:$0xff] %vm1580_vm8, %v1513_v57 }
 0x1f5   : > { %1721 = vrot.lane.b32.xlu0 %v1635_v52, %s5054_s16 }
 0x1f6   : > { %v1511_v59 = vpop.permute.xlu1 %1510 }
 0x1f7   : > { %1594 = vst.msk [vmem:[#allocation3 + $0x68] sm:$0xff] %vm1580_vm8, %v1511_v59  ;;  %v1517_v61 = vpop.permute.xlu0 %1516 }
 0x1f8   : > { %1912 = vrot.lane.b32.xlu1 %v1827_v55, %s5055_s19  ;;  %1597 = vst.msk [vmem:[#allocation3 + $0x80] sm:$0xff] %vm1580_vm8, %v1517_v61 }
 0x1f9   : > { %1914 = vrot.lane.b32.xlu0 %v1828_v58, %s5055_s19 }
 0x1fa   : > { %v1515_v0 = vpop.permute.xlu1 %1514 }
 0x1fb   : > { %1596 = vst.msk [vmem:[#allocation3 + $0x78] sm:$0xff] %vm1580_vm8, %v1515_v0  ;;  %v1521_v8 = vpop.permute.xlu0 %1520 }
 0x1fc   : > { %1723 = vrot.lane.b32.xlu1 %v1636_v60, %s5054_s16  ;;  %1599 = vst.msk [vmem:[#allocation3 + $0x90] sm:$0xff] %vm1580_vm8, %v1521_v8 }
 0x1fd   : > { %1725 = vrot.lane.b32.xlu0 %v1637_v62, %s5054_s16 }
 0x1fe   : > { %v1519_v48 = vpop.permute.xlu1 %1518 }
 0x1ff   : > { %1598 = vst.msk [vmem:[#allocation3 + $0x88] sm:$0xff] %vm1580_vm8, %v1519_v48  ;;  %v1525_v38 = vpop.permute.xlu0 %1524 }
 0x200   : > { %1916 = vrot.lane.b32.xlu1 %v1829_v7, %s5055_s19  ;;  %1601 = vst.msk [vmem:[#allocation3 + $0xa0] sm:$0xff] %vm1580_vm8, %v1525_v38 }
 0x201   : > { %1918 = vrot.lane.b32.xlu0 %v1830_v45, %s5055_s19 }
 0x202   : > { %v1523_v36 = vpop.permute.xlu1 %1522 }
 0x203   : > { %1600 = vst.msk [vmem:[#allocation3 + $0x98] sm:$0xff] %vm1580_vm8, %v1523_v36  ;;  %v1529_v35 = vpop.permute.xlu0 %1528 }
 0x204   : > { %1727 = vrot.lane.b32.xlu1 %v1638_v37, %s5054_s16  ;;  %1603 = vst.msk [vmem:[#allocation3 + $0xb0] sm:$0xff] %vm1580_vm8, %v1529_v35 }
 0x205   : > { %1729 = vrot.lane.b32.xlu0 %v1639_v27, %s5054_s16 }
 0x206   : > { %v1527_v28 = vpop.permute.xlu1 %1526 }
 0x207   : > { %1602 = vst.msk [vmem:[#allocation3 + $0xa8] sm:$0xff] %vm1580_vm8, %v1527_v28  ;;  %v1533_v33 = vpop.permute.xlu0 %1532 }
 0x208   : > { %1920 = vrot.lane.b32.xlu1 %v1831_v30, %s5055_s19  ;;  %1605 = vst.msk [vmem:[#allocation3 + $0xc0] sm:$0xff] %vm1580_vm8, %v1533_v33 }
 0x209   : > { %1922 = vrot.lane.b32.xlu0 %v1832_v31, %s5055_s19 }
 0x20a   : > { %v1531_v21 = vpop.permute.xlu1 %1530 }
 0x20b   : > { %1604 = vst.msk [vmem:[#allocation3 + $0xb8] sm:$0xff] %vm1580_vm8, %v1531_v21  ;;  %v1537_v40 = vpop.permute.xlu0 %1536 }
 0x20c   : > { %1731 = vrot.lane.b32.xlu1 %v1640_v32, %s5054_s16  ;;  %1607 = vst.msk [vmem:[#allocation3 + $0xd0] sm:$0xff] %vm1580_vm8, %v1537_v40 }
 0x20d   : > { %1540 = vrot.lane.b32.xlu0 %v1448_v39, %s5053_s13 }
 0x20e   : > { %v1535_v41 = vpop.permute.xlu1 %1534 }
 0x20f   : > { %1606 = vst.msk [vmem:[#allocation3 + $0xc8] sm:$0xff] %vm1580_vm8, %v1535_v41  ;;  %v1678_v17 = vpop.permute.xlu0 %1677 }
 0x210   : > { %1924 = vrot.lane.b32.xlu1 %v1833_v29, %s5055_s19  ;;  %1774 = vst.msk [vmem:[#allocation3] sm:$0xff] %vm1773_vm9, %v1678_v17 }
 0x211   : > { %1733 = vrot.lane.b32.xlu0 %v5875_v11, %s5054_s16 }
 0x212   : > { %v1539_v43 = vpop.permute.xlu1 %1538 }
 0x213   : > { %1608 = vst.msk [vmem:[#allocation3 + $0xd8] sm:$0xff] %vm1580_vm8, %v1539_v43  ;;  %v1871_v22 = vpop.permute.xlu0 %1870 }
 0x214   : > { %1542 = vrot.lane.b32.xlu1 %v1449_v42, %s5053_s13  ;;  %1967 = vst.msk [vmem:[#allocation3] sm:$0xff] %vm1966_vm10, %v1871_v22 }
 0x215   : > { %1926 = vrot.lane.b32.xlu0 %v5975_v10, %s5055_s19 }
 0x216   : > { %v1680_v44 = vpop.permute.xlu1 %1679 }
 0x217   : > { %1775 = vst.msk [vmem:[#allocation3 + $0x8] sm:$0xff] %vm1773_vm9, %v1680_v44  ;;  %v1682_v13 = vpop.permute.xlu0 %1681 }
 0x218   : > { %1735 = vrot.lane.b32.xlu1 %v5885_v1, %s5054_s16  ;;  %1776 = vst.msk [vmem:[#allocation3 + $0x10] sm:$0xff] %vm1773_vm9, %v1682_v13 }
 0x219   : > { %1544 = vrot.lane.b32.xlu0 %v1450_v47, %s5053_s13 }
 0x21a   : > { %v1873_v11 = vpop.permute.xlu1 %1872 }
 0x21b   : > { %1968 = vst.msk [vmem:[#allocation3 + $0x8] sm:$0xff] %vm1966_vm10, %v1873_v11  ;;  %v1875_v50 = vpop.permute.xlu0 %1874  ;;  %v1999_v10 = vld [vmem:[#allocation3] sm:$0xff] }
 0x21c   : > { %1928 = vrot.lane.b32.xlu1 %v5985_v2, %s5055_s19  ;;  %1969 = vst.msk [vmem:[#allocation3 + $0x10] sm:$0xff] %vm1966_vm10, %v1875_v50  ;;  %4876 = vmatprep.mubr.msk.f32.mxu0 %vm2040_vm11, %v1999_v10 }
 0x21e   : > { %v1684_v1 = vpop.permute.xlu1 %1683 }
 0x21f   : > { %1777 = vst.msk [vmem:[#allocation3 + $0x18] sm:$0xff] %vm1773_vm9, %v1684_v1  ;;  %v1686_v18 = vpop.permute.xlu0 %1685 }
 0x220   : > { %1546 = vrot.lane.b32.xlu1 %v1451_v53, %s5053_s13  ;;  %1778 = vst.msk [vmem:[#allocation3 + $0x20] sm:$0xff] %vm1773_vm9, %v1686_v18 }
 0x222   : > { %v1877_v56 = vpop.permute.xlu1 %1876  ;;  %v2000_v63 = vld [vmem:[#allocation3 + $0x8] sm:$0xff] }
 0x223   : > { %1970 = vst.msk [vmem:[#allocation3 + $0x18] sm:$0xff] %vm1966_vm10, %v1877_v56  ;;  %4877 = vmatmul.mubr.msk.f32.vlgmr.msra.gmra.mrb[0].mxu0 %vm2040_vm11, %v2000_v63  ;;  %v1879_v2 = vpop.permute.xlu0 %1878  ;;  %v2001_v34 = vld [vmem:[#allocation3 + $0x10] sm:$0xff] }
 0x224   : > { %1971 = vst.msk [vmem:[#allocation3 + $0x20] sm:$0xff] %vm1966_vm10, %v1879_v2  ;;  %4879 = vmatprep.mubr.msk.f32.mxu0 %vm2040_vm11, %v2001_v34  ;;  %v1644_v2 = vld [vmem:[#allocation2 + $0x1a1] sm:$0xff]  ;;  %v1643_v34 = vld [vmem:[#allocation2 + $0x199] sm:$0xff] }
 0x225   : > { %1739 = vrot.lane.b32.xlu1 %v1644_v2, %s5054_s16  ;;  %1737 = vrot.lane.b32.xlu0 %v1643_v34, %s5054_s16 }
 0x226   : > { %v1688_v23 = vpop.permute.xlu1 %1687 }
 0x227   : > { %1779 = vst.msk [vmem:[#allocation3 + $0x28] sm:$0xff] %vm1773_vm9, %v1688_v23  ;;  %v1690_v24 = vpop.permute.xlu0 %1689 }
 0x228   : > { %1780 = vst.msk [vmem:[#allocation3 + $0x30] sm:$0xff] %vm1773_vm9, %v1690_v24 }
 0x22a   : > { %v1881_v14 = vpop.permute.xlu1 %1880  ;;  %v2002_v19 = vld [vmem:[#allocation3 + $0x18] sm:$0xff] }
 0x22b   : > { %1972 = vst.msk [vmem:[#allocation3 + $0x28] sm:$0xff] %vm1966_vm10, %v1881_v14  ;;  %4880 = vmatmul.mubr.msk.f32.gmra.mrb[2].mxu0 %vm2040_vm11, %v2002_v19  ;;  %v1883_v20 = vpop.permute.xlu0 %1882  ;;  %v2003_v15 = vld [vmem:[#allocation3 + $0x20] sm:$0xff] }
 0x22c   : > { %1973 = vst.msk [vmem:[#allocation3 + $0x30] sm:$0xff] %vm1966_vm10, %v1883_v20  ;;  %4882 = vmatprep.mubr.msk.f32.mxu0 %vm2040_vm11, %v2003_v15  ;;  %v1837_v20 = vld [vmem:[#allocation2 + $0x1a2] sm:$0xff]  ;;  %v1836_v15 = vld [vmem:[#allocation2 + $0x19a] sm:$0xff] }
 0x22d   : > { %1932 = vrot.lane.b32.xlu1 %v1837_v20, %s5055_s19  ;;  %1930 = vrot.lane.b32.xlu0 %v1836_v15, %s5055_s19 }
 0x22e   : > { %v1692_v3 = vpop.permute.xlu1 %1691 }
 0x22f   : > { %1781 = vst.msk [vmem:[#allocation3 + $0x38] sm:$0xff] %vm1773_vm9, %v1692_v3  ;;  %v1694_v16 = vpop.permute.xlu0 %1693 }
 0x230   : > { %1782 = vst.msk [vmem:[#allocation3 + $0x40] sm:$0xff] %vm1773_vm9, %v1694_v16 }
 0x232   : > { %v1885_v46 = vpop.permute.xlu1 %1884  ;;  %v2004_v5 = vld [vmem:[#allocation3 + $0x28] sm:$0xff] }
 0x233   : > { %1974 = vst.msk [vmem:[#allocation3 + $0x38] sm:$0xff] %vm1966_vm10, %v1885_v46  ;;  %4883 = vmatmul.mubr.msk.f32.gmra.mrb[4].mxu0 %vm2040_vm11, %v2004_v5  ;;  %v1887_v12 = vpop.permute.xlu0 %1886  ;;  %v2005_v6 = vld [vmem:[#allocation3 + $0x30] sm:$0xff]  ;;  %v2569_v46 = vld [vmem:[#allocation2 + $0x9] sm:$0xff] }
 0x234   : > { %1975 = vst.msk [vmem:[#allocation3 + $0x40] sm:$0xff] %vm1966_vm10, %v1887_v12  ;;  %4885 = vmatprep.mubr.msk.f32.mxu0 %vm2040_vm11, %v2005_v6  ;;  %2634 = vrot.lane.b32.xlu1 %v2569_v46, %s5048_s8  ;;  %v2568_v5 = vld [vmem:[#allocation2 + $0x1] sm:$0xff] }
 0x235   : > { %2632 = vrot.lane.b32.xlu0 %v2568_v5, %s5048_s8 }
 0x236   : > { %v1696_v49 = vpop.permute.xlu1 %1695 }
 0x237   : > { %1783 = vst.msk [vmem:[#allocation3 + $0x48] sm:$0xff] %vm1773_vm9, %v1696_v49  ;;  %v1698_v4 = vpop.permute.xlu0 %1697 }
 0x238   : > { %1784 = vst.msk [vmem:[#allocation3 + $0x50] sm:$0xff] %vm1773_vm9, %v1698_v4 }
 0x23a   : > { %v1889_v25 = vpop.permute.xlu1 %1888  ;;  %v2006_v9 = vld [vmem:[#allocation3 + $0x38] sm:$0xff] }
 0x23b   : > { %1976 = vst.msk [vmem:[#allocation3 + $0x48] sm:$0xff] %vm1966_vm10, %v1889_v25  ;;  %4886 = vmatmul.mubr.msk.f32.gmra.mrb[6].mxu0 %vm2040_vm11, %v2006_v9  ;;  %v1891_v51 = vpop.permute.xlu0 %1890  ;;  %v2007_v26 = vld [vmem:[#allocation3 + $0x40] sm:$0xff] }
 0x23c   : > { %1977 = vst.msk [vmem:[#allocation3 + $0x50] sm:$0xff] %vm1966_vm10, %v1891_v51  ;;  %4888 = vmatprep.mubr.msk.f32.mxu0 %vm2040_vm11, %v2007_v26 }
 0x23e   : > { %v1700_v54 = vpop.permute.xlu1 %1699 }
 0x23f   : > { %1785 = vst.msk [vmem:[#allocation3 + $0x58] sm:$0xff] %vm1773_vm9, %v1700_v54  ;;  %v1702_v52 = vpop.permute.xlu0 %1701 }
 0x240   : > { %1786 = vst.msk [vmem:[#allocation3 + $0x60] sm:$0xff] %vm1773_vm9, %v1702_v52 }
 0x242   : > { %v1893_v57 = vpop.permute.xlu1 %1892  ;;  %v2008_v55 = vld [vmem:[#allocation3 + $0x48] sm:$0xff] }
 0x243   : > { %1978 = vst.msk [vmem:[#allocation3 + $0x58] sm:$0xff] %vm1966_vm10, %v1893_v57  ;;  %4889 = vmatmul.mubr.msk.f32.gmra.mrb[8].mxu0 %vm2040_vm11, %v2008_v55  ;;  %v1895_v59 = vpop.permute.xlu0 %1894  ;;  %v2009_v58 = vld [vmem:[#allocation3 + $0x50] sm:$0xff] }
 0x244   : > { %1979 = vst.msk [vmem:[#allocation3 + $0x60] sm:$0xff] %vm1966_vm10, %v1895_v59  ;;  %4891 = vmatprep.mubr.msk.f32.mxu0 %vm2040_vm11, %v2009_v58 }
 0x246   : > { %v1704_v61 = vpop.permute.xlu1 %1703 }
 0x247   : > { %1787 = vst.msk [vmem:[#allocation3 + $0x68] sm:$0xff] %vm1773_vm9, %v1704_v61  ;;  %v1706_v60 = vpop.permute.xlu0 %1705 }
 0x248   : > { %1788 = vst.msk [vmem:[#allocation3 + $0x70] sm:$0xff] %vm1773_vm9, %v1706_v60 }
 0x24a   : > { %v1897_v0 = vpop.permute.xlu1 %1896  ;;  %v2010_v62 = vld [vmem:[#allocation3 + $0x58] sm:$0xff] }
 0x24b   : > { %1980 = vst.msk [vmem:[#allocation3 + $0x68] sm:$0xff] %vm1966_vm10, %v1897_v0  ;;  %4892 = vmatmul.mubr.msk.f32.gmra.mrb[10].mxu0 %vm2040_vm11, %v2010_v62  ;;  %v1899_v8 = vpop.permute.xlu0 %1898  ;;  %v2011_v7 = vld [vmem:[#allocation3 + $0x60] sm:$0xff]  ;;  %v2505_v62 = vld [vmem:[#allocation2 + $0x8] sm:$0xff] }
 0x24c   : > { %1981 = vst.msk [vmem:[#allocation3 + $0x70] sm:$0xff] %vm1966_vm10, %v1899_v8  ;;  %4894 = vmatprep.mubr.msk.f32.mxu0 %vm2040_vm11, %v2011_v7  ;;  %v2504_v8 = vld [vmem:[#allocation2] sm:$0xff] }
 0x24d   : > { %2537 = vst.msk [vmem:[#allocation3 + $0x8] sm:$0xff] %vm279_vm0, %v2505_v62  ;;  %2536 = vst.msk [vmem:[#allocation3] sm:$0xff] %vm279_vm0, %v2504_v8 }
 0x24e   : > { %v1708_v48 = vpop.permute.xlu1 %1707 }
 0x24f   : > { %1789 = vst.msk [vmem:[#allocation3 + $0x78] sm:$0xff] %vm1773_vm9, %v1708_v48  ;;  %v1710_v45 = vpop.permute.xlu0 %1709  ;;  %v6336_v48 = vld [vmem:[%s7466_s3] ss:$0 sm:$0xff] }
 0x250   : > { %1790 = vst.msk [vmem:[#allocation3 + $0x80] sm:$0xff] %vm1773_vm9, %v1710_v45 }
 0x252   : > { %v1901_v38 = vpop.permute.xlu1 %1900  ;;  %v2012_v37 = vld [vmem:[#allocation3 + $0x68] sm:$0xff] }
 0x253   : > { %1982 = vst.msk [vmem:[#allocation3 + $0x78] sm:$0xff] %vm1966_vm10, %v1901_v38  ;;  %4895 = vmatmul.mubr.msk.f32.gmra.mrb[12].mxu0 %vm2040_vm11, %v2012_v37  ;;  %v1903_v36 = vpop.permute.xlu0 %1902  ;;  %v2013_v27 = vld [vmem:[#allocation3 + $0x70] sm:$0xff] }
 0x254   : > { %1983 = vst.msk [vmem:[#allocation3 + $0x80] sm:$0xff] %vm1966_vm10, %v1903_v36  ;;  %4897 = vmatprep.mubr.msk.f32.mxu0 %vm2040_vm11, %v2013_v27  ;;  %v6343_v37 = vld [vmem:[%s7467_s4] ss:$0 sm:$0xff] }
 0x256   : > { %v1712_v35 = vpop.permute.xlu1 %1711 }
 0x257   : > { %1791 = vst.msk [vmem:[#allocation3 + $0x88] sm:$0xff] %vm1773_vm9, %v1712_v35  ;;  %v1714_v30 = vpop.permute.xlu0 %1713 }
 0x258   : > { %1792 = vst.msk [vmem:[#allocation3 + $0x90] sm:$0xff] %vm1773_vm9, %v1714_v30 }
 0x25a   : > { %v1905_v28 = vpop.permute.xlu1 %1904  ;;  %v2014_v31 = vld [vmem:[#allocation3 + $0x78] sm:$0xff] }
 0x25b   : > { %1984 = vst.msk [vmem:[#allocation3 + $0x88] sm:$0xff] %vm1966_vm10, %v1905_v28  ;;  %4898 = vmatmul.mubr.msk.f32.gmra.mrb[14].mxu0 %vm2040_vm11, %v2014_v31  ;;  %v1907_v33 = vpop.permute.xlu0 %1906  ;;  %v2015_v32 = vld [vmem:[#allocation3 + $0x80] sm:$0xff] }
 0x25c   : > { %1985 = vst.msk [vmem:[#allocation3 + $0x90] sm:$0xff] %vm1966_vm10, %v1907_v33  ;;  %4900 = vmatprep.mubr.msk.f32.mxu0 %vm2040_vm11, %v2015_v32 }
 0x25e   : > { %v1716_v21 = vpop.permute.xlu1 %1715 }
 0x25f   : > { %1793 = vst.msk [vmem:[#allocation3 + $0x98] sm:$0xff] %vm1773_vm9, %v1716_v21  ;;  %v1718_v39 = vpop.permute.xlu0 %1717 }
 0x260   : > { %1794 = vst.msk [vmem:[#allocation3 + $0xa0] sm:$0xff] %vm1773_vm9, %v1718_v39 }
 0x262   : > { %v1909_v40 = vpop.permute.xlu1 %1908  ;;  %v2016_v29 = vld [vmem:[#allocation3 + $0x88] sm:$0xff] }
 0x263   : > { %1986 = vst.msk [vmem:[#allocation3 + $0x98] sm:$0xff] %vm1966_vm10, %v1909_v40  ;;  %4901 = vmatmul.mubr.msk.f32.gmra.mrb[16].mxu0 %vm2040_vm11, %v2016_v29  ;;  %v1911_v41 = vpop.permute.xlu0 %1910  ;;  %v2017_v17 = vld [vmem:[#allocation3 + $0x90] sm:$0xff] }
 0x264   : > { %1987 = vst.msk [vmem:[#allocation3 + $0xa0] sm:$0xff] %vm1966_vm10, %v1911_v41  ;;  %4903 = vmatprep.mubr.msk.f32.mxu0 %vm2040_vm11, %v2017_v17 }
 0x266   : > { %v1720_v42 = vpop.permute.xlu1 %1719 }
 0x267   : > { %1795 = vst.msk [vmem:[#allocation3 + $0xa8] sm:$0xff] %vm1773_vm9, %v1720_v42  ;;  %v1722_v43 = vpop.permute.xlu0 %1721 }
 0x268   : > { %1796 = vst.msk [vmem:[#allocation3 + $0xb0] sm:$0xff] %vm1773_vm9, %v1722_v43 }
 0x26a   : > { %v1913_v22 = vpop.permute.xlu1 %1912  ;;  %v2018_v44 = vld [vmem:[#allocation3 + $0x98] sm:$0xff] }
 0x26b   : > { %1988 = vst.msk [vmem:[#allocation3 + $0xa8] sm:$0xff] %vm1966_vm10, %v1913_v22  ;;  %4904 = vmatmul.mubr.msk.f32.gmra.mrb[18].mxu0 %vm2040_vm11, %v2018_v44  ;;  %v1915_v47 = vpop.permute.xlu0 %1914  ;;  %v2019_v13 = vld [vmem:[#allocation3 + $0xa0] sm:$0xff] }
 0x26c   : > { %1989 = vst.msk [vmem:[#allocation3 + $0xb0] sm:$0xff] %vm1966_vm10, %v1915_v47  ;;  %4906 = vmatprep.mubr.msk.f32.mxu0 %vm2040_vm11, %v2019_v13 }
 0x26e   : > { %v1724_v11 = vpop.permute.xlu1 %1723 }
 0x26f   : > { %1797 = vst.msk [vmem:[#allocation3 + $0xb8] sm:$0xff] %vm1773_vm9, %v1724_v11  ;;  %v1726_v50 = vpop.permute.xlu0 %1725 }
 0x270   : > { %1798 = vst.msk [vmem:[#allocation3 + $0xc0] sm:$0xff] %vm1773_vm9, %v1726_v50 }
 0x272   : > { %v1917_v10 = vpop.permute.xlu1 %1916  ;;  %v2020_v53 = vld [vmem:[#allocation3 + $0xa8] sm:$0xff] }
 0x273   : > { %1990 = vst.msk [vmem:[#allocation3 + $0xb8] sm:$0xff] %vm1966_vm10, %v1917_v10  ;;  %4907 = vmatmul.mubr.msk.f32.gmra.mrb[20].mxu0 %vm2040_vm11, %v2020_v53  ;;  %v1919_v1 = vpop.permute.xlu0 %1918  ;;  %v2021_v18 = vld [vmem:[#allocation3 + $0xb0] sm:$0xff] }
 0x274   : > { %1991 = vst.msk [vmem:[#allocation3 + $0xc0] sm:$0xff] %vm1966_vm10, %v1919_v1  ;;  %4909 = vmatprep.mubr.msk.f32.mxu0 %vm2040_vm11, %v2021_v18 }
 0x276   : > { %v1728_v56 = vpop.permute.xlu1 %1727 }
 0x277   : > { %1799 = vst.msk [vmem:[#allocation3 + $0xc8] sm:$0xff] %vm1773_vm9, %v1728_v56  ;;  %v1730_v63 = vpop.permute.xlu0 %1729 }
 0x278   : > { %1800 = vst.msk [vmem:[#allocation3 + $0xd0] sm:$0xff] %vm1773_vm9, %v1730_v63 }
 0x27a   : > { %v1921_v23 = vpop.permute.xlu1 %1920  ;;  %v2022_v24 = vld [vmem:[#allocation3 + $0xb8] sm:$0xff] }
 0x27b   : > { %1992 = vst.msk [vmem:[#allocation3 + $0xc8] sm:$0xff] %vm1966_vm10, %v1921_v23  ;;  %4910 = vmatmul.mubr.msk.f32.gmra.mrb[22].mxu0 %vm2040_vm11, %v2022_v24  ;;  %v1923_v14 = vpop.permute.xlu0 %1922  ;;  %v2023_v19 = vld [vmem:[#allocation3 + $0xc0] sm:$0xff] }
 0x27c   : > { %1993 = vst.msk [vmem:[#allocation3 + $0xd0] sm:$0xff] %vm1966_vm10, %v1923_v14  ;;  %4912 = vmatprep.mubr.msk.f32.mxu0 %vm2040_vm11, %v2023_v19 }
 0x27e   : > { %v1732_v3 = vpop.permute.xlu1 %1731 }
 0x27f   : > { %1801 = vst.msk [vmem:[#allocation3 + $0xd8] sm:$0xff] %vm1773_vm9, %v1732_v3  ;;  %v1541_v16 = vpop.permute.xlu0 %1540 }
 0x280   : > { %1609 = vst.msk [vmem:[#allocation3 + $0xe0] sm:$0xff] %vm1580_vm8, %v1541_v16 }
 0x282   : > { %v1925_v12 = vpop.permute.xlu1 %1924  ;;  %v2024_v6 = vld [vmem:[#allocation3 + $0xc8] sm:$0xff] }
 0x283   : > { %1994 = vst.msk [vmem:[#allocation3 + $0xd8] sm:$0xff] %vm1966_vm10, %v1925_v12  ;;  %4913 = vmatmul.mubr.msk.f32.gmra.mrb[24].mxu0 %vm2040_vm11, %v2024_v6  ;;  %v1734_v49 = vpop.permute.xlu0 %1733  ;;  %v2025_v4 = vld [vmem:[#allocation3 + $0xd0] sm:$0xff] }
 0x284   : > { %1802 = vst.msk [vmem:[#allocation3 + $0xe0] sm:$0xff] %vm1773_vm9, %v1734_v49  ;;  %4915 = vmatprep.mubr.msk.f32.mxu0 %vm2040_vm11, %v2025_v4 }
 0x286   : > { %v1543_v25 = vpop.permute.xlu1 %1542 }
 0x287   : > { %1610 = vst.msk [vmem:[#allocation3 + $0xe8] sm:$0xff] %vm1580_vm8, %v1543_v25  ;;  %v1927_v9 = vpop.permute.xlu0 %1926 }
 0x288   : > { %1995 = vst.msk [vmem:[#allocation3 + $0xe0] sm:$0xff] %vm1966_vm10, %v1927_v9 }
 0x28a   : > { %v1736_v51 = vpop.permute.xlu1 %1735  ;;  %v2026_v26 = vld [vmem:[#allocation3 + $0xd8] sm:$0xff] }
 0x28b   : > { %1803 = vst.msk [vmem:[#allocation3 + $0xe8] sm:$0xff] %vm1773_vm9, %v1736_v51  ;;  %4916 = vmatmul.mubr.msk.f32.gmra.mrb[26].mxu0 %vm2040_vm11, %v2026_v26  ;;  %v1545_v59 = vpop.permute.xlu0 %1544 }
 0x28c   : > { %1611 = vst.msk [vmem:[#allocation3 + $0xf0] sm:$0xff] %vm1580_vm8, %v1545_v59 }
 0x28e   : > { %v1929_v54 = vpop.permute.xlu1 %1928 }
 0x28f   : > { %1996 = vst.msk [vmem:[#allocation3 + $0xe8] sm:$0xff] %vm1966_vm10, %v1929_v54  ;;  %v2027_v52 = vld [vmem:[#allocation3 + $0xe0] sm:$0xff] }
 0x290   : > { %4918 = vmatprep.mubr.msk.f32.mxu0 %vm2040_vm11, %v2027_v52 }
 0x292   : > { %v1547_v55 = vpop.permute.xlu1 %1546 }
 0x293   : > { %1612 = vst.msk [vmem:[#allocation3 + $0xf8] sm:$0xff] %vm1580_vm8, %v1547_v55 }
 0x296   : > { %v2028_v57 = vld [vmem:[#allocation3 + $0xe8] sm:$0xff] }
 0x297   : > { %4919 = vmatmul.mubr.msk.f32.gmra.mrb[28].mxu0 %vm2040_vm11, %v2028_v57  ;;  %v1740_v58 = vpop.permute.xlu1 %1739  ;;  %v1738_v61 = vpop.permute.xlu0 %1737 }
 0x298   : > { %1805 = vst.msk [vmem:[#allocation3 + $0xf8] sm:$0xff] %vm1773_vm9, %v1740_v58  ;;  %1804 = vst.msk [vmem:[#allocation3 + $0xf0] sm:$0xff] %vm1773_vm9, %v1738_v61 }
 0x29f   : > { %v1933_v60 = vpop.permute.xlu1 %1932  ;;  %v1931_v0 = vpop.permute.xlu0 %1930 }
 0x2a0   : > { %1998 = vst.msk [vmem:[#allocation3 + $0xf8] sm:$0xff] %vm1966_vm10, %v1933_v60  ;;  %1997 = vst.msk [vmem:[#allocation3 + $0xf0] sm:$0xff] %vm1966_vm10, %v1931_v0 }
 0x2a6   : > { %v2635_v7 = vpop.permute.xlu1 %2634 }
 0x2a7   : > { %2729 = vst.msk [vmem:[#allocation3 + $0x8] sm:$0xff] %vm614_vm3, %v2635_v7  ;;  %v2633_v45 = vpop.permute.xlu0 %2632  ;;  %v2029_v31 = vld [vmem:[#allocation3 + $0xf0] sm:$0xff]  ;;  %v2030_v32 = vld [vmem:[#allocation3 + $0xf8] sm:$0xff] }
 0x2a8   : > { %2728 = vst.msk [vmem:[#allocation3] sm:$0xff] %vm614_vm3, %v2633_v45  ;;  %4921 = vmatprep.mubr.msk.f32.mxu0 %vm2040_vm11, %v2029_v31 }
 0x2a9   : > { %4922 = vmatmul.mubr.msk.f32.gmra.mrb[30].mxu0 %vm2040_vm11, %v2030_v32 }
 0x2f6   : > { %v4878_v38 = vpop.f32.mrb[0].mxu0 }
 0x2f7   : > { %v2370_v36 = vmul.f32 %v4878_v38, %v6336_v48  ;;  %v2203_v27 = vpop.f32.mrb[1].mxu0 }
 0x2f8   : > { %v2369_v35 = vmul.f32 %v6336_v48, %v2203_v27 }
 0x2f9   : > { %v2409_v30 = vadd.f32 %v6343_v37, %v2370_v36 }
 0x2fa   : > { %v2408_v28 = vadd.f32 %v6343_v37, %v2369_v35 }
 0x2fb   : > { %v2441_v33 = vmax.f32 %v2409_v30, 0.0 }
 0x2fc   : > { %v2440_v21 = vmax.f32 %v2408_v28, 0.0 }
 0x2fd   : > { %2473 = vst.msk [vmem:[#allocation2 + $0x21] sm:$0xff] %vm279_vm0, %v2441_v33 }
 0x2fe   : > { %2472 = vst.msk [vmem:[#allocation2 + $0x19] sm:$0xff] %vm279_vm0, %v2440_v21  ;;  %v4881_v39 = vpop.f32.mrb[2].mxu0 }
 0x2ff   : > { %v2372_v40 = vmul.f32 %v4881_v39, %v6336_v48  ;;  %v2213_v29 = vpop.f32.mrb[3].mxu0 }
 0x300   : > { %v2371_v41 = vmul.f32 %v6336_v48, %v2213_v29 }
 0x301   : > { %v2411_v17 = vadd.f32 %v6343_v37, %v2372_v40 }
 0x302   : > { %v2410_v42 = vadd.f32 %v6343_v37, %v2371_v41 }
 0x303   : > { %v2443_v43 = vmax.f32 %v2411_v17, 0.0 }
 0x304   : > { %v2442_v22 = vmax.f32 %v2410_v42, 0.0  ;;  %v6357_v44 = vld [vmem:[#allocation2 + $0x21] sm:$0xff] }
 0x305   : > { %2475 = vst.msk [vmem:[#allocation2 + $0x39] sm:$0xff] %vm279_vm0, %v2443_v43  ;;  %2638 = vrot.lane.b32.xlu1 %v6357_v44, %s5048_s8  ;;  %v6362_v47 = vld [vmem:[#allocation2 + $0x19] sm:$0xff] }
 0x306   : > { %v6364_v13 = vld [vmem:[#allocation2 + $0x20] sm:$0xff]  ;;  %v6366_v11 = vld [vmem:[#allocation2 + $0x18] sm:$0xff]  ;;  %2474 = vst.msk [vmem:[#allocation2 + $0x31] sm:$0xff] %vm279_vm0, %v2442_v22  ;;  %2636 = vrot.lane.b32.xlu0 %v6362_v47, %s5048_s8  ;;  %v4884_v50 = vpop.f32.mrb[4].mxu0 }
 0x307   : > { %2539 = vst.msk [vmem:[#allocation3 + $0x18] sm:$0xff] %vm279_vm0, %v6364_v13  ;;  %2538 = vst.msk [vmem:[#allocation3 + $0x10] sm:$0xff] %vm279_vm0, %v6366_v11  ;;  %v2374_v10 = vmul.f32 %v4884_v50, %v6336_v48  ;;  %v2223_v53 = vpop.f32.mrb[5].mxu0 }
 0x308   : > { %v2373_v1 = vmul.f32 %v6336_v48, %v2223_v53 }
 0x309   : > { %v2413_v18 = vadd.f32 %v6343_v37, %v2374_v10 }
 0x30a   : > { %v2412_v56 = vadd.f32 %v6343_v37, %v2373_v1 }
 0x30b   : > { %v2445_v63 = vmax.f32 %v2413_v18, 0.0 }
 0x30c   : > { %v2444_v2 = vmax.f32 %v2412_v56, 0.0  ;;  %v6379_v34 = vld [vmem:[#allocation2 + $0x39] sm:$0xff] }
 0x30d   : > { %2477 = vst.msk [vmem:[#allocation2 + $0x51] sm:$0xff] %vm279_vm0, %v2445_v63  ;;  %2642 = vrot.lane.b32.xlu1 %v6379_v34, %s5048_s8  ;;  %v6384_v23 = vld [vmem:[#allocation2 + $0x31] sm:$0xff] }
 0x30e   : > { %v6386_v24 = vld [vmem:[#allocation2 + $0x38] sm:$0xff]  ;;  %v6388_v14 = vld [vmem:[#allocation2 + $0x30] sm:$0xff]  ;;  %2476 = vst.msk [vmem:[#allocation2 + $0x49] sm:$0xff] %vm279_vm0, %v2444_v2  ;;  %2640 = vrot.lane.b32.xlu0 %v6384_v23, %s5048_s8  ;;  %v4887_v19 = vpop.f32.mrb[6].mxu0 }
 0x30f   : > { %2541 = vst.msk [vmem:[#allocation3 + $0x28] sm:$0xff] %vm279_vm0, %v6386_v24  ;;  %2540 = vst.msk [vmem:[#allocation3 + $0x20] sm:$0xff] %vm279_vm0, %v6388_v14  ;;  %v2376_v20 = vmul.f32 %v4887_v19, %v6336_v48  ;;  %v2233_v15 = vpop.f32.mrb[7].mxu0 }
 0x310   : > { %v2375_v3 = vmul.f32 %v6336_v48, %v2233_v15 }
 0x311   : > { %v2415_v16 = vadd.f32 %v6343_v37, %v2376_v20 }
 0x312   : > { %v2414_v46 = vadd.f32 %v6343_v37, %v2375_v3 }
 0x313   : > { %v2447_v5 = vmax.f32 %v2415_v16, 0.0 }
 0x314   : > { %v2446_v12 = vmax.f32 %v2414_v46, 0.0  ;;  %v6401_v6 = vld [vmem:[#allocation2 + $0x51] sm:$0xff] }
 0x315   : > { %2479 = vst.msk [vmem:[#allocation2 + $0x69] sm:$0xff] %vm279_vm0, %v2447_v5  ;;  %2646 = vrot.lane.b32.xlu1 %v6401_v6, %s5048_s8  ;;  %v6406_v49 = vld [vmem:[#allocation2 + $0x49] sm:$0xff] }
 0x316   : > { %v6408_v4 = vld [vmem:[#allocation2 + $0x50] sm:$0xff]  ;;  %v6410_v25 = vld [vmem:[#allocation2 + $0x48] sm:$0xff]  ;;  %2478 = vst.msk [vmem:[#allocation2 + $0x61] sm:$0xff] %vm279_vm0, %v2446_v12  ;;  %2644 = vrot.lane.b32.xlu0 %v6406_v49, %s5048_s8  ;;  %v4890_v9 = vpop.f32.mrb[8].mxu0 }
 0x317   : > { %2543 = vst.msk [vmem:[#allocation3 + $0x38] sm:$0xff] %vm279_vm0, %v6408_v4  ;;  %2542 = vst.msk [vmem:[#allocation3 + $0x30] sm:$0xff] %vm279_vm0, %v6410_v25  ;;  %v2378_v51 = vmul.f32 %v4890_v9, %v6336_v48  ;;  %v2243_v26 = vpop.f32.mrb[9].mxu0 }
 0x318   : > { %v2377_v54 = vmul.f32 %v6336_v48, %v2243_v26 }
 0x319   : > { %v2417_v52 = vadd.f32 %v6343_v37, %v2378_v51 }
 0x31a   : > { %v2416_v57 = vadd.f32 %v6343_v37, %v2377_v54 }
 0x31b   : > { %v2449_v55 = vmax.f32 %v2417_v52, 0.0 }
 0x31c   : > { %v2448_v59 = vmax.f32 %v2416_v57, 0.0  ;;  %v6423_v58 = vld [vmem:[#allocation2 + $0x69] sm:$0xff] }
 0x31d   : > { %2481 = vst.msk [vmem:[#allocation2 + $0x81] sm:$0xff] %vm279_vm0, %v2449_v55  ;;  %2650 = vrot.lane.b32.xlu1 %v6423_v58, %s5048_s8  ;;  %v6428_v61 = vld [vmem:[#allocation2 + $0x61] sm:$0xff] }
 0x31e   : > { %v6430_v60 = vld [vmem:[#allocation2 + $0x68] sm:$0xff]  ;;  %2480 = vst.msk [vmem:[#allocation2 + $0x79] sm:$0xff] %vm279_vm0, %v2448_v59  ;;  %2648 = vrot.lane.b32.xlu0 %v6428_v61, %s5048_s8  ;;  %v4893_v0 = vpop.f32.mrb[10].mxu0  ;;  %v6437_v62 = vld [vmem:[#allocation2 + $0x60] sm:$0xff] }
 0x31f   : > { %2545 = vst.msk [vmem:[#allocation3 + $0x48] sm:$0xff] %vm279_vm0, %v6430_v60  ;;  %v2380_v8 = vmul.f32 %v4893_v0, %v6336_v48  ;;  %v2253_v7 = vpop.f32.mrb[11].mxu0  ;;  %2544 = vst.msk [vmem:[#allocation3 + $0x40] sm:$0xff] %vm279_vm0, %v6437_v62 }
 0x320   : > { %v2379_v45 = vmul.f32 %v6336_v48, %v2253_v7 }
 0x321   : > { %v2419_v38 = vadd.f32 %v6343_v37, %v2380_v8 }
 0x322   : > { %v2418_v36 = vadd.f32 %v6343_v37, %v2379_v45 }
 0x323   : > { %v2451_v27 = vmax.f32 %v2419_v38, 0.0 }
 0x324   : > { %v2450_v35 = vmax.f32 %v2418_v36, 0.0  ;;  %v6445_v30 = vld [vmem:[#allocation2 + $0x81] sm:$0xff] }
 0x325   : > { %2483 = vst.msk [vmem:[#allocation2 + $0x99] sm:$0xff] %vm279_vm0, %v2451_v27  ;;  %2654 = vrot.lane.b32.xlu1 %v6445_v30, %s5048_s8  ;;  %v6450_v28 = vld [vmem:[#allocation2 + $0x79] sm:$0xff] }
 0x326   : > { %v6452_v31 = vld [vmem:[#allocation2 + $0x80] sm:$0xff]  ;;  %2482 = vst.msk [vmem:[#allocation2 + $0x91] sm:$0xff] %vm279_vm0, %v2450_v35  ;;  %2652 = vrot.lane.b32.xlu0 %v6450_v28, %s5048_s8  ;;  %v4896_v33 = vpop.f32.mrb[12].mxu0  ;;  %v6459_v32 = vld [vmem:[#allocation2 + $0x78] sm:$0xff] }
 0x327   : > { %2547 = vst.msk [vmem:[#allocation3 + $0x58] sm:$0xff] %vm279_vm0, %v6452_v31  ;;  %v2382_v21 = vmul.f32 %v4896_v33, %v6336_v48  ;;  %v2263_v39 = vpop.f32.mrb[13].mxu0  ;;  %2546 = vst.msk [vmem:[#allocation3 + $0x50] sm:$0xff] %vm279_vm0, %v6459_v32 }
 0x328   : > { %v2381_v40 = vmul.f32 %v6336_v48, %v2263_v39 }
 0x329   : > { %v2421_v29 = vadd.f32 %v6343_v37, %v2382_v21 }
 0x32a   : > { %v2420_v41 = vadd.f32 %v6343_v37, %v2381_v40 }
 0x32b   : > { %v2453_v17 = vmax.f32 %v2421_v29, 0.0 }
 0x32c   : > { %v2452_v42 = vmax.f32 %v2420_v41, 0.0  ;;  %v2581_v43 = vld [vmem:[#allocation2 + $0x99] sm:$0xff] }
 0x32d   : > { %2485 = vst.msk [vmem:[#allocation2 + $0xb1] sm:$0xff] %vm279_vm0, %v2453_v17  ;;  %2658 = vrot.lane.b32.xlu1 %v2581_v43, %s5048_s8  ;;  %v2580_v22 = vld [vmem:[#allocation2 + $0x91] sm:$0xff] }
 0x32e   : > { %v6469_v50 = vld [vmem:[#allocation2 + $0x98] sm:$0xff]  ;;  %2484 = vst.msk [vmem:[#allocation2 + $0xa9] sm:$0xff] %vm279_vm0, %v2452_v42  ;;  %2656 = vrot.lane.b32.xlu0 %v2580_v22, %s5048_s8  ;;  %v4899_v10 = vpop.f32.mrb[14].mxu0  ;;  %v6475_v53 = vld [vmem:[#allocation2 + $0x90] sm:$0xff] }
 0x32f   : > { %2549 = vst.msk [vmem:[#allocation3 + $0x68] sm:$0xff] %vm279_vm0, %v6469_v50  ;;  %v2384_v1 = vmul.f32 %v4899_v10, %v6336_v48  ;;  %v2273_v18 = vpop.f32.mrb[15].mxu0  ;;  %2548 = vst.msk [vmem:[#allocation3 + $0x60] sm:$0xff] %vm279_vm0, %v6475_v53 }
 0x330   : > { %v2383_v56 = vmul.f32 %v6336_v48, %v2273_v18 }
 0x331   : > { %v2423_v63 = vadd.f32 %v6343_v37, %v2384_v1 }
 0x332   : > { %v2422_v2 = vadd.f32 %v6343_v37, %v2383_v56 }
 0x333   : > { %v2455_v19 = vmax.f32 %v2423_v63, 0.0 }
 0x334   : > { %v2454_v20 = vmax.f32 %v2422_v2, 0.0  ;;  %v2583_v15 = vld [vmem:[#allocation2 + $0xb1] sm:$0xff] }
 0x335   : > { %2487 = vst.msk [vmem:[#allocation2 + $0xc9] sm:$0xff] %vm279_vm0, %v2455_v19  ;;  %2662 = vrot.lane.b32.xlu1 %v2583_v15, %s5048_s8  ;;  %v2582_v3 = vld [vmem:[#allocation2 + $0xa9] sm:$0xff] }
 0x336   : > { %v6485_v16 = vld [vmem:[#allocation2 + $0xb0] sm:$0xff]  ;;  %2486 = vst.msk [vmem:[#allocation2 + $0xc1] sm:$0xff] %vm279_vm0, %v2454_v20  ;;  %2660 = vrot.lane.b32.xlu0 %v2582_v3, %s5048_s8  ;;  %v4902_v46 = vpop.f32.mrb[16].mxu0  ;;  %v6491_v5 = vld [vmem:[#allocation2 + $0xa8] sm:$0xff] }
 0x337   : > { %2551 = vst.msk [vmem:[#allocation3 + $0x78] sm:$0xff] %vm279_vm0, %v6485_v16  ;;  %v2386_v12 = vmul.f32 %v4902_v46, %v6336_v48  ;;  %v2283_v9 = vpop.f32.mrb[17].mxu0  ;;  %2550 = vst.msk [vmem:[#allocation3 + $0x70] sm:$0xff] %vm279_vm0, %v6491_v5 }
 0x338   : > { %v2385_v51 = vmul.f32 %v6336_v48, %v2283_v9 }
 0x339   : > { %v2425_v26 = vadd.f32 %v6343_v37, %v2386_v12 }
 0x33a   : > { %v2424_v54 = vadd.f32 %v6343_v37, %v2385_v51 }
 0x33b   : > { %v2457_v52 = vmax.f32 %v2425_v26, 0.0 }
 0x33c   : > { %v2456_v57 = vmax.f32 %v2424_v54, 0.0  ;;  %v2585_v55 = vld [vmem:[#allocation2 + $0xc9] sm:$0xff] }
 0x33d   : > { %2489 = vst.msk [vmem:[#allocation2 + $0xe1] sm:$0xff] %vm279_vm0, %v2457_v52  ;;  %2666 = vrot.lane.b32.xlu1 %v2585_v55, %s5048_s8  ;;  %v2584_v59 = vld [vmem:[#allocation2 + $0xc1] sm:$0xff] }
 0x33e   : > { %v6501_v0 = vld [vmem:[#allocation2 + $0xc8] sm:$0xff]  ;;  %2488 = vst.msk [vmem:[#allocation2 + $0xd9] sm:$0xff] %vm279_vm0, %v2456_v57  ;;  %2664 = vrot.lane.b32.xlu0 %v2584_v59, %s5048_s8  ;;  %v4905_v8 = vpop.f32.mrb[18].mxu0  ;;  %v6507_v7 = vld [vmem:[#allocation2 + $0xc0] sm:$0xff] }
 0x33f   : > { %2553 = vst.msk [vmem:[#allocation3 + $0x88] sm:$0xff] %vm279_vm0, %v6501_v0  ;;  %v2388_v45 = vmul.f32 %v4905_v8, %v6336_v48  ;;  %v2293_v38 = vpop.f32.mrb[19].mxu0  ;;  %2552 = vst.msk [vmem:[#allocation3 + $0x80] sm:$0xff] %vm279_vm0, %v6507_v7 }
 0x340   : > { %v2387_v36 = vmul.f32 %v6336_v48, %v2293_v38 }
 0x341   : > { %v2427_v27 = vadd.f32 %v6343_v37, %v2388_v45 }
 0x342   : > { %v2426_v35 = vadd.f32 %v6343_v37, %v2387_v36 }
 0x343   : > { %v2459_v33 = vmax.f32 %v2427_v27, 0.0 }
 0x344   : > { %v2458_v21 = vmax.f32 %v2426_v35, 0.0  ;;  %v2587_v39 = vld [vmem:[#allocation2 + $0xe1] sm:$0xff] }
 0x345   : > { %2491 = vst.msk [vmem:[#allocation2 + $0xf9] sm:$0xff] %vm279_vm0, %v2459_v33  ;;  %2670 = vrot.lane.b32.xlu1 %v2587_v39, %s5048_s8  ;;  %v2586_v40 = vld [vmem:[#allocation2 + $0xd9] sm:$0xff] }
 0x346   : > { %v6517_v29 = vld [vmem:[#allocation2 + $0xe0] sm:$0xff]  ;;  %2490 = vst.msk [vmem:[#allocation2 + $0xf1] sm:$0xff] %vm279_vm0, %v2458_v21  ;;  %2668 = vrot.lane.b32.xlu0 %v2586_v40, %s5048_s8  ;;  %v4908_v41 = vpop.f32.mrb[20].mxu0  ;;  %v6523_v17 = vld [vmem:[#allocation2 + $0xd8] sm:$0xff] }
 0x347   : > { %2555 = vst.msk [vmem:[#allocation3 + $0x98] sm:$0xff] %vm279_vm0, %v6517_v29  ;;  %v2390_v42 = vmul.f32 %v4908_v41, %v6336_v48  ;;  %v2303_v43 = vpop.f32.mrb[21].mxu0  ;;  %2554 = vst.msk [vmem:[#allocation3 + $0x90] sm:$0xff] %vm279_vm0, %v6523_v17 }
 0x348   : > { %v2389_v22 = vmul.f32 %v6336_v48, %v2303_v43 }
 0x349   : > { %v2429_v10 = vadd.f32 %v6343_v37, %v2390_v42 }
 0x34a   : > { %v2428_v1 = vadd.f32 %v6343_v37, %v2389_v22 }
 0x34b   : > { %v2461_v18 = vmax.f32 %v2429_v10, 0.0 }
 0x34c   : > { %v2460_v56 = vmax.f32 %v2428_v1, 0.0  ;;  %v2589_v63 = vld [vmem:[#allocation2 + $0xf9] sm:$0xff] }
 0x34d   : > { %2493 = vst.msk [vmem:[#allocation2 + $0x111] sm:$0xff] %vm279_vm0, %v2461_v18  ;;  %2674 = vrot.lane.b32.xlu1 %v2589_v63, %s5048_s8  ;;  %v2588_v2 = vld [vmem:[#allocation2 + $0xf1] sm:$0xff] }
 0x34e   : > { %v6533_v19 = vld [vmem:[#allocation2 + $0xf8] sm:$0xff]  ;;  %2492 = vst.msk [vmem:[#allocation2 + $0x109] sm:$0xff] %vm279_vm0, %v2460_v56  ;;  %2672 = vrot.lane.b32.xlu0 %v2588_v2, %s5048_s8  ;;  %v4911_v20 = vpop.f32.mrb[22].mxu0  ;;  %v6539_v15 = vld [vmem:[#allocation2 + $0xf0] sm:$0xff] }
 0x34f   : > { %2557 = vst.msk [vmem:[#allocation3 + $0xa8] sm:$0xff] %vm279_vm0, %v6533_v19  ;;  %v2392_v3 = vmul.f32 %v4911_v20, %v6336_v48  ;;  %v2313_v46 = vpop.f32.mrb[23].mxu0  ;;  %2556 = vst.msk [vmem:[#allocation3 + $0xa0] sm:$0xff] %vm279_vm0, %v6539_v15 }
 0x350   : > { %v2391_v12 = vmul.f32 %v6336_v48, %v2313_v46 }
 0x351   : > { %v2431_v9 = vadd.f32 %v6343_v37, %v2392_v3 }
 0x352   : > { %v2430_v51 = vadd.f32 %v6343_v37, %v2391_v12 }
 0x353   : > { %v2463_v26 = vmax.f32 %v2431_v9, 0.0 }
 0x354   : > { %v2462_v54 = vmax.f32 %v2430_v51, 0.0  ;;  %v2591_v52 = vld [vmem:[#allocation2 + $0x111] sm:$0xff] }
 0x355   : > { %2495 = vst.msk [vmem:[#allocation2 + $0x129] sm:$0xff] %vm279_vm0, %v2463_v26  ;;  %2678 = vrot.lane.b32.xlu1 %v2591_v52, %s5048_s8  ;;  %v2590_v57 = vld [vmem:[#allocation2 + $0x109] sm:$0xff] }
 0x356   : > { %v6549_v55 = vld [vmem:[#allocation2 + $0x110] sm:$0xff]  ;;  %2494 = vst.msk [vmem:[#allocation2 + $0x121] sm:$0xff] %vm279_vm0, %v2462_v54  ;;  %2676 = vrot.lane.b32.xlu0 %v2590_v57, %s5048_s8  ;;  %v4914_v59 = vpop.f32.mrb[24].mxu0  ;;  %v6555_v8 = vld [vmem:[#allocation2 + $0x108] sm:$0xff] }
 0x357   : > { %2559 = vst.msk [vmem:[#allocation3 + $0xb8] sm:$0xff] %vm279_vm0, %v6549_v55  ;;  %v2394_v45 = vmul.f32 %v4914_v59, %v6336_v48  ;;  %v2323_v38 = vpop.f32.mrb[25].mxu0  ;;  %2558 = vst.msk [vmem:[#allocation3 + $0xb0] sm:$0xff] %vm279_vm0, %v6555_v8 }
 0x358   : > { %v2393_v36 = vmul.f32 %v6336_v48, %v2323_v38 }
 0x359   : > { %v2433_v27 = vadd.f32 %v6343_v37, %v2394_v45 }
 0x35a   : > { %v2432_v35 = vadd.f32 %v6343_v37, %v2393_v36 }
 0x35b   : > { %v2465_v33 = vmax.f32 %v2433_v27, 0.0 }
 0x35c   : > { %v2464_v21 = vmax.f32 %v2432_v35, 0.0  ;;  %v2593_v39 = vld [vmem:[#allocation2 + $0x129] sm:$0xff] }
 0x35d   : > { %2497 = vst.msk [vmem:[#allocation2 + $0x141] sm:$0xff] %vm279_vm0, %v2465_v33  ;;  %2682 = vrot.lane.b32.xlu1 %v2593_v39, %s5048_s8  ;;  %v2592_v40 = vld [vmem:[#allocation2 + $0x121] sm:$0xff] }
 0x35e   : > { %v2529_v41 = vld [vmem:[#allocation2 + $0x128] sm:$0xff]  ;;  %2496 = vst.msk [vmem:[#allocation2 + $0x139] sm:$0xff] %vm279_vm0, %v2464_v21  ;;  %2680 = vrot.lane.b32.xlu0 %v2592_v40, %s5048_s8  ;;  %v4917_v42 = vpop.f32.mrb[26].mxu0  ;;  %v2528_v43 = vld [vmem:[#allocation2 + $0x120] sm:$0xff] }
 0x35f   : > { %2561 = vst.msk [vmem:[#allocation3 + $0xc8] sm:$0xff] %vm279_vm0, %v2529_v41  ;;  %v2396_v22 = vmul.f32 %v4917_v42, %v6336_v48  ;;  %v2333_v10 = vpop.f32.mrb[27].mxu0  ;;  %2560 = vst.msk [vmem:[#allocation3 + $0xc0] sm:$0xff] %vm279_vm0, %v2528_v43  ;;  %v2761_v42 = vld [vmem:[#allocation2 + $0xa] sm:$0xff] }
 0x360   : > { %v2395_v1 = vmul.f32 %v6336_v48, %v2333_v10 }
 0x361   : > { %v2435_v18 = vadd.f32 %v6343_v37, %v2396_v22  ;;  %v2760_v22 = vld [vmem:[#allocation2 + $0x2] sm:$0xff] }
 0x362   : > { %v2434_v56 = vadd.f32 %v6343_v37, %v2395_v1 }
 0x363   : > { %v2467_v63 = vmax.f32 %v2435_v18, 0.0  ;;  %v6598_v18 = vld [vmem:[#allocation2 + $0x22] sm:$0xff] }
 0x364   : > { %v2466_v2 = vmax.f32 %v2434_v56, 0.0  ;;  %v2595_v20 = vld [vmem:[#allocation2 + $0x141] sm:$0xff] }
 0x365   : > { %2499 = vst.msk [vmem:[#allocation2 + $0x159] sm:$0xff] %vm279_vm0, %v2467_v63  ;;  %2686 = vrot.lane.b32.xlu1 %v2595_v20, %s5048_s8  ;;  %v2594_v3 = vld [vmem:[#allocation2 + $0x139] sm:$0xff] }
 0x366   : > { %v2531_v46 = vld [vmem:[#allocation2 + $0x140] sm:$0xff]  ;;  %2498 = vst.msk [vmem:[#allocation2 + $0x151] sm:$0xff] %vm279_vm0, %v2466_v2  ;;  %2684 = vrot.lane.b32.xlu0 %v2594_v3, %s5048_s8  ;;  %v2530_v12 = vld [vmem:[#allocation2 + $0x138] sm:$0xff] }
 0x367   : > { %2563 = vst.msk [vmem:[#allocation3 + $0xd8] sm:$0xff] %vm279_vm0, %v2531_v46  ;;  %2562 = vst.msk [vmem:[#allocation3 + $0xd0] sm:$0xff] %vm279_vm0, %v2530_v12  ;;  %v6603_v56 = vld [vmem:[#allocation2 + $0x1a] sm:$0xff]  ;;  %v6611_v2 = vld [vmem:[#allocation2 + $0x32] sm:$0xff] }
 0x368   : > { %v6607_v63 = vld [vmem:[#allocation2 + $0x3a] sm:$0xff]  ;;  %v6616_v46 = vld [vmem:[#allocation2 + $0x52] sm:$0xff]  ;;  %v6621_v12 = vld [vmem:[#allocation2 + $0x4a] sm:$0xff] }
 0x36a   : > { %v4920_v9 = vpop.f32.mrb[28].mxu0 }
 0x36b   : > { %v2398_v51 = vmul.f32 %v4920_v9, %v6336_v48  ;;  %v2343_v26 = vpop.f32.mrb[29].mxu0  ;;  %v6625_v9 = vld [vmem:[#allocation2 + $0x6a] sm:$0xff] }
 0x36c   : > { %v2397_v54 = vmul.f32 %v6336_v48, %v2343_v26  ;;  %v2597_v52 = vld [vmem:[#allocation2 + $0x159] sm:$0xff] }
 0x36d   : > { %v2437_v57 = vadd.f32 %v6343_v37, %v2398_v51  ;;  %2690 = vrot.lane.b32.xlu1 %v2597_v52, %s5048_s8  ;;  %v2596_v59 = vld [vmem:[#allocation2 + $0x151] sm:$0xff]  ;;  %v6629_v51 = vld [vmem:[#allocation2 + $0x62] sm:$0xff] }
 0x36e   : > { %v2533_v45 = vld [vmem:[#allocation2 + $0x158] sm:$0xff]  ;;  %v2436_v38 = vadd.f32 %v6343_v37, %v2397_v54  ;;  %2688 = vrot.lane.b32.xlu0 %v2596_v59, %s5048_s8  ;;  %v2532_v36 = vld [vmem:[#allocation2 + $0x150] sm:$0xff]  ;;  %v6634_v52 = vld [vmem:[#allocation2 + $0x82] sm:$0xff] }
 0x36f   : > { %2565 = vst.msk [vmem:[#allocation3 + $0xe8] sm:$0xff] %vm279_vm0, %v2533_v45  ;;  %v2469_v27 = vmax.f32 %v2437_v57, 0.0  ;;  %2564 = vst.msk [vmem:[#allocation3 + $0xe0] sm:$0xff] %vm279_vm0, %v2532_v36  ;;  %v6639_v57 = vld [vmem:[#allocation2 + $0x7a] sm:$0xff]  ;;  %v6647_v45 = vld [vmem:[#allocation2 + $0x92] sm:$0xff] }
 0x370   : > { %v2468_v35 = vmax.f32 %v2436_v38, 0.0  ;;  %v6643_v59 = vld [vmem:[#allocation2 + $0x9a] sm:$0xff] }
 0x371   : > { %2501 = vst.msk [vmem:[#allocation2 + $0x171] sm:$0xff] %vm279_vm0, %v2469_v27  ;;  %v6652_v27 = vld [vmem:[#allocation2 + $0xb2] sm:$0xff] }
 0x372   : > { %2500 = vst.msk [vmem:[#allocation2 + $0x169] sm:$0xff] %vm279_vm0, %v2468_v35  ;;  %v6657_v35 = vld [vmem:[#allocation2 + $0xaa] sm:$0xff] }
 0x377   : > { %v2639_v33 = vpop.permute.xlu1 %2638 }
 0x378   : > { %2731 = vst.msk [vmem:[#allocation3 + $0x18] sm:$0xff] %vm614_vm3, %v2639_v33  ;;  %v2637_v21 = vpop.permute.xlu0 %2636  ;;  %v2599_v39 = vld [vmem:[#allocation2 + $0x171] sm:$0xff] }
 0x379   : > { %2730 = vst.msk [vmem:[#allocation3 + $0x10] sm:$0xff] %vm614_vm3, %v2637_v21  ;;  %2694 = vrot.lane.b32.xlu1 %v2599_v39, %s5048_s8  ;;  %v2598_v40 = vld [vmem:[#allocation2 + $0x169] sm:$0xff] }
 0x37a   : > { %v2535_v41 = vld [vmem:[#allocation2 + $0x170] sm:$0xff]  ;;  %2692 = vrot.lane.b32.xlu0 %v2598_v40, %s5048_s8  ;;  %v2534_v43 = vld [vmem:[#allocation2 + $0x168] sm:$0xff] }
 0x37b   : > { %2567 = vst.msk [vmem:[#allocation3 + $0xf8] sm:$0xff] %vm279_vm0, %v2535_v41  ;;  %2566 = vst.msk [vmem:[#allocation3 + $0xf0] sm:$0xff] %vm279_vm0, %v2534_v43  ;;  %v6661_v33 = vld [vmem:[#allocation2 + $0xca] sm:$0xff]  ;;  %v6665_v21 = vld [vmem:[#allocation2 + $0xc2] sm:$0xff] }
 0x37c   : > { %v6670_v41 = vld [vmem:[#allocation2 + $0xe2] sm:$0xff]  ;;  %v2781_v43 = vld [vmem:[#allocation2 + $0xfa] sm:$0xff] }
 0x37d   : > { %2826 = vrot.lane.b32.xlu1 %v2761_v42, %s5049_s9  ;;  %v6675_v42 = vld [vmem:[#allocation2 + $0xda] sm:$0xff] }
 0x37e   : > { %2824 = vrot.lane.b32.xlu0 %v2760_v22, %s5049_s9  ;;  %v2780_v22 = vld [vmem:[#allocation2 + $0xf2] sm:$0xff] }
 0x37f   : > { %v2643_v10 = vpop.permute.xlu1 %2642 }
 0x380   : > { %2733 = vst.msk [vmem:[#allocation3 + $0x28] sm:$0xff] %vm614_vm3, %v2643_v10  ;;  %v2641_v1 = vpop.permute.xlu0 %2640 }
 0x381   : > { %2732 = vst.msk [vmem:[#allocation3 + $0x20] sm:$0xff] %vm614_vm3, %v2641_v1  ;;  %2830 = vrot.lane.b32.xlu1 %v6598_v18, %s5049_s9 }
 0x382   : > { %2828 = vrot.lane.b32.xlu0 %v6603_v56, %s5049_s9 }
 0x385   : > { %2834 = vrot.lane.b32.xlu1 %v6607_v63, %s5049_s9 }
 0x386   : > { %2832 = vrot.lane.b32.xlu0 %v6611_v2, %s5049_s9 }
 0x387   : > { %v2647_v20 = vpop.permute.xlu1 %2646 }
 0x388   : > { %2735 = vst.msk [vmem:[#allocation3 + $0x38] sm:$0xff] %vm614_vm3, %v2647_v20  ;;  %v2645_v3 = vpop.permute.xlu0 %2644  ;;  %v2783_v20 = vld [vmem:[#allocation2 + $0x112] sm:$0xff] }
 0x389   : > { %2734 = vst.msk [vmem:[#allocation3 + $0x30] sm:$0xff] %vm614_vm3, %v2645_v3  ;;  %2838 = vrot.lane.b32.xlu1 %v6616_v46, %s5049_s9  ;;  %v2782_v3 = vld [vmem:[#allocation2 + $0x10a] sm:$0xff] }
 0x38a   : > { %2836 = vrot.lane.b32.xlu0 %v6621_v12, %s5049_s9 }
 0x38d   : > { %2842 = vrot.lane.b32.xlu1 %v6625_v9, %s5049_s9 }
 0x38e   : > { %2840 = vrot.lane.b32.xlu0 %v6629_v51, %s5049_s9 }
 0x38f   : > { %v2651_v26 = vpop.permute.xlu1 %2650 }
 0x390   : > { %2737 = vst.msk [vmem:[#allocation3 + $0x48] sm:$0xff] %vm614_vm3, %v2651_v26  ;;  %v2649_v54 = vpop.permute.xlu0 %2648  ;;  %v2785_v26 = vld [vmem:[#allocation2 + $0x12a] sm:$0xff] }
 0x391   : > { %2736 = vst.msk [vmem:[#allocation3 + $0x40] sm:$0xff] %vm614_vm3, %v2649_v54  ;;  %2846 = vrot.lane.b32.xlu1 %v6634_v52, %s5049_s9  ;;  %v2784_v54 = vld [vmem:[#allocation2 + $0x122] sm:$0xff] }
 0x392   : > { %2844 = vrot.lane.b32.xlu0 %v6639_v57, %s5049_s9 }
 0x395   : > { %2850 = vrot.lane.b32.xlu1 %v6643_v59, %s5049_s9 }
 0x396   : > { %2848 = vrot.lane.b32.xlu0 %v6647_v45, %s5049_s9 }
 0x397   : > { %v2655_v38 = vpop.permute.xlu1 %2654 }
 0x398   : > { %2739 = vst.msk [vmem:[#allocation3 + $0x58] sm:$0xff] %vm614_vm3, %v2655_v38  ;;  %v2653_v36 = vpop.permute.xlu0 %2652 }
 0x399   : > { %2738 = vst.msk [vmem:[#allocation3 + $0x50] sm:$0xff] %vm614_vm3, %v2653_v36  ;;  %2854 = vrot.lane.b32.xlu1 %v6652_v27, %s5049_s9 }
 0x39a   : > { %2852 = vrot.lane.b32.xlu0 %v6657_v35, %s5049_s9 }
 0x39d   : > { %2858 = vrot.lane.b32.xlu1 %v6661_v33, %s5049_s9 }
 0x39e   : > { %2856 = vrot.lane.b32.xlu0 %v6665_v21, %s5049_s9 }
 0x39f   : > { %v2659_v39 = vpop.permute.xlu1 %2658 }
 0x3a0   : > { %2741 = vst.msk [vmem:[#allocation3 + $0x68] sm:$0xff] %vm614_vm3, %v2659_v39  ;;  %v2657_v40 = vpop.permute.xlu0 %2656  ;;  %v2787_v39 = vld [vmem:[#allocation2 + $0x142] sm:$0xff] }
 0x3a1   : > { %2740 = vst.msk [vmem:[#allocation3 + $0x60] sm:$0xff] %vm614_vm3, %v2657_v40  ;;  %2862 = vrot.lane.b32.xlu1 %v6670_v41, %s5049_s9  ;;  %v2786_v40 = vld [vmem:[#allocation2 + $0x13a] sm:$0xff] }
 0x3a2   : > { %2860 = vrot.lane.b32.xlu0 %v6675_v42, %s5049_s9 }
 0x3a5   : > { %2866 = vrot.lane.b32.xlu1 %v2781_v43, %s5049_s9  ;;  %v2789_v43 = vld [vmem:[#allocation2 + $0x15a] sm:$0xff] }
 0x3a6   : > { %2864 = vrot.lane.b32.xlu0 %v2780_v22, %s5049_s9  ;;  %v2788_v22 = vld [vmem:[#allocation2 + $0x152] sm:$0xff] }
 0x3a7   : > { %v2663_v10 = vpop.permute.xlu1 %2662 }
 0x3a8   : > { %2743 = vst.msk [vmem:[#allocation3 + $0x78] sm:$0xff] %vm614_vm3, %v2663_v10  ;;  %v2661_v1 = vpop.permute.xlu0 %2660 }
 0x3a9   : > { %2742 = vst.msk [vmem:[#allocation3 + $0x70] sm:$0xff] %vm614_vm3, %v2661_v1  ;;  %2870 = vrot.lane.b32.xlu1 %v2783_v20, %s5049_s9  ;;  %v2791_v20 = vld [vmem:[#allocation2 + $0x172] sm:$0xff] }
 0x3aa   : > { %2868 = vrot.lane.b32.xlu0 %v2782_v3, %s5049_s9  ;;  %v2790_v3 = vld [vmem:[#allocation2 + $0x16a] sm:$0xff] }
 0x3ad   : > { %2874 = vrot.lane.b32.xlu1 %v2785_v26, %s5049_s9 }
 0x3ae   : > { %2872 = vrot.lane.b32.xlu0 %v2784_v54, %s5049_s9 }
 0x3af   : > { %v2667_v38 = vpop.permute.xlu1 %2666 }
 0x3b0   : > { %2745 = vst.msk [vmem:[#allocation3 + $0x88] sm:$0xff] %vm614_vm3, %v2667_v38  ;;  %v2665_v36 = vpop.permute.xlu0 %2664 }
 0x3b1   : > { %2744 = vst.msk [vmem:[#allocation3 + $0x80] sm:$0xff] %vm614_vm3, %v2665_v36  ;;  %2878 = vrot.lane.b32.xlu1 %v2787_v39, %s5049_s9 }
 0x3b2   : > { %2876 = vrot.lane.b32.xlu0 %v2786_v40, %s5049_s9 }
 0x3b5   : > { %2882 = vrot.lane.b32.xlu1 %v2789_v43, %s5049_s9  ;;  %v4136_v43 = vld [vmem:[%s7465_s2] sm:$0xff] }
 0x3b6   : > { %2880 = vrot.lane.b32.xlu0 %v2788_v22, %s5049_s9  ;;  %v4137_v22 = vld [vmem:[%s7465_s2 + $0x8] sm:$0xff] }
 0x3b7   : > { %v2671_v10 = vpop.permute.xlu1 %2670 }
 0x3b8   : > { %2747 = vst.msk [vmem:[#allocation3 + $0x98] sm:$0xff] %vm614_vm3, %v2671_v10  ;;  %v2669_v1 = vpop.permute.xlu0 %2668  ;;  %v5006_v10 = vpack.c.bf16 %v4137_v22, %v4136_v43 }
 0x3b9   : > { %2746 = vst.msk [vmem:[#allocation3 + $0x90] sm:$0xff] %vm614_vm3, %v2669_v1  ;;  %2886 = vrot.lane.b32.xlu1 %v2791_v20, %s5049_s9 }
 0x3ba   : > { %2884 = vrot.lane.b32.xlu0 %v2790_v3, %s5049_s9  ;;  %5007 = vmatprep.subr.bf16.mxu1 %v5006_v10 }
 0x3bb   : > { %5009 = vmatpush3.bf16.msra.mxu1 %v5006_v10 }
 0x3bd   : > { %3018 = vrot.lane.b32.xlu1 %v6364_v13, %s5050_s10 }
 0x3be   : > { %3016 = vrot.lane.b32.xlu0 %v6366_v11, %s5050_s10 }
 0x3bf   : > { %v2675_v26 = vpop.permute.xlu1 %2674 }
 0x3c0   : > { %2749 = vst.msk [vmem:[#allocation3 + $0xa8] sm:$0xff] %vm614_vm3, %v2675_v26  ;;  %v2673_v54 = vpop.permute.xlu0 %2672  ;;  %v4141_v26 = vld [vmem:[%s7465_s2 + $0x28] sm:$0xff] }
 0x3c1   : > { %2748 = vst.msk [vmem:[#allocation3 + $0xa0] sm:$0xff] %vm614_vm3, %v2673_v54  ;;  %3022 = vrot.lane.b32.xlu1 %v6386_v24, %s5050_s10 }
 0x3c2   : > { %3020 = vrot.lane.b32.xlu0 %v6388_v14, %s5050_s10 }
 0x3c5   : > { %3026 = vrot.lane.b32.xlu1 %v6408_v4, %s5050_s10 }
 0x3c6   : > { %3024 = vrot.lane.b32.xlu0 %v6410_v25, %s5050_s10 }
 0x3c7   : > { %v2679_v13 = vpop.permute.xlu1 %2678 }
 0x3c8   : > { %2751 = vst.msk [vmem:[#allocation3 + $0xb8] sm:$0xff] %vm614_vm3, %v2679_v13  ;;  %v2677_v11 = vpop.permute.xlu0 %2676 }
 0x3c9   : > { %2750 = vst.msk [vmem:[#allocation3 + $0xb0] sm:$0xff] %vm614_vm3, %v2677_v11  ;;  %3030 = vrot.lane.b32.xlu1 %v6430_v60, %s5050_s10 }
 0x3ca   : > { %3028 = vrot.lane.b32.xlu0 %v6437_v62, %s5050_s10 }
 0x3cd   : > { %3034 = vrot.lane.b32.xlu1 %v6452_v31, %s5050_s10 }
 0x3ce   : > { %3032 = vrot.lane.b32.xlu0 %v6459_v32, %s5050_s10 }
 0x3cf   : > { %v2683_v38 = vpop.permute.xlu1 %2682 }
 0x3d0   : > { %2753 = vst.msk [vmem:[#allocation3 + $0xc8] sm:$0xff] %vm614_vm3, %v2683_v38  ;;  %v2681_v36 = vpop.permute.xlu0 %2680  ;;  %v4144_v38 = vld [vmem:[%s7465_s2 + $0x40] sm:$0xff] }
 0x3d1   : > { %2752 = vst.msk [vmem:[#allocation3 + $0xc0] sm:$0xff] %vm614_vm3, %v2681_v36  ;;  %3038 = vrot.lane.b32.xlu1 %v6469_v50, %s5050_s10 }
 0x3d2   : > { %3036 = vrot.lane.b32.xlu0 %v6475_v53, %s5050_s10 }
 0x3d5   : > { %3042 = vrot.lane.b32.xlu1 %v6485_v16, %s5050_s10 }
 0x3d6   : > { %3040 = vrot.lane.b32.xlu0 %v6491_v5, %s5050_s10 }
 0x3d7   : > { %v2687_v39 = vpop.permute.xlu1 %2686 }
 0x3d8   : > { %2755 = vst.msk [vmem:[#allocation3 + $0xd8] sm:$0xff] %vm614_vm3, %v2687_v39  ;;  %v2685_v40 = vpop.permute.xlu0 %2684 }
 0x3d9   : > { %2754 = vst.msk [vmem:[#allocation3 + $0xd0] sm:$0xff] %vm614_vm3, %v2685_v40  ;;  %3046 = vrot.lane.b32.xlu1 %v6501_v0, %s5050_s10 }
 0x3da   : > { %3044 = vrot.lane.b32.xlu0 %v6507_v7, %s5050_s10 }
 0x3dd   : > { %3210 = vrot.lane.b32.xlu1 %v6357_v44, %s5051_s11  ;;  %v4138_v44 = vld [vmem:[%s7465_s2 + $0x10] sm:$0xff] }
 0x3de   : > { %3208 = vrot.lane.b32.xlu0 %v6362_v47, %s5051_s11  ;;  %v4139_v47 = vld [vmem:[%s7465_s2 + $0x18] sm:$0xff] }
 0x3df   : > { %v2691_v1 = vpop.permute.xlu1 %2690  ;;  %v5010_v3 = vpack.c.bf16 %v4139_v47, %v4138_v44 }
 0x3e0   : > { %2757 = vst.msk [vmem:[#allocation3 + $0xe8] sm:$0xff] %vm614_vm3, %v2691_v1  ;;  %v2689_v20 = vpop.permute.xlu0 %2688 }
 0x3e1   : > { %2756 = vst.msk [vmem:[#allocation3 + $0xe0] sm:$0xff] %vm614_vm3, %v2689_v20  ;;  %3402 = vrot.lane.b32.xlu1 %v6598_v18, %s5052_s12  ;;  %5011 = vmatprep.subr.bf16.mxu1 %v5010_v3  ;;  %v4140_v18 = vld [vmem:[%s7465_s2 + $0x20] sm:$0xff]  ;;  %v4923_v20 = vpop.f32.mrb[30].mxu0 }
 0x3e2   : > { %3400 = vrot.lane.b32.xlu0 %v6603_v56, %s5052_s12  ;;  %5013 = vmatpush3.bf16.msra.mxu1 %v5010_v3  ;;  %v5014_v54 = vpack.c.bf16 %v4141_v26, %v4140_v18  ;;  %v4143_v56 = vld [vmem:[%s7465_s2 + $0x38] sm:$0xff]  ;;  %v2400_v44 = vmul.f32 %v4923_v20, %v6336_v48  ;;  %v2353_v47 = vpop.f32.mrb[31].mxu0 }
 0x3e3   : > { %v2399_v3 = vmul.f32 %v6336_v48, %v2353_v47 }
 0x3e4   : > { %5015 = vmatprep.subr.bf16.mxu1 %v5014_v54  ;;  %v2439_v18 = vadd.f32 %v6343_v37, %v2400_v44 }
 0x3e5   : > { %3594 = vrot.lane.b32.xlu1 %v6386_v24, %s5053_s13  ;;  %v4142_v24 = vld [vmem:[%s7465_s2 + $0x30] sm:$0xff]  ;;  %v2438_v26 = vadd.f32 %v6343_v37, %v2399_v3 }
 0x3e6   : > { %3592 = vrot.lane.b32.xlu0 %v6388_v14, %s5053_s13  ;;  %5017 = vmatpush3.bf16.msra.mxu1 %v5014_v54  ;;  %v5018_v13 = vpack.c.bf16 %v4143_v56, %v4142_v24 }
 0x3e7   : > { %v2470_v24 = vmax.f32 %v2438_v26, 0.0 }
 0x3e8   : > { %5019 = vmatprep.subr.bf16.mxu1 %v5018_v13 }
 0x3e9   : > { %3212 = vrot.lane.b32.xlu1 %v6384_v23, %s5051_s11  ;;  %2502 = vst.msk [vmem:[#allocation2 + $0x181] sm:$0xff] %vm279_vm0, %v2470_v24 }
 0x3ea   : > { %3784 = vrot.lane.b32.xlu0 %v6384_v23, %s5054_s16  ;;  %5021 = vmatpush3.bf16.msra.mxu1 %v5018_v13 }
 0x3eb   : > { %v2695_v11 = vpop.permute.xlu1 %2694  ;;  %4940 = vmatprep.subr.mxu1 %v4144_v38 }
 0x3ec   : > { %2759 = vst.msk [vmem:[#allocation3 + $0xf8] sm:$0xff] %vm614_vm3, %v2695_v11  ;;  %v2693_v14 = vpop.permute.xlu0 %2692 }
 0x3ed   : > { %2758 = vst.msk [vmem:[#allocation3 + $0xf0] sm:$0xff] %vm614_vm3, %v2693_v14  ;;  %3976 = vrot.lane.b32.xlu1 %v6611_v2, %s5055_s19 }
 0x3ee   : > { %3786 = vrot.lane.b32.xlu0 %v6379_v34, %s5054_s16  ;;  %4941 = vmatpush3.msra.mxu1 %v4144_v38 }
 0x3ef   : > { %v2827_v23 = vpop.permute.xlu1 %2826 }
 0x3f0   : > { %2921 = vst.msk [vmem:[#allocation3 + $0x8] sm:$0xff] %vm807_vm4, %v2827_v23  ;;  %v2825_v36 = vpop.permute.xlu0 %2824 }
 0x3f1   : > { %2920 = vst.msk [vmem:[#allocation3] sm:$0xff] %vm807_vm4, %v2825_v36  ;;  %3404 = vrot.lane.b32.xlu1 %v6611_v2, %s5052_s12 }
 0x3f2   : > { %3214 = vrot.lane.b32.xlu0 %v6379_v34, %s5051_s11 }
 0x3f3   : > { %v2831_v39 = vpop.permute.xlu1 %2830 }
 0x3f4   : > { %2923 = vst.msk [vmem:[#allocation3 + $0x18] sm:$0xff] %vm807_vm4, %v2831_v39  ;;  %v2829_v40 = vpop.permute.xlu0 %2828 }
 0x3f5   : > { %2922 = vst.msk [vmem:[#allocation3 + $0x10] sm:$0xff] %vm807_vm4, %v2829_v40  ;;  %3406 = vrot.lane.b32.xlu1 %v6607_v63, %s5052_s12 }
 0x3f6   : > { %3978 = vrot.lane.b32.xlu0 %v6607_v63, %s5055_s19 }
 0x3f7   : > { %v2835_v43 = vpop.permute.xlu1 %2834 }
 0x3f8   : > { %2925 = vst.msk [vmem:[#allocation3 + $0x28] sm:$0xff] %vm807_vm4, %v2835_v43  ;;  %v2833_v2 = vpop.permute.xlu0 %2832  ;;  %v3154_v43 = vld [vmem:[#allocation2 + $0x91] sm:$0xff] }
 0x3f9   : > { %2924 = vst.msk [vmem:[#allocation3 + $0x20] sm:$0xff] %vm807_vm4, %v2833_v2  ;;  %3598 = vrot.lane.b32.xlu1 %v6408_v4, %s5053_s13 }
 0x3fa   : > { %3596 = vrot.lane.b32.xlu0 %v6410_v25, %s5053_s13 }
 0x3fb   : > { %v2839_v34 = vpop.permute.xlu1 %2838 }
 0x3fc   : > { %2927 = vst.msk [vmem:[#allocation3 + $0x38] sm:$0xff] %vm807_vm4, %v2839_v34  ;;  %v2837_v22 = vpop.permute.xlu0 %2836 }
 0x3fd   : > { %2926 = vst.msk [vmem:[#allocation3 + $0x30] sm:$0xff] %vm807_vm4, %v2837_v22  ;;  %3216 = vrot.lane.b32.xlu1 %v6406_v49, %s5051_s11 }
 0x3fe   : > { %3788 = vrot.lane.b32.xlu0 %v6406_v49, %s5054_s16 }
 0x3ff   : > { %v2843_v63 = vpop.permute.xlu1 %2842 }
 0x400   : > { %2929 = vst.msk [vmem:[#allocation3 + $0x48] sm:$0xff] %vm807_vm4, %v2843_v63  ;;  %v2841_v10 = vpop.permute.xlu0 %2840 }
 0x401   : > { %2928 = vst.msk [vmem:[#allocation3 + $0x40] sm:$0xff] %vm807_vm4, %v2841_v10  ;;  %3980 = vrot.lane.b32.xlu1 %v6621_v12, %s5055_s19 }
 0x402   : > { %3790 = vrot.lane.b32.xlu0 %v6401_v6, %s5054_s16 }
 0x403   : > { %v2847_v4 = vpop.permute.xlu1 %2846 }
 0x404   : > { %2931 = vst.msk [vmem:[#allocation3 + $0x58] sm:$0xff] %vm807_vm4, %v2847_v4  ;;  %v2845_v25 = vpop.permute.xlu0 %2844 }
 0x405   : > { %2930 = vst.msk [vmem:[#allocation3 + $0x50] sm:$0xff] %vm807_vm4, %v2845_v25  ;;  %3408 = vrot.lane.b32.xlu1 %v6621_v12, %s5052_s12 }
 0x406   : > { %3218 = vrot.lane.b32.xlu0 %v6401_v6, %s5051_s11 }
 0x407   : > { %v2851_v49 = vpop.permute.xlu1 %2850 }
 0x408   : > { %2933 = vst.msk [vmem:[#allocation3 + $0x68] sm:$0xff] %vm807_vm4, %v2851_v49  ;;  %v2849_v1 = vpop.permute.xlu0 %2848  ;;  %v3156_v49 = vld [vmem:[#allocation2 + $0xa9] sm:$0xff] }
 0x409   : > { %2932 = vst.msk [vmem:[#allocation3 + $0x60] sm:$0xff] %vm807_vm4, %v2849_v1  ;;  %3410 = vrot.lane.b32.xlu1 %v6616_v46, %s5052_s12 }
 0x40a   : > { %3982 = vrot.lane.b32.xlu0 %v6616_v46, %s5055_s19  ;;  %v2471_v46 = vmax.f32 %v2439_v18, 0.0  ;;  %v3158_v18 = vld [vmem:[#allocation2 + $0xc1] sm:$0xff] }
 0x40b   : > { %v2855_v12 = vpop.permute.xlu1 %2854 }
 0x40c   : > { %2935 = vst.msk [vmem:[#allocation3 + $0x78] sm:$0xff] %vm807_vm4, %v2855_v12  ;;  %v2853_v6 = vpop.permute.xlu0 %2852 }
 0x40d   : > { %2934 = vst.msk [vmem:[#allocation3 + $0x70] sm:$0xff] %vm807_vm4, %v2853_v6  ;;  %3602 = vrot.lane.b32.xlu1 %v6430_v60, %s5053_s13 }
 0x40e   : > { %3600 = vrot.lane.b32.xlu0 %v6437_v62, %s5053_s13  ;;  %2503 = vst.msk [vmem:[#allocation2 + $0x189] sm:$0xff] %vm279_vm0, %v2471_v46 }
 0x40f   : > { %v2859_v54 = vpop.permute.xlu1 %2858 }
 0x410   : > { %2937 = vst.msk [vmem:[#allocation3 + $0x88] sm:$0xff] %vm807_vm4, %v2859_v54  ;;  %v2857_v48 = vpop.permute.xlu0 %2856 }
 0x411   : > { %2936 = vst.msk [vmem:[#allocation3 + $0x80] sm:$0xff] %vm807_vm4, %v2857_v48  ;;  %3220 = vrot.lane.b32.xlu1 %v6428_v61, %s5051_s11 }
 0x412   : > { %3792 = vrot.lane.b32.xlu0 %v6428_v61, %s5054_s16 }
 0x413   : > { %v2863_v37 = vpop.permute.xlu1 %2862 }
 0x414   : > { %2939 = vst.msk [vmem:[#allocation3 + $0x98] sm:$0xff] %vm807_vm4, %v2863_v37  ;;  %v2861_v60 = vpop.permute.xlu0 %2860 }
 0x415   : > { %2938 = vst.msk [vmem:[#allocation3 + $0x90] sm:$0xff] %vm807_vm4, %v2861_v60  ;;  %3984 = vrot.lane.b32.xlu1 %v6629_v51, %s5055_s19 }
 0x416   : > { %3794 = vrot.lane.b32.xlu0 %v6423_v58, %s5054_s16 }
 0x417   : > { %v2867_v62 = vpop.permute.xlu1 %2866 }
 0x418   : > { %2941 = vst.msk [vmem:[#allocation3 + $0xa8] sm:$0xff] %vm807_vm4, %v2867_v62  ;;  %v2865_v56 = vpop.permute.xlu0 %2864 }
 0x419   : > { %2940 = vst.msk [vmem:[#allocation3 + $0xa0] sm:$0xff] %vm807_vm4, %v2865_v56  ;;  %3412 = vrot.lane.b32.xlu1 %v6629_v51, %s5052_s12 }
 0x41a   : > { %3222 = vrot.lane.b32.xlu0 %v6423_v58, %s5051_s11 }
 0x41b   : > { %v2871_v61 = vpop.permute.xlu1 %2870 }
 0x41c   : > { %2943 = vst.msk [vmem:[#allocation3 + $0xb8] sm:$0xff] %vm807_vm4, %v2871_v61  ;;  %v2869_v13 = vpop.permute.xlu0 %2868 }
 0x41d   : > { %2942 = vst.msk [vmem:[#allocation3 + $0xb0] sm:$0xff] %vm807_vm4, %v2869_v13  ;;  %3414 = vrot.lane.b32.xlu1 %v6625_v9, %s5052_s12 }
 0x41e   : > { %3986 = vrot.lane.b32.xlu0 %v6625_v9, %s5055_s19 }
 0x41f   : > { %v2875_v11 = vpop.permute.xlu1 %2874 }
 0x420   : > { %2945 = vst.msk [vmem:[#allocation3 + $0xc8] sm:$0xff] %vm807_vm4, %v2875_v11  ;;  %v2873_v14 = vpop.permute.xlu0 %2872 }
 0x421   : > { %2944 = vst.msk [vmem:[#allocation3 + $0xc0] sm:$0xff] %vm807_vm4, %v2873_v14  ;;  %3606 = vrot.lane.b32.xlu1 %v6452_v31, %s5053_s13 }
 0x422   : > { %3604 = vrot.lane.b32.xlu0 %v6459_v32, %s5053_s13 }
 0x423   : > { %v2879_v58 = vpop.permute.xlu1 %2878 }
 0x424   : > { %2947 = vst.msk [vmem:[#allocation3 + $0xd8] sm:$0xff] %vm807_vm4, %v2879_v58  ;;  %v2877_v51 = vpop.permute.xlu0 %2876  ;;  %v3735_v58 = vld [vmem:[#allocation2 + $0xe1] sm:$0xff] }
 0x425   : > { %2946 = vst.msk [vmem:[#allocation3 + $0xd0] sm:$0xff] %vm807_vm4, %v2877_v51  ;;  %3224 = vrot.lane.b32.xlu1 %v6450_v28, %s5051_s11 }
 0x426   : > { %3796 = vrot.lane.b32.xlu0 %v6450_v28, %s5054_s16  ;;  %v3153_v28 = vld [vmem:[#allocation2 + $0x81] sm:$0xff] }
 0x427   : > { %v2883_v9 = vpop.permute.xlu1 %2882 }
 0x428   : > { %2949 = vst.msk [vmem:[#allocation3 + $0xe8] sm:$0xff] %vm807_vm4, %v2883_v9  ;;  %v2881_v38 = vpop.permute.xlu0 %2880 }
 0x429   : > { %2948 = vst.msk [vmem:[#allocation3 + $0xe0] sm:$0xff] %vm807_vm4, %v2881_v38  ;;  %3988 = vrot.lane.b32.xlu1 %v6639_v57, %s5055_s19 }
 0x42a   : > { %3798 = vrot.lane.b32.xlu0 %v6445_v30, %s5054_s16 }
 0x42b   : > { %v2887_v31 = vpop.permute.xlu1 %2886 }
 0x42c   : > { %2951 = vst.msk [vmem:[#allocation3 + $0xf8] sm:$0xff] %vm807_vm4, %v2887_v31  ;;  %v2885_v32 = vpop.permute.xlu0 %2884 }
 0x42d   : > { %2950 = vst.msk [vmem:[#allocation3 + $0xf0] sm:$0xff] %vm807_vm4, %v2885_v32  ;;  %3416 = vrot.lane.b32.xlu1 %v6639_v57, %s5052_s12 }
 0x42e   : > { %3226 = vrot.lane.b32.xlu0 %v3153_v28, %s5051_s11 }
 0x42f   : > { %v3019_v23 = vpop.permute.xlu1 %3018 }
 0x430   : > { %3113 = vst.msk [vmem:[#allocation3 + $0x8] sm:$0xff] %vm1000_vm5, %v3019_v23  ;;  %v3017_v36 = vpop.permute.xlu0 %3016 }
 0x431   : > { %3112 = vst.msk [vmem:[#allocation3] sm:$0xff] %vm1000_vm5, %v3017_v36  ;;  %3418 = vrot.lane.b32.xlu1 %v6634_v52, %s5052_s12  ;;  %v3736_v36 = vld [vmem:[#allocation2 + $0xf1] sm:$0xff] }
 0x432   : > { %3990 = vrot.lane.b32.xlu0 %v6634_v52, %s5055_s19 }
 0x433   : > { %v3023_v30 = vpop.permute.xlu1 %3022 }
 0x434   : > { %3115 = vst.msk [vmem:[#allocation3 + $0x18] sm:$0xff] %vm1000_vm5, %v3023_v30  ;;  %v3021_v39 = vpop.permute.xlu0 %3020 }
 0x435   : > { %3114 = vst.msk [vmem:[#allocation3 + $0x10] sm:$0xff] %vm1000_vm5, %v3021_v39  ;;  %3610 = vrot.lane.b32.xlu1 %v6469_v50, %s5053_s13  ;;  %v3729_v50 = vld [vmem:[#allocation2 + $0x99] sm:$0xff] }
 0x436   : > { %3608 = vrot.lane.b32.xlu0 %v6475_v53, %s5053_s13 }
 0x437   : > { %v3027_v57 = vpop.permute.xlu1 %3026 }
 0x438   : > { %3117 = vst.msk [vmem:[#allocation3 + $0x28] sm:$0xff] %vm1000_vm5, %v3027_v57  ;;  %v3025_v40 = vpop.permute.xlu0 %3024 }
 0x439   : > { %3116 = vst.msk [vmem:[#allocation3 + $0x20] sm:$0xff] %vm1000_vm5, %v3025_v40  ;;  %3228 = vrot.lane.b32.xlu1 %v3154_v43, %s5051_s11  ;;  %v3928_v40 = vld [vmem:[#allocation2 + $0xf2] sm:$0xff] }
 0x43a   : > { %3800 = vrot.lane.b32.xlu0 %v3154_v43, %s5054_s16  ;;  %v3737_v43 = vld [vmem:[#allocation2 + $0xf9] sm:$0xff] }
 0x43b   : > { %v3031_v52 = vpop.permute.xlu1 %3030 }
 0x43c   : > { %3119 = vst.msk [vmem:[#allocation3 + $0x38] sm:$0xff] %vm1000_vm5, %v3031_v52  ;;  %v3029_v2 = vpop.permute.xlu0 %3028 }
 0x43d   : > { %3118 = vst.msk [vmem:[#allocation3 + $0x30] sm:$0xff] %vm1000_vm5, %v3029_v2  ;;  %3992 = vrot.lane.b32.xlu1 %v6647_v45, %s5055_s19 }
 0x43e   : > { %3802 = vrot.lane.b32.xlu0 %v3729_v50, %s5054_s16 }
 0x43f   : > { %v3035_v53 = vpop.permute.xlu1 %3034 }
 0x440   : > { %3121 = vst.msk [vmem:[#allocation3 + $0x48] sm:$0xff] %vm1000_vm5, %v3035_v53  ;;  %v3033_v34 = vpop.permute.xlu0 %3032 }
 0x441   : > { %3120 = vst.msk [vmem:[#allocation3 + $0x40] sm:$0xff] %vm1000_vm5, %v3033_v34  ;;  %3420 = vrot.lane.b32.xlu1 %v6647_v45, %s5052_s12  ;;  %v3355_v34 = vld [vmem:[#allocation2 + $0xfa] sm:$0xff] }
 0x442   : > { %3230 = vrot.lane.b32.xlu0 %v3729_v50, %s5051_s11 }
 0x443   : > { %v3039_v22 = vpop.permute.xlu1 %3038 }
 0x444   : > { %3123 = vst.msk [vmem:[#allocation3 + $0x58] sm:$0xff] %vm1000_vm5, %v3039_v22  ;;  %v3037_v63 = vpop.permute.xlu0 %3036 }
 0x445   : > { %3122 = vst.msk [vmem:[#allocation3 + $0x50] sm:$0xff] %vm1000_vm5, %v3037_v63  ;;  %3422 = vrot.lane.b32.xlu1 %v6643_v59, %s5052_s12 }
 0x446   : > { %3994 = vrot.lane.b32.xlu0 %v6643_v59, %s5055_s19 }
 0x447   : > { %v3043_v10 = vpop.permute.xlu1 %3042 }
 0x448   : > { %3125 = vst.msk [vmem:[#allocation3 + $0x68] sm:$0xff] %vm1000_vm5, %v3043_v10  ;;  %v3041_v4 = vpop.permute.xlu0 %3040 }
 0x449   : > { %3124 = vst.msk [vmem:[#allocation3 + $0x60] sm:$0xff] %vm1000_vm5, %v3041_v4  ;;  %3614 = vrot.lane.b32.xlu1 %v6485_v16, %s5053_s13  ;;  %v3731_v16 = vld [vmem:[#allocation2 + $0xb1] sm:$0xff] }
 0x44a   : > { %3612 = vrot.lane.b32.xlu0 %v6491_v5, %s5053_s13 }
 0x44b   : > { %v3047_v45 = vpop.permute.xlu1 %3046 }
 0x44c   : > { %3127 = vst.msk [vmem:[#allocation3 + $0x78] sm:$0xff] %vm1000_vm5, %v3047_v45  ;;  %v3045_v25 = vpop.permute.xlu0 %3044 }
 0x44d   : > { %3126 = vst.msk [vmem:[#allocation3 + $0x70] sm:$0xff] %vm1000_vm5, %v3045_v25  ;;  %3232 = vrot.lane.b32.xlu1 %v3156_v49, %s5051_s11  ;;  %v3738_v25 = vld [vmem:[#allocation2 + $0x109] sm:$0xff] }
 0x44e   : > { %3804 = vrot.lane.b32.xlu0 %v3156_v49, %s5054_s16 }
 0x44f   : > { %v3211_v59 = vpop.permute.xlu1 %3210 }
 0x450   : > { %3305 = vst.msk [vmem:[#allocation3 + $0x8] sm:$0xff] %vm1193_vm6, %v3211_v59  ;;  %v3209_v1 = vpop.permute.xlu0 %3208 }
 0x451   : > { %3304 = vst.msk [vmem:[#allocation3] sm:$0xff] %vm1193_vm6, %v3209_v1  ;;  %3996 = vrot.lane.b32.xlu1 %v6657_v35, %s5055_s19 }
 0x452   : > { %3806 = vrot.lane.b32.xlu0 %v3731_v16, %s5054_s16 }
 0x453   : > { %v3403_v5 = vpop.permute.xlu1 %3402 }
 0x454   : > { %3497 = vst.msk [vmem:[#allocation3 + $0x8] sm:$0xff] %vm1386_vm7, %v3403_v5  ;;  %v3401_v20 = vpop.permute.xlu0 %3400 }
 0x455   : > { %3496 = vst.msk [vmem:[#allocation3] sm:$0xff] %vm1386_vm7, %v3401_v20  ;;  %3424 = vrot.lane.b32.xlu1 %v6657_v35, %s5052_s12  ;;  %v3739_v20 = vld [vmem:[#allocation2 + $0x111] sm:$0xff] }
 0x456   : > { %3234 = vrot.lane.b32.xlu0 %v3731_v16, %s5051_s11  ;;  %v3930_v16 = vld [vmem:[#allocation2 + $0x10a] sm:$0xff] }
 0x457   : > { %v3595_v44 = vpop.permute.xlu1 %3594 }
 0x458   : > { %3689 = vst.msk [vmem:[#allocation3 + $0x8] sm:$0xff] %vm1580_vm8, %v3595_v44  ;;  %v3593_v47 = vpop.permute.xlu0 %3592 }
 0x459   : > { %3688 = vst.msk [vmem:[#allocation3] sm:$0xff] %vm1580_vm8, %v3593_v47  ;;  %3426 = vrot.lane.b32.xlu1 %v6652_v27, %s5052_s12 }
 0x45a   : > { %3998 = vrot.lane.b32.xlu0 %v6652_v27, %s5055_s19 }
 0x45b   : > { %v3213_v12 = vpop.permute.xlu1 %3212 }
 0x45c   : > { %3306 = vst.msk [vmem:[#allocation3 + $0x10] sm:$0xff] %vm1193_vm6, %v3213_v12  ;;  %v3785_v3 = vpop.permute.xlu0 %3784 }
 0x45d   : > { %3880 = vst.msk [vmem:[#allocation3] sm:$0xff] %vm1773_vm9, %v3785_v3  ;;  %3618 = vrot.lane.b32.xlu1 %v6501_v0, %s5053_s13  ;;  %v3733_v0 = vld [vmem:[#allocation2 + $0xc9] sm:$0xff]  ;;  %v3357_v3 = vld [vmem:[#allocation2 + $0x112] sm:$0xff] }
 0x45e   : > { %3616 = vrot.lane.b32.xlu0 %v6507_v7, %s5053_s13 }
 0x45f   : > { %v3977_v35 = vpop.permute.xlu1 %3976 }
 0x460   : > { %4072 = vst.msk [vmem:[#allocation3] sm:$0xff] %vm1966_vm10, %v3977_v35  ;;  %v3787_v6 = vpop.permute.xlu0 %3786 }
 0x461   : > { %3881 = vst.msk [vmem:[#allocation3 + $0x8] sm:$0xff] %vm1773_vm9, %v3787_v6  ;;  %3236 = vrot.lane.b32.xlu1 %v3158_v18, %s5051_s11 }
 0x462   : > { %3808 = vrot.lane.b32.xlu0 %v3158_v18, %s5054_s16 }
 0x463   : > { %v3405_v27 = vpop.permute.xlu1 %3404 }
 0x464   : > { %3498 = vst.msk [vmem:[#allocation3 + $0x10] sm:$0xff] %vm1386_vm7, %v3405_v27  ;;  %v3215_v26 = vpop.permute.xlu0 %3214  ;;  %v2974_v27 = vld [vmem:[#allocation2 + $0x120] sm:$0xff] }
 0x465   : > { %3307 = vst.msk [vmem:[#allocation3 + $0x18] sm:$0xff] %vm1193_vm6, %v3215_v26  ;;  %4000 = vrot.lane.b32.xlu1 %v6665_v21, %s5055_s19 }
 0x466   : > { %3810 = vrot.lane.b32.xlu0 %v3733_v0, %s5054_s16 }
 0x467   : > { %v3407_v7 = vpop.permute.xlu1 %3406  ;;  %v4104_v46 = vld [vmem:[#allocation3] sm:$0xff] }
 0x468   : > { %3499 = vst.msk [vmem:[#allocation3 + $0x18] sm:$0xff] %vm1386_vm7, %v3407_v7  ;;  %4942 = vmatprep.mubr.msk.f32.mxu1 %vm2040_vm11, %v4104_v46  ;;  %v3979_v54 = vpop.permute.xlu0 %3978  ;;  %v3740_v7 = vld [vmem:[#allocation2 + $0x121] sm:$0xff] }
 0x469   : > { %4073 = vst.msk [vmem:[#allocation3 + $0x8] sm:$0xff] %vm1966_vm10, %v3979_v54  ;;  %3428 = vrot.lane.b32.xlu1 %v6665_v21, %s5052_s12  ;;  %v3549_v46 = vld [vmem:[#allocation2 + $0x128] sm:$0xff] }
 0x46a   : > { %3238 = vrot.lane.b32.xlu0 %v3733_v0, %s5051_s11 }
 0x46b   : > { %v3599_v24 = vpop.permute.xlu1 %3598 }
 0x46c   : > { %3691 = vst.msk [vmem:[#allocation3 + $0x18] sm:$0xff] %vm1580_vm8, %v3599_v24  ;;  %v3597_v48 = vpop.permute.xlu0 %3596 }
 0x46d   : > { %3690 = vst.msk [vmem:[#allocation3 + $0x10] sm:$0xff] %vm1580_vm8, %v3597_v48  ;;  %3430 = vrot.lane.b32.xlu1 %v6661_v33, %s5052_s12 }
 0x46e   : > { %4002 = vrot.lane.b32.xlu0 %v6661_v33, %s5055_s19  ;;  %v3734_v33 = vld [vmem:[#allocation2 + $0xd9] sm:$0xff] }
 0x46f   : > { %v3217_v37 = vpop.permute.xlu1 %3216 }
 0x470   : > { %3308 = vst.msk [vmem:[#allocation3 + $0x20] sm:$0xff] %vm1193_vm6, %v3217_v37  ;;  %v3789_v60 = vpop.permute.xlu0 %3788  ;;  %v4105_v62 = vld [vmem:[#allocation3 + $0x8] sm:$0xff] }
 0x471   : > { %3882 = vst.msk [vmem:[#allocation3 + $0x10] sm:$0xff] %vm1773_vm9, %v3789_v60  ;;  %3048 = vrot.lane.b32.xlu1 %v6523_v17, %s5050_s10  ;;  %4943 = vmatmul.mubr.msk.f32.vlgmr.msra.gmra.mrb[0].mxu1 %vm2040_vm11, %v4105_v62  ;;  %v3932_v62 = vld [vmem:[#allocation2 + $0x122] sm:$0xff] }
 0x472   : > { %3620 = vrot.lane.b32.xlu0 %v6523_v17, %s5053_s13 }
 0x473   : > { %v3981_v21 = vpop.permute.xlu1 %3980 }
 0x474   : > { %4074 = vst.msk [vmem:[#allocation3 + $0x10] sm:$0xff] %vm1966_vm10, %v3981_v21  ;;  %v3791_v56 = vpop.permute.xlu0 %3790  ;;  %v3741_v21 = vld [vmem:[#allocation2 + $0x129] sm:$0xff] }
 0x475   : > { %3883 = vst.msk [vmem:[#allocation3 + $0x18] sm:$0xff] %vm1773_vm9, %v3791_v56  ;;  %3812 = vrot.lane.b32.xlu1 %v3734_v33, %s5054_s16 }
 0x476   : > { %3622 = vrot.lane.b32.xlu0 %v6517_v29, %s5053_s13 }
 0x477   : > { %v3409_v61 = vpop.permute.xlu1 %3408 }
 0x478   : > { %3500 = vst.msk [vmem:[#allocation3 + $0x20] sm:$0xff] %vm1386_vm7, %v3409_v61  ;;  %v3219_v13 = vpop.permute.xlu0 %3218 }
 0x479   : > { %3309 = vst.msk [vmem:[#allocation3 + $0x28] sm:$0xff] %vm1193_vm6, %v3219_v13  ;;  %3240 = vrot.lane.b32.xlu1 %v3734_v33, %s5051_s11 }
 0x47a   : > { %3050 = vrot.lane.b32.xlu0 %v6517_v29, %s5050_s10 }
 0x47b   : > { %v3411_v17 = vpop.permute.xlu1 %3410  ;;  %v4106_v11 = vld [vmem:[#allocation3 + $0x10] sm:$0xff] }
 0x47c   : > { %3501 = vst.msk [vmem:[#allocation3 + $0x28] sm:$0xff] %vm1386_vm7, %v3411_v17  ;;  %4945 = vmatprep.mubr.msk.f32.mxu1 %vm2040_vm11, %v4106_v11  ;;  %v3983_v14 = vpop.permute.xlu0 %3982  ;;  %v3359_v11 = vld [vmem:[#allocation2 + $0x12a] sm:$0xff] }
 0x47d   : > { %4075 = vst.msk [vmem:[#allocation3 + $0x18] sm:$0xff] %vm1966_vm10, %v3983_v14  ;;  %4004 = vrot.lane.b32.xlu1 %v6675_v42, %s5055_s19 }
 0x47e   : > { %3814 = vrot.lane.b32.xlu0 %v3735_v58, %s5054_s16 }
 0x47f   : > { %v3603_v51 = vpop.permute.xlu1 %3602 }
 0x480   : > { %3693 = vst.msk [vmem:[#allocation3 + $0x28] sm:$0xff] %vm1580_vm8, %v3603_v51  ;;  %v3601_v9 = vpop.permute.xlu0 %3600  ;;  %v2976_v51 = vld [vmem:[#allocation2 + $0x138] sm:$0xff] }
 0x481   : > { %3692 = vst.msk [vmem:[#allocation3 + $0x20] sm:$0xff] %vm1580_vm8, %v3601_v9  ;;  %3432 = vrot.lane.b32.xlu1 %v6675_v42, %s5052_s12 }
 0x482   : > { %3242 = vrot.lane.b32.xlu0 %v3735_v58, %s5051_s11 }
 0x483   : > { %v3221_v29 = vpop.permute.xlu1 %3220 }
 0x484   : > { %3310 = vst.msk [vmem:[#allocation3 + $0x30] sm:$0xff] %vm1193_vm6, %v3221_v29  ;;  %v3793_v38 = vpop.permute.xlu0 %3792  ;;  %v4107_v31 = vld [vmem:[#allocation3 + $0x18] sm:$0xff] }
 0x485   : > { %3884 = vst.msk [vmem:[#allocation3 + $0x20] sm:$0xff] %vm1773_vm9, %v3793_v38  ;;  %3434 = vrot.lane.b32.xlu1 %v6670_v41, %s5052_s12  ;;  %4946 = vmatmul.mubr.msk.f32.gmra.mrb[2].mxu1 %vm2040_vm11, %v4107_v31  ;;  %v3742_v38 = vld [vmem:[#allocation2 + $0x139] sm:$0xff] }
 0x486   : > { %4006 = vrot.lane.b32.xlu0 %v6670_v41, %s5055_s19 }
 0x487   : > { %v3985_v32 = vpop.permute.xlu1 %3984 }
 0x488   : > { %4076 = vst.msk [vmem:[#allocation3 + $0x20] sm:$0xff] %vm1966_vm10, %v3985_v32  ;;  %v3795_v42 = vpop.permute.xlu0 %3794  ;;  %v3551_v32 = vld [vmem:[#allocation2 + $0x140] sm:$0xff] }
 0x489   : > { %3885 = vst.msk [vmem:[#allocation3 + $0x28] sm:$0xff] %vm1773_vm9, %v3795_v42  ;;  %3052 = vrot.lane.b32.xlu1 %v6539_v15, %s5050_s10 }
 0x48a   : > { %3624 = vrot.lane.b32.xlu0 %v6539_v15, %s5053_s13 }
 0x48b   : > { %v3413_v28 = vpop.permute.xlu1 %3412 }
 0x48c   : > { %3502 = vst.msk [vmem:[#allocation3 + $0x30] sm:$0xff] %vm1386_vm7, %v3413_v28  ;;  %v3223_v23 = vpop.permute.xlu0 %3222 }
 0x48d   : > { %3311 = vst.msk [vmem:[#allocation3 + $0x38] sm:$0xff] %vm1193_vm6, %v3223_v23  ;;  %3816 = vrot.lane.b32.xlu1 %v3736_v36, %s5054_s16 }
 0x48e   : > { %3626 = vrot.lane.b32.xlu0 %v6533_v19, %s5053_s13 }
 0x48f   : > { %v3415_v41 = vpop.permute.xlu1 %3414  ;;  %v4108_v30 = vld [vmem:[#allocation3 + $0x20] sm:$0xff] }
 0x490   : > { %3503 = vst.msk [vmem:[#allocation3 + $0x38] sm:$0xff] %vm1386_vm7, %v3415_v41  ;;  %4948 = vmatprep.mubr.msk.f32.mxu1 %vm2040_vm11, %v4108_v30  ;;  %v3987_v39 = vpop.permute.xlu0 %3986  ;;  %v3934_v41 = vld [vmem:[#allocation2 + $0x13a] sm:$0xff] }
 0x491   : > { %4077 = vst.msk [vmem:[#allocation3 + $0x28] sm:$0xff] %vm1966_vm10, %v3987_v39  ;;  %3244 = vrot.lane.b32.xlu1 %v3736_v36, %s5051_s11  ;;  %v3743_v30 = vld [vmem:[#allocation2 + $0x141] sm:$0xff] }
 0x492   : > { %3054 = vrot.lane.b32.xlu0 %v6533_v19, %s5050_s10 }
 0x493   : > { %v3607_v15 = vpop.permute.xlu1 %3606 }
 0x494   : > { %3695 = vst.msk [vmem:[#allocation3 + $0x38] sm:$0xff] %vm1580_vm8, %v3607_v15  ;;  %v3605_v57 = vpop.permute.xlu0 %3604 }
 0x495   : > { %3694 = vst.msk [vmem:[#allocation3 + $0x30] sm:$0xff] %vm1580_vm8, %v3605_v57  ;;  %4008 = vrot.lane.b32.xlu1 %v3928_v40, %s5055_s19 }
 0x496   : > { %3818 = vrot.lane.b32.xlu0 %v3737_v43, %s5054_s16 }
 0x497   : > { %v3225_v52 = vpop.permute.xlu1 %3224 }
 0x498   : > { %3312 = vst.msk [vmem:[#allocation3 + $0x40] sm:$0xff] %vm1193_vm6, %v3225_v52  ;;  %v3797_v2 = vpop.permute.xlu0 %3796  ;;  %v4109_v50 = vld [vmem:[#allocation3 + $0x28] sm:$0xff]  ;;  %v3361_v52 = vld [vmem:[#allocation2 + $0x142] sm:$0xff] }
 0x499   : > { %3886 = vst.msk [vmem:[#allocation3 + $0x30] sm:$0xff] %vm1773_vm9, %v3797_v2  ;;  %3436 = vrot.lane.b32.xlu1 %v3928_v40, %s5052_s12  ;;  %4949 = vmatmul.mubr.msk.f32.gmra.mrb[4].mxu1 %vm2040_vm11, %v4109_v50 }
 0x49a   : > { %3246 = vrot.lane.b32.xlu0 %v3737_v43, %s5051_s11 }
 0x49b   : > { %v3989_v19 = vpop.permute.xlu1 %3988 }
 0x49c   : > { %4078 = vst.msk [vmem:[#allocation3 + $0x30] sm:$0xff] %vm1966_vm10, %v3989_v19  ;;  %v3799_v53 = vpop.permute.xlu0 %3798  ;;  %v2978_v19 = vld [vmem:[#allocation2 + $0x150] sm:$0xff] }
 0x49d   : > { %3887 = vst.msk [vmem:[#allocation3 + $0x38] sm:$0xff] %vm1773_vm9, %v3799_v53  ;;  %3438 = vrot.lane.b32.xlu1 %v3355_v34, %s5052_s12 }
 0x49e   : > { %4010 = vrot.lane.b32.xlu0 %v3355_v34, %s5055_s19 }
 0x49f   : > { %v3417_v22 = vpop.permute.xlu1 %3416 }
 0x4a0   : > { %3504 = vst.msk [vmem:[#allocation3 + $0x40] sm:$0xff] %vm1386_vm7, %v3417_v22  ;;  %v3227_v63 = vpop.permute.xlu0 %3226 }
 0x4a1   : > { %3313 = vst.msk [vmem:[#allocation3 + $0x48] sm:$0xff] %vm1193_vm6, %v3227_v63  ;;  %3056 = vrot.lane.b32.xlu1 %v6555_v8, %s5050_s10  ;;  %v3744_v63 = vld [vmem:[#allocation2 + $0x151] sm:$0xff] }
 0x4a2   : > { %3628 = vrot.lane.b32.xlu0 %v6555_v8, %s5053_s13 }
 0x4a3   : > { %v3419_v10 = vpop.permute.xlu1 %3418  ;;  %v4110_v4 = vld [vmem:[#allocation3 + $0x30] sm:$0xff] }
 0x4a4   : > { %3505 = vst.msk [vmem:[#allocation3 + $0x48] sm:$0xff] %vm1386_vm7, %v3419_v10  ;;  %4951 = vmatprep.mubr.msk.f32.mxu1 %vm2040_vm11, %v4110_v4  ;;  %v3991_v45 = vpop.permute.xlu0 %3990  ;;  %v3553_v10 = vld [vmem:[#allocation2 + $0x158] sm:$0xff] }
 0x4a5   : > { %4079 = vst.msk [vmem:[#allocation3 + $0x38] sm:$0xff] %vm1966_vm10, %v3991_v45  ;;  %3820 = vrot.lane.b32.xlu1 %v3738_v25, %s5054_s16 }
 0x4a6   : > { %3630 = vrot.lane.b32.xlu0 %v6549_v55, %s5053_s13 }
 0x4a7   : > { %v3611_v49 = vpop.permute.xlu1 %3610 }
 0x4a8   : > { %3697 = vst.msk [vmem:[#allocation3 + $0x48] sm:$0xff] %vm1580_vm8, %v3611_v49  ;;  %v3609_v59 = vpop.permute.xlu0 %3608 }
 0x4a9   : > { %3696 = vst.msk [vmem:[#allocation3 + $0x40] sm:$0xff] %vm1580_vm8, %v3609_v59  ;;  %3248 = vrot.lane.b32.xlu1 %v3738_v25, %s5051_s11  ;;  %v3936_v59 = vld [vmem:[#allocation2 + $0x152] sm:$0xff] }
 0x4aa   : > { %3058 = vrot.lane.b32.xlu0 %v6549_v55, %s5050_s10 }
 0x4ab   : > { %v3229_v8 = vpop.permute.xlu1 %3228 }
 0x4ac   : > { %3314 = vst.msk [vmem:[#allocation3 + $0x50] sm:$0xff] %vm1193_vm6, %v3229_v8  ;;  %v3801_v1 = vpop.permute.xlu0 %3800  ;;  %v4111_v5 = vld [vmem:[#allocation3 + $0x38] sm:$0xff]  ;;  %v3745_v8 = vld [vmem:[#allocation2 + $0x159] sm:$0xff] }
 0x4ad   : > { %3888 = vst.msk [vmem:[#allocation3 + $0x40] sm:$0xff] %vm1773_vm9, %v3801_v1  ;;  %4012 = vrot.lane.b32.xlu1 %v3930_v16, %s5055_s19  ;;  %4952 = vmatmul.mubr.msk.f32.gmra.mrb[6].mxu1 %vm2040_vm11, %v4111_v5 }
 0x4ae   : > { %3822 = vrot.lane.b32.xlu0 %v3739_v20, %s5054_s16 }
 0x4af   : > { %v3993_v44 = vpop.permute.xlu1 %3992 }
 0x4b0   : > { %4080 = vst.msk [vmem:[#allocation3 + $0x40] sm:$0xff] %vm1966_vm10, %v3993_v44  ;;  %v3803_v47 = vpop.permute.xlu0 %3802 }
 0x4b1   : > { %3889 = vst.msk [vmem:[#allocation3 + $0x48] sm:$0xff] %vm1773_vm9, %v3803_v47  ;;  %3440 = vrot.lane.b32.xlu1 %v3930_v16, %s5052_s12  ;;  %v3363_v47 = vld [vmem:[#allocation2 + $0x15a] sm:$0xff] }
 0x4b2   : > { %3250 = vrot.lane.b32.xlu0 %v3739_v20, %s5051_s11 }
 0x4b3   : > { %v3421_v55 = vpop.permute.xlu1 %3420 }
 0x4b4   : > { %3506 = vst.msk [vmem:[#allocation3 + $0x50] sm:$0xff] %vm1386_vm7, %v3421_v55  ;;  %v3231_v12 = vpop.permute.xlu0 %3230 }
 0x4b5   : > { %3315 = vst.msk [vmem:[#allocation3 + $0x58] sm:$0xff] %vm1193_vm6, %v3231_v12  ;;  %3442 = vrot.lane.b32.xlu1 %v3357_v3, %s5052_s12 }
 0x4b6   : > { %4014 = vrot.lane.b32.xlu0 %v3357_v3, %s5055_s19  ;;  %v2980_v3 = vld [vmem:[#allocation2 + $0x168] sm:$0xff] }
 0x4b7   : > { %v3423_v35 = vpop.permute.xlu1 %3422  ;;  %v4112_v6 = vld [vmem:[#allocation3 + $0x40] sm:$0xff] }
 0x4b8   : > { %3507 = vst.msk [vmem:[#allocation3 + $0x58] sm:$0xff] %vm1386_vm7, %v3423_v35  ;;  %4954 = vmatprep.mubr.msk.f32.mxu1 %vm2040_vm11, %v4112_v6  ;;  %v3995_v18 = vpop.permute.xlu0 %3994 }
 0x4b9   : > { %4081 = vst.msk [vmem:[#allocation3 + $0x48] sm:$0xff] %vm1966_vm10, %v3995_v18  ;;  %3060 = vrot.lane.b32.xlu1 %v2974_v27, %s5050_s10 }
 0x4ba   : > { %3632 = vrot.lane.b32.xlu0 %v2974_v27, %s5053_s13  ;;  %v3746_v27 = vld [vmem:[#allocation2 + $0x169] sm:$0xff] }
 0x4bb   : > { %v3615_v26 = vpop.permute.xlu1 %3614 }
 0x4bc   : > { %3699 = vst.msk [vmem:[#allocation3 + $0x58] sm:$0xff] %vm1580_vm8, %v3615_v26  ;;  %v3613_v0 = vpop.permute.xlu0 %3612  ;;  %v3555_v26 = vld [vmem:[#allocation2 + $0x170] sm:$0xff] }
 0x4bd   : > { %3698 = vst.msk [vmem:[#allocation3 + $0x50] sm:$0xff] %vm1580_vm8, %v3613_v0  ;;  %3824 = vrot.lane.b32.xlu1 %v3740_v7, %s5054_s16 }
 0x4be   : > { %3634 = vrot.lane.b32.xlu0 %v3549_v46, %s5053_s13 }
 0x4bf   : > { %v3233_v54 = vpop.permute.xlu1 %3232 }
 0x4c0   : > { %3316 = vst.msk [vmem:[#allocation3 + $0x60] sm:$0xff] %vm1193_vm6, %v3233_v54  ;;  %v3805_v24 = vpop.permute.xlu0 %3804  ;;  %v4113_v48 = vld [vmem:[#allocation3 + $0x48] sm:$0xff] }
 0x4c1   : > { %3890 = vst.msk [vmem:[#allocation3 + $0x50] sm:$0xff] %vm1773_vm9, %v3805_v24  ;;  %3252 = vrot.lane.b32.xlu1 %v3740_v7, %s5051_s11  ;;  %4955 = vmatmul.mubr.msk.f32.gmra.mrb[8].mxu1 %vm2040_vm11, %v4113_v48  ;;  %v3938_v24 = vld [vmem:[#allocation2 + $0x16a] sm:$0xff] }
 0x4c2   : > { %3062 = vrot.lane.b32.xlu0 %v3549_v46, %s5050_s10  ;;  %v3747_v48 = vld [vmem:[#allocation2 + $0x171] sm:$0xff] }
 0x4c3   : > { %v3997_v37 = vpop.permute.xlu1 %3996 }
 0x4c4   : > { %4082 = vst.msk [vmem:[#allocation3 + $0x50] sm:$0xff] %vm1966_vm10, %v3997_v37  ;;  %v3807_v60 = vpop.permute.xlu0 %3806 }
 0x4c5   : > { %3891 = vst.msk [vmem:[#allocation3 + $0x58] sm:$0xff] %vm1773_vm9, %v3807_v60  ;;  %4016 = vrot.lane.b32.xlu1 %v3932_v62, %s5055_s19 }
 0x4c6   : > { %3826 = vrot.lane.b32.xlu0 %v3741_v21, %s5054_s16 }
 0x4c7   : > { %v3425_v56 = vpop.permute.xlu1 %3424 }
 0x4c8   : > { %3508 = vst.msk [vmem:[#allocation3 + $0x60] sm:$0xff] %vm1386_vm7, %v3425_v56  ;;  %v3235_v33 = vpop.permute.xlu0 %3234 }
 0x4c9   : > { %3317 = vst.msk [vmem:[#allocation3 + $0x68] sm:$0xff] %vm1193_vm6, %v3235_v33  ;;  %3444 = vrot.lane.b32.xlu1 %v3932_v62, %s5052_s12  ;;  %v3365_v33 = vld [vmem:[#allocation2 + $0x172] sm:$0xff] }
 0x4ca   : > { %3254 = vrot.lane.b32.xlu0 %v3741_v21, %s5051_s11 }
 0x4cb   : > { %v3427_v61 = vpop.permute.xlu1 %3426  ;;  %v4114_v13 = vld [vmem:[#allocation3 + $0x50] sm:$0xff] }
 0x4cc   : > { %3509 = vst.msk [vmem:[#allocation3 + $0x68] sm:$0xff] %vm1386_vm7, %v3427_v61  ;;  %4957 = vmatprep.mubr.msk.f32.mxu1 %vm2040_vm11, %v4114_v13  ;;  %v3999_v17 = vpop.permute.xlu0 %3998 }
 0x4cd   : > { %4083 = vst.msk [vmem:[#allocation3 + $0x58] sm:$0xff] %vm1966_vm10, %v3999_v17  ;;  %3446 = vrot.lane.b32.xlu1 %v3359_v11, %s5052_s12 }
 0x4ce   : > { %4018 = vrot.lane.b32.xlu0 %v3359_v11, %s5055_s19  ;;  %v2982_v11 = vld [vmem:[#allocation2 + $0x180] sm:$0xff] }
 0x4cf   : > { %v3619_v14 = vpop.permute.xlu1 %3618 }
 0x4d0   : > { %3701 = vst.msk [vmem:[#allocation3 + $0x68] sm:$0xff] %vm1580_vm8, %v3619_v14  ;;  %v3617_v58 = vpop.permute.xlu0 %3616 }
 0x4d1   : > { %3700 = vst.msk [vmem:[#allocation3 + $0x60] sm:$0xff] %vm1580_vm8, %v3617_v58  ;;  %3064 = vrot.lane.b32.xlu1 %v2976_v51, %s5050_s10 }
 0x4d2   : > { %3636 = vrot.lane.b32.xlu0 %v2976_v51, %s5053_s13  ;;  %v3748_v51 = vld [vmem:[#allocation2 + $0x181] sm:$0xff] }
 0x4d3   : > { %v3237_v9 = vpop.permute.xlu1 %3236 }
 0x4d4   : > { %3318 = vst.msk [vmem:[#allocation3 + $0x70] sm:$0xff] %vm1193_vm6, %v3237_v9  ;;  %v3809_v29 = vpop.permute.xlu0 %3808  ;;  %v4115_v31 = vld [vmem:[#allocation3 + $0x58] sm:$0xff] }
 0x4d5   : > { %3892 = vst.msk [vmem:[#allocation3 + $0x60] sm:$0xff] %vm1773_vm9, %v3809_v29  ;;  %3828 = vrot.lane.b32.xlu1 %v3742_v38, %s5054_s16  ;;  %4958 = vmatmul.mubr.msk.f32.gmra.mrb[10].mxu1 %vm2040_vm11, %v4115_v31  ;;  %v3557_v9 = vld [vmem:[#allocation2 + $0x188] sm:$0xff] }
 0x4d6   : > { %3638 = vrot.lane.b32.xlu0 %v3551_v32, %s5053_s13 }
 0x4d7   : > { %v4001_v42 = vpop.permute.xlu1 %4000 }
 0x4d8   : > { %4084 = vst.msk [vmem:[#allocation3 + $0x60] sm:$0xff] %vm1966_vm10, %v4001_v42  ;;  %v3811_v28 = vpop.permute.xlu0 %3810  ;;  %v3940_v42 = vld [vmem:[#allocation2 + $0x182] sm:$0xff] }
 0x4d9   : > { %3893 = vst.msk [vmem:[#allocation3 + $0x68] sm:$0xff] %vm1773_vm9, %v3811_v28  ;;  %3256 = vrot.lane.b32.xlu1 %v3742_v38, %s5051_s11  ;;  %v3749_v28 = vld [vmem:[#allocation2 + $0x189] sm:$0xff] }
 0x4da   : > { %3066 = vrot.lane.b32.xlu0 %v3551_v32, %s5050_s10 }
 0x4db   : > { %v3429_v23 = vpop.permute.xlu1 %3428 }
 0x4dc   : > { %3510 = vst.msk [vmem:[#allocation3 + $0x70] sm:$0xff] %vm1386_vm7, %v3429_v23  ;;  %v3239_v36 = vpop.permute.xlu0 %3238 }
 0x4dd   : > { %3319 = vst.msk [vmem:[#allocation3 + $0x78] sm:$0xff] %vm1193_vm6, %v3239_v36  ;;  %4020 = vrot.lane.b32.xlu1 %v3934_v41, %s5055_s19 }
 0x4de   : > { %3830 = vrot.lane.b32.xlu0 %v3743_v30, %s5054_s16 }
 0x4df   : > { %v3431_v39 = vpop.permute.xlu1 %3430  ;;  %v4116_v15 = vld [vmem:[#allocation3 + $0x60] sm:$0xff] }
 0x4e0   : > { %3511 = vst.msk [vmem:[#allocation3 + $0x78] sm:$0xff] %vm1386_vm7, %v3431_v39  ;;  %4960 = vmatprep.mubr.msk.f32.mxu1 %vm2040_vm11, %v4116_v15  ;;  %v4003_v57 = vpop.permute.xlu0 %4002  ;;  %v3367_v15 = vld [vmem:[#allocation2 + $0x18a] sm:$0xff] }
 0x4e1   : > { %4085 = vst.msk [vmem:[#allocation3 + $0x68] sm:$0xff] %vm1966_vm10, %v4003_v57  ;;  %3448 = vrot.lane.b32.xlu1 %v3934_v41, %s5052_s12  ;;  %v3559_v57 = vld [vmem:[#allocation2 + $0x1a0] sm:$0xff] }
 0x4e2   : > { %3258 = vrot.lane.b32.xlu0 %v3743_v30, %s5051_s11 }
 0x4e3   : > { %v3049_v40 = vpop.permute.xlu1 %3048 }
 0x4e4   : > { %3128 = vst.msk [vmem:[#allocation3 + $0x80] sm:$0xff] %vm1000_vm5, %v3049_v40  ;;  %v3621_v43 = vpop.permute.xlu0 %3620 }
 0x4e5   : > { %3702 = vst.msk [vmem:[#allocation3 + $0x70] sm:$0xff] %vm1580_vm8, %v3621_v43  ;;  %3450 = vrot.lane.b32.xlu1 %v3361_v52, %s5052_s12  ;;  %v3558_v43 = vld [vmem:[#allocation2 + $0x198] sm:$0xff] }
 0x4e6   : > { %4022 = vrot.lane.b32.xlu0 %v3361_v52, %s5055_s19 }
 0x4e7   : > { %v3813_v2 = vpop.permute.xlu1 %3812 }
 0x4e8   : > { %3894 = vst.msk [vmem:[#allocation3 + $0x70] sm:$0xff] %vm1773_vm9, %v3813_v2  ;;  %v3623_v50 = vpop.permute.xlu0 %3622  ;;  %v4117_v53 = vld [vmem:[#allocation3 + $0x68] sm:$0xff] }
 0x4e9   : > { %3703 = vst.msk [vmem:[#allocation3 + $0x78] sm:$0xff] %vm1580_vm8, %v3623_v50  ;;  %3068 = vrot.lane.b32.xlu1 %v2978_v19, %s5050_s10  ;;  %4961 = vmatmul.mubr.msk.f32.gmra.mrb[12].mxu1 %vm2040_vm11, %v4117_v53  ;;  %v3751_v50 = vld [vmem:[#allocation2 + $0x1a1] sm:$0xff]  ;;  %v3750_v53 = vld [vmem:[#allocation2 + $0x199] sm:$0xff] }
 0x4ea   : > { %3640 = vrot.lane.b32.xlu0 %v2978_v19, %s5053_s13 }
 0x4eb   : > { %v3241_v34 = vpop.permute.xlu1 %3240 }
 0x4ec   : > { %3320 = vst.msk [vmem:[#allocation3 + $0x80] sm:$0xff] %vm1193_vm6, %v3241_v34  ;;  %v3051_v22 = vpop.permute.xlu0 %3050 }
 0x4ed   : > { %3129 = vst.msk [vmem:[#allocation3 + $0x88] sm:$0xff] %vm1000_vm5, %v3051_v22  ;;  %3832 = vrot.lane.b32.xlu1 %v3744_v63, %s5054_s16  ;;  %v3943_v22 = vld [vmem:[#allocation2 + $0x1a2] sm:$0xff] }
 0x4ee   : > { %3642 = vrot.lane.b32.xlu0 %v3553_v10, %s5053_s13 }
 0x4ef   : > { %v4005_v4 = vpop.permute.xlu1 %4004 }
 0x4f0   : > { %4086 = vst.msk [vmem:[#allocation3 + $0x70] sm:$0xff] %vm1966_vm10, %v4005_v4  ;;  %v3815_v45 = vpop.permute.xlu0 %3814 }
 0x4f1   : > { %3895 = vst.msk [vmem:[#allocation3 + $0x78] sm:$0xff] %vm1773_vm9, %v3815_v45  ;;  %3260 = vrot.lane.b32.xlu1 %v3744_v63, %s5051_s11 }
 0x4f2   : > { %3070 = vrot.lane.b32.xlu0 %v3553_v10, %s5050_s10  ;;  %v3942_v10 = vld [vmem:[#allocation2 + $0x19a] sm:$0xff] }
 0x4f3   : > { %v3433_v25 = vpop.permute.xlu1 %3432 }
 0x4f4   : > { %3512 = vst.msk [vmem:[#allocation3 + $0x80] sm:$0xff] %vm1386_vm7, %v3433_v25  ;;  %v3243_v49 = vpop.permute.xlu0 %3242 }
 0x4f5   : > { %3321 = vst.msk [vmem:[#allocation3 + $0x88] sm:$0xff] %vm1193_vm6, %v3243_v49  ;;  %4024 = vrot.lane.b32.xlu1 %v3936_v59, %s5055_s19 }
 0x4f6   : > { %3834 = vrot.lane.b32.xlu0 %v3745_v8, %s5054_s16 }
 0x4f7   : > { %v3435_v1 = vpop.permute.xlu1 %3434  ;;  %v4118_v16 = vld [vmem:[#allocation3 + $0x70] sm:$0xff] }
 0x4f8   : > { %3513 = vst.msk [vmem:[#allocation3 + $0x88] sm:$0xff] %vm1386_vm7, %v3435_v1  ;;  %4963 = vmatprep.mubr.msk.f32.mxu1 %vm2040_vm11, %v4118_v16  ;;  %v4007_v5 = vpop.permute.xlu0 %4006  ;;  %v7221_v1 = vld [vmem:[%s7468_s5] ss:$0 sm:$0xff] }
 0x4f9   : > { %4087 = vst.msk [vmem:[#allocation3 + $0x78] sm:$0xff] %vm1966_vm10, %v4007_v5  ;;  %3452 = vrot.lane.b32.xlu1 %v3936_v59, %s5052_s12 }
 0x4fa   : > { %3262 = vrot.lane.b32.xlu0 %v3745_v8, %s5051_s11 }
 0x4fb   : > { %v3053_v20 = vpop.permute.xlu1 %3052 }
 0x4fc   : > { %3130 = vst.msk [vmem:[#allocation3 + $0x90] sm:$0xff] %vm1000_vm5, %v3053_v20  ;;  %v3625_v44 = vpop.permute.xlu0 %3624  ;;  %v7227_v20 = vld [vmem:[%s7469_s6] ss:$0 sm:$0xff] }
 0x4fd   : > { %3704 = vst.msk [vmem:[#allocation3 + $0x80] sm:$0xff] %vm1580_vm8, %v3625_v44  ;;  %3454 = vrot.lane.b32.xlu1 %v3363_v47, %s5052_s12 }
 0x4fe   : > { %4026 = vrot.lane.b32.xlu0 %v3363_v47, %s5055_s19 }
 0x4ff   : > { %v3817_v55 = vpop.permute.xlu1 %3816 }
 0x500   : > { %3896 = vst.msk [vmem:[#allocation3 + $0x80] sm:$0xff] %vm1773_vm9, %v3817_v55  ;;  %v3627_v12 = vpop.permute.xlu0 %3626  ;;  %v4119_v35 = vld [vmem:[#allocation3 + $0x78] sm:$0xff] }
 0x501   : > { %3705 = vst.msk [vmem:[#allocation3 + $0x88] sm:$0xff] %vm1580_vm8, %v3627_v12  ;;  %3072 = vrot.lane.b32.xlu1 %v2980_v3, %s5050_s10  ;;  %4964 = vmatmul.mubr.msk.f32.gmra.mrb[14].mxu1 %vm2040_vm11, %v4119_v35 }
 0x502   : > { %3644 = vrot.lane.b32.xlu0 %v2980_v3, %s5053_s13 }
 0x503   : > { %v3245_v6 = vpop.permute.xlu1 %3244 }
 0x504   : > { %3322 = vst.msk [vmem:[#allocation3 + $0x90] sm:$0xff] %vm1193_vm6, %v3245_v6  ;;  %v3055_v18 = vpop.permute.xlu0 %3054 }
 0x505   : > { %3131 = vst.msk [vmem:[#allocation3 + $0x98] sm:$0xff] %vm1000_vm5, %v3055_v18  ;;  %3836 = vrot.lane.b32.xlu1 %v3746_v27, %s5054_s16 }
 0x506   : > { %3646 = vrot.lane.b32.xlu0 %v3555_v26, %s5053_s13 }
 0x507   : > { %v4009_v0 = vpop.permute.xlu1 %4008 }
 0x508   : > { %4088 = vst.msk [vmem:[#allocation3 + $0x80] sm:$0xff] %vm1966_vm10, %v4009_v0  ;;  %v3819_v7 = vpop.permute.xlu0 %3818 }
 0x509   : > { %3897 = vst.msk [vmem:[#allocation3 + $0x88] sm:$0xff] %vm1773_vm9, %v3819_v7  ;;  %3264 = vrot.lane.b32.xlu1 %v3746_v27, %s5051_s11  ;;  %v7627_v7 = vld [vmem:[#allocation4_spill] sm:$0xff] }
 0x50a   : > { %3074 = vrot.lane.b32.xlu0 %v3555_v26, %s5050_s10  ;;  %v7626_v26 = vld [vmem:[#allocation5_spill] sm:$0xff] }
 0x50b   : > { %v3437_v46 = vpop.permute.xlu1 %3436 }
 0x50c   : > { %3514 = vst.msk [vmem:[#allocation3 + $0x90] sm:$0xff] %vm1386_vm7, %v3437_v46  ;;  %v3247_v54 = vpop.permute.xlu0 %3246 }
 0x50d   : > { %3323 = vst.msk [vmem:[#allocation3 + $0x98] sm:$0xff] %vm1193_vm6, %v3247_v54  ;;  %4028 = vrot.lane.b32.xlu1 %v3938_v24, %s5055_s19 }
 0x50e   : > { %3838 = vrot.lane.b32.xlu0 %v3747_v48, %s5054_s16 }
 0x50f   : > { %v3439_v37 = vpop.permute.xlu1 %3438  ;;  %v4120_v60 = vld [vmem:[#allocation3 + $0x80] sm:$0xff] }
 0x510   : > { %3515 = vst.msk [vmem:[#allocation3 + $0x98] sm:$0xff] %vm1386_vm7, %v3439_v37  ;;  %4966 = vmatprep.mubr.msk.f32.mxu1 %vm2040_vm11, %v4120_v60  ;;  %v4011_v62 = vpop.permute.xlu0 %4010 }
 0x511   : > { %4089 = vst.msk [vmem:[#allocation3 + $0x88] sm:$0xff] %vm1966_vm10, %v4011_v62  ;;  %3456 = vrot.lane.b32.xlu1 %v3938_v24, %s5052_s12 }
 0x512   : > { %3266 = vrot.lane.b32.xlu0 %v3747_v48, %s5051_s11 }
 0x513   : > { %v3057_v21 = vpop.permute.xlu1 %3056 }
 0x514   : > { %3132 = vst.msk [vmem:[#allocation3 + $0xa0] sm:$0xff] %vm1000_vm5, %v3057_v21  ;;  %v3629_v56 = vpop.permute.xlu0 %3628 }
 0x515   : > { %3706 = vst.msk [vmem:[#allocation3 + $0x90] sm:$0xff] %vm1580_vm8, %v3629_v56  ;;  %3458 = vrot.lane.b32.xlu1 %v3365_v33, %s5052_s12 }
 0x516   : > { %4030 = vrot.lane.b32.xlu0 %v3365_v33, %s5055_s19 }
 0x517   : > { %v3821_v61 = vpop.permute.xlu1 %3820 }
 0x518   : > { %3898 = vst.msk [vmem:[#allocation3 + $0x90] sm:$0xff] %vm1773_vm9, %v3821_v61  ;;  %v3631_v13 = vpop.permute.xlu0 %3630  ;;  %v4121_v17 = vld [vmem:[#allocation3 + $0x88] sm:$0xff] }
 0x519   : > { %3707 = vst.msk [vmem:[#allocation3 + $0x98] sm:$0xff] %vm1580_vm8, %v3631_v13  ;;  %4967 = vmatmul.mubr.msk.f32.gmra.mrb[16].mxu1 %vm2040_vm11, %v4121_v17  ;;  %3076 = vrot.lane.b32.xlu1 %v2982_v11, %s5050_s10 }
 0x51a   : > { %3648 = vrot.lane.b32.xlu0 %v2982_v11, %s5053_s13 }
 0x51b   : > { %v3249_v14 = vpop.permute.xlu1 %3248 }
 0x51c   : > { %3324 = vst.msk [vmem:[#allocation3 + $0xa0] sm:$0xff] %vm1193_vm6, %v3249_v14  ;;  %v3059_v58 = vpop.permute.xlu0 %3058 }
 0x51d   : > { %3133 = vst.msk [vmem:[#allocation3 + $0xa8] sm:$0xff] %vm1000_vm5, %v3059_v58  ;;  %3840 = vrot.lane.b32.xlu1 %v3748_v51, %s5054_s16 }
 0x51e   : > { %3650 = vrot.lane.b32.xlu0 %v3557_v9, %s5053_s13 }
 0x51f   : > { %v4013_v29 = vpop.permute.xlu1 %4012 }
 0x520   : > { %4090 = vst.msk [vmem:[#allocation3 + $0x90] sm:$0xff] %vm1966_vm10, %v4013_v29  ;;  %v3823_v38 = vpop.permute.xlu0 %3822 }
 0x521   : > { %3899 = vst.msk [vmem:[#allocation3 + $0x98] sm:$0xff] %vm1773_vm9, %v3823_v38  ;;  %3268 = vrot.lane.b32.xlu1 %v3748_v51, %s5051_s11 }
 0x522   : > { %3078 = vrot.lane.b32.xlu0 %v3557_v9, %s5050_s10 }
 0x523   : > { %v3441_v31 = vpop.permute.xlu1 %3440 }
 0x524   : > { %3516 = vst.msk [vmem:[#allocation3 + $0xa0] sm:$0xff] %vm1386_vm7, %v3441_v31  ;;  %v3251_v32 = vpop.permute.xlu0 %3250  ;;  %v7628_v31 = vld [vmem:[#allocation7_spill] sm:$0xff] }
 0x525   : > { %3325 = vst.msk [vmem:[#allocation3 + $0xa8] sm:$0xff] %vm1193_vm6, %v3251_v32  ;;  %4032 = vrot.lane.b32.xlu1 %v3940_v42, %s5055_s19 }
 0x526   : > { %3842 = vrot.lane.b32.xlu0 %v3749_v28, %s5054_s16 }
 0x527   : > { %v3443_v23 = vpop.permute.xlu1 %3442  ;;  %v4122_v36 = vld [vmem:[#allocation3 + $0x90] sm:$0xff] }
 0x528   : > { %3517 = vst.msk [vmem:[#allocation3 + $0xa8] sm:$0xff] %vm1386_vm7, %v3443_v23  ;;  %4969 = vmatprep.mubr.msk.f32.mxu1 %vm2040_vm11, %v4122_v36  ;;  %v4015_v41 = vpop.permute.xlu0 %4014 }
 0x529   : > { %4091 = vst.msk [vmem:[#allocation3 + $0x98] sm:$0xff] %vm1966_vm10, %v4015_v41  ;;  %3460 = vrot.lane.b32.xlu1 %v3940_v42, %s5052_s12  ;;  %v7629_v42 = vld [vmem:[#allocation6_spill] sm:$0xff] }
 0x52a   : > { %3270 = vrot.lane.b32.xlu0 %v3749_v28, %s5051_s11 }
 0x52b   : > { %v3061_v30 = vpop.permute.xlu1 %3060 }
 0x52c   : > { %3134 = vst.msk [vmem:[#allocation3 + $0xb0] sm:$0xff] %vm1000_vm5, %v3061_v30  ;;  %v3633_v39 = vpop.permute.xlu0 %3632 }
 0x52d   : > { %3708 = vst.msk [vmem:[#allocation3 + $0xa0] sm:$0xff] %vm1580_vm8, %v3633_v39  ;;  %3462 = vrot.lane.b32.xlu1 %v3367_v15, %s5052_s12 }
 0x52e   : > { %4034 = vrot.lane.b32.xlu0 %v3367_v15, %s5055_s19 }
 0x52f   : > { %v3825_v40 = vpop.permute.xlu1 %3824 }
 0x530   : > { %3900 = vst.msk [vmem:[#allocation3 + $0xa0] sm:$0xff] %vm1773_vm9, %v3825_v40  ;;  %v3635_v52 = vpop.permute.xlu0 %3634  ;;  %v4123_v2 = vld [vmem:[#allocation3 + $0x98] sm:$0xff] }
 0x531   : > { %3709 = vst.msk [vmem:[#allocation3 + $0xa8] sm:$0xff] %vm1580_vm8, %v3635_v52  ;;  %4970 = vmatmul.mubr.msk.f32.gmra.mrb[18].mxu1 %vm2040_vm11, %v4123_v2  ;;  %3654 = vrot.lane.b32.xlu1 %v3559_v57, %s5053_s13 }
 0x532   : > { %3652 = vrot.lane.b32.xlu0 %v3558_v43, %s5053_s13 }
 0x533   : > { %v3253_v19 = vpop.permute.xlu1 %3252 }
 0x534   : > { %3326 = vst.msk [vmem:[#allocation3 + $0xb0] sm:$0xff] %vm1193_vm6, %v3253_v19  ;;  %v3063_v34 = vpop.permute.xlu0 %3062 }
 0x535   : > { %3135 = vst.msk [vmem:[#allocation3 + $0xb8] sm:$0xff] %vm1000_vm5, %v3063_v34  ;;  %3846 = vrot.lane.b32.xlu1 %v3751_v50, %s5054_s16 }
 0x536   : > { %3844 = vrot.lane.b32.xlu0 %v3750_v53, %s5054_s16 }
 0x537   : > { %v4017_v63 = vpop.permute.xlu1 %4016 }
 0x538   : > { %4092 = vst.msk [vmem:[#allocation3 + $0xa0] sm:$0xff] %vm1966_vm10, %v4017_v63  ;;  %v3827_v4 = vpop.permute.xlu0 %3826 }
 0x539   : > { %3901 = vst.msk [vmem:[#allocation3 + $0xa8] sm:$0xff] %vm1773_vm9, %v3827_v4  ;;  %4038 = vrot.lane.b32.xlu1 %v3943_v22, %s5055_s19 }
 0x53a   : > { %4036 = vrot.lane.b32.xlu0 %v3942_v10, %s5055_s19 }
 0x53b   : > { %v3445_v45 = vpop.permute.xlu1 %3444 }
 0x53c   : > { %3518 = vst.msk [vmem:[#allocation3 + $0xb0] sm:$0xff] %vm1386_vm7, %v3445_v45  ;;  %v3255_v25 = vpop.permute.xlu0 %3254 }
 0x53d   : > { %3327 = vst.msk [vmem:[#allocation3 + $0xb8] sm:$0xff] %vm1193_vm6, %v3255_v25  ;;  %v7630_v25 = vld [vmem:[#allocation9_spill] sm:$0xff] }
 0x53f   : > { %v3447_v49 = vpop.permute.xlu1 %3446  ;;  %v4124_v59 = vld [vmem:[#allocation3 + $0xa0] sm:$0xff] }
 0x540   : > { %3519 = vst.msk [vmem:[#allocation3 + $0xb8] sm:$0xff] %vm1386_vm7, %v3447_v49  ;;  %4972 = vmatprep.mubr.msk.f32.mxu1 %vm2040_vm11, %v4124_v59  ;;  %v4019_v8 = vpop.permute.xlu0 %4018  ;;  %v7631_v59 = vld [vmem:[#allocation8_spill] sm:$0xff] }
 0x541   : > { %4093 = vst.msk [vmem:[#allocation3 + $0xa8] sm:$0xff] %vm1966_vm10, %v4019_v8 }
 0x543   : > { %v3065_v16 = vpop.permute.xlu1 %3064 }
 0x544   : > { %3136 = vst.msk [vmem:[#allocation3 + $0xc0] sm:$0xff] %vm1000_vm5, %v3065_v16  ;;  %v4944_v5 = vpop.f32.mrb[0].mxu1  ;;  %v3637_v44 = vpop.permute.xlu0 %3636 }
 0x545   : > { %v4474_v47 = vmul.f32 %v4944_v5, %v7221_v1  ;;  %3710 = vst.msk [vmem:[#allocation3 + $0xb0] sm:$0xff] %vm1580_vm8, %v3637_v44  ;;  %v4307_v55 = vpop.f32.mrb[1].mxu1 }
 0x546   : > { %v4473_v12 = vmul.f32 %v7221_v1, %v4307_v55 }
 0x547   : > { %v4513_v3 = vadd.f32 %v7227_v20, %v4474_v47  ;;  %v3829_v35 = vpop.permute.xlu1 %3828 }
 0x548   : > { %v4512_v6 = vadd.f32 %v7227_v20, %v4473_v12  ;;  %3902 = vst.msk [vmem:[#allocation3 + $0xb0] sm:$0xff] %vm1773_vm9, %v3829_v35  ;;  %v3639_v18 = vpop.permute.xlu0 %3638  ;;  %v4125_v27 = vld [vmem:[#allocation3 + $0xa8] sm:$0xff] }
 0x549   : > { %v4545_v0 = vadd.f32 %v4513_v3, %v7626_v26  ;;  %3711 = vst.msk [vmem:[#allocation3 + $0xb8] sm:$0xff] %vm1580_vm8, %v3639_v18  ;;  %4973 = vmatmul.mubr.msk.f32.gmra.mrb[20].mxu1 %vm2040_vm11, %v4125_v27 }
 0x54a   : > { %v4544_v46 = vadd.f32 %v4512_v6, %v7627_v7 }
 0x54b   : > { %v4577_v54 = vmax.f32 %v4545_v0, 0.0  ;;  %v3257_v24 = vpop.permute.xlu1 %3256 }
 0x54c   : > { %v4576_v48 = vmax.f32 %v4544_v46, 0.0  ;;  %3328 = vst.msk [vmem:[#allocation3 + $0xc0] sm:$0xff] %vm1193_vm6, %v3257_v24  ;;  %v3067_v37 = vpop.permute.xlu0 %3066 }
 0x54d   : > { %4609 = vst.msk [vmem:[%s7243_s29 + $0x8] sm:$0xff] %vm279_vm0, %v4577_v54 }
 0x54e   : > { %3137 = vst.msk [vmem:[#allocation3 + $0xc8] sm:$0xff] %vm1000_vm5, %v3067_v37 }
 0x54f   : > { %4608 = vst.msk [vmem:[%s7243_s29] sm:$0xff] %vm279_vm0, %v4576_v48  ;;  %v4021_v60 = vpop.permute.xlu1 %4020 }
 0x550   : > { %4094 = vst.msk [vmem:[#allocation3 + $0xb0] sm:$0xff] %vm1966_vm10, %v4021_v60  ;;  %v3831_v62 = vpop.permute.xlu0 %3830  ;;  %v7632_v60 = vld [vmem:[#allocation11_spill] sm:$0xff] }
 0x551   : > { %3903 = vst.msk [vmem:[#allocation3 + $0xb8] sm:$0xff] %vm1773_vm9, %v3831_v62 }
 0x553   : > { %v3449_v21 = vpop.permute.xlu1 %3448 }
 0x554   : > { %3520 = vst.msk [vmem:[#allocation3 + $0xc0] sm:$0xff] %vm1386_vm7, %v3449_v21  ;;  %v3259_v56 = vpop.permute.xlu0 %3258  ;;  %v7633_v21 = vld [vmem:[#allocation10_spill] sm:$0xff] }
 0x555   : > { %3329 = vst.msk [vmem:[#allocation3 + $0xc8] sm:$0xff] %vm1193_vm6, %v3259_v56 }
 0x557   : > { %v3451_v33 = vpop.permute.xlu1 %3450  ;;  %v4126_v61 = vld [vmem:[#allocation3 + $0xb0] sm:$0xff] }
 0x558   : > { %3521 = vst.msk [vmem:[#allocation3 + $0xc8] sm:$0xff] %vm1386_vm7, %v3451_v33  ;;  %v4947_v13 = vpop.f32.mrb[2].mxu1  ;;  %4975 = vmatprep.mubr.msk.f32.mxu1 %vm2040_vm11, %v4126_v61  ;;  %v4023_v17 = vpop.permute.xlu0 %4022 }
 0x559   : > { %v4476_v11 = vmul.f32 %v4947_v13, %v7221_v1  ;;  %4095 = vst.msk [vmem:[#allocation3 + $0xb8] sm:$0xff] %vm1966_vm10, %v4023_v17  ;;  %v4317_v14 = vpop.f32.mrb[3].mxu1 }
 0x55a   : > { %v4475_v58 = vmul.f32 %v7221_v1, %v4317_v14 }
 0x55b   : > { %v4515_v51 = vadd.f32 %v7227_v20, %v4476_v11  ;;  %v3069_v9 = vpop.permute.xlu1 %3068 }
 0x55c   : > { %v4514_v29 = vadd.f32 %v7227_v20, %v4475_v58  ;;  %3138 = vst.msk [vmem:[#allocation3 + $0xd0] sm:$0xff] %vm1000_vm5, %v3069_v9  ;;  %v3641_v38 = vpop.permute.xlu0 %3640 }
 0x55d   : > { %v4547_v32 = vadd.f32 %v4515_v51, %v7628_v31  ;;  %3712 = vst.msk [vmem:[#allocation3 + $0xc0] sm:$0xff] %vm1580_vm8, %v3641_v38 }
 0x55e   : > { %v4546_v28 = vadd.f32 %v4514_v29, %v7629_v42 }
 0x55f   : > { %v4579_v23 = vmax.f32 %v4547_v32, 0.0  ;;  %v3833_v36 = vpop.permute.xlu1 %3832 }
 0x560   : > { %v4578_v41 = vmax.f32 %v4546_v28, 0.0  ;;  %3904 = vst.msk [vmem:[#allocation3 + $0xc0] sm:$0xff] %vm1773_vm9, %v3833_v36  ;;  %v3643_v30 = vpop.permute.xlu0 %3642  ;;  %v4127_v39 = vld [vmem:[#allocation3 + $0xb8] sm:$0xff] }
 0x561   : > { %4611 = vst.msk [vmem:[%s7243_s29 + $0x18] sm:$0xff] %vm279_vm0, %v4579_v23  ;;  %4976 = vmatmul.mubr.msk.f32.gmra.mrb[22].mxu1 %vm2040_vm11, %v4127_v39 }
 0x562   : > { %3713 = vst.msk [vmem:[#allocation3 + $0xc8] sm:$0xff] %vm1580_vm8, %v3643_v30 }
 0x563   : > { %4610 = vst.msk [vmem:[%s7243_s29 + $0x10] sm:$0xff] %vm279_vm0, %v4578_v41  ;;  %v3261_v15 = vpop.permute.xlu1 %3260 }
 0x564   : > { %3330 = vst.msk [vmem:[#allocation3 + $0xd0] sm:$0xff] %vm1193_vm6, %v3261_v15  ;;  %v3071_v57 = vpop.permute.xlu0 %3070  ;;  %v7634_v15 = vld [vmem:[#allocation13_spill] sm:$0xff] }
 0x565   : > { %3139 = vst.msk [vmem:[#allocation3 + $0xd8] sm:$0xff] %vm1000_vm5, %v3071_v57 }
 0x567   : > { %v4025_v40 = vpop.permute.xlu1 %4024 }
 0x568   : > { %4096 = vst.msk [vmem:[#allocation3 + $0xc0] sm:$0xff] %vm1966_vm10, %v4025_v40  ;;  %v3835_v43 = vpop.permute.xlu0 %3834  ;;  %v7635_v40 = vld [vmem:[#allocation12_spill] sm:$0xff] }
 0x569   : > { %3905 = vst.msk [vmem:[#allocation3 + $0xc8] sm:$0xff] %vm1773_vm9, %v3835_v43 }
 0x56b   : > { %v3453_v52 = vpop.permute.xlu1 %3452 }
 0x56c   : > { %3522 = vst.msk [vmem:[#allocation3 + $0xd0] sm:$0xff] %vm1386_vm7, %v3453_v52  ;;  %v4950_v2 = vpop.f32.mrb[4].mxu1  ;;  %v3263_v50 = vpop.permute.xlu0 %3262 }
 0x56d   : > { %v4478_v19 = vmul.f32 %v4950_v2, %v7221_v1  ;;  %3331 = vst.msk [vmem:[#allocation3 + $0xd8] sm:$0xff] %vm1193_vm6, %v3263_v50  ;;  %v4327_v53 = vpop.f32.mrb[5].mxu1 }
 0x56e   : > { %v4477_v34 = vmul.f32 %v7221_v1, %v4327_v53 }
 0x56f   : > { %v4517_v22 = vadd.f32 %v7227_v20, %v4478_v19  ;;  %v3455_v63 = vpop.permute.xlu1 %3454  ;;  %v4128_v10 = vld [vmem:[#allocation3 + $0xc0] sm:$0xff] }
 0x570   : > { %v4516_v4 = vadd.f32 %v7227_v20, %v4477_v34  ;;  %3523 = vst.msk [vmem:[#allocation3 + $0xd8] sm:$0xff] %vm1386_vm7, %v3455_v63  ;;  %4978 = vmatprep.mubr.msk.f32.mxu1 %vm2040_vm11, %v4128_v10  ;;  %v4027_v45 = vpop.permute.xlu0 %4026 }
 0x571   : > { %v4549_v49 = vadd.f32 %v4517_v22, %v7630_v25  ;;  %4097 = vst.msk [vmem:[#allocation3 + $0xc8] sm:$0xff] %vm1966_vm10, %v4027_v45 }
 0x572   : > { %v4548_v8 = vadd.f32 %v4516_v4, %v7631_v59 }
 0x573   : > { %v4581_v16 = vmax.f32 %v4549_v49, 0.0  ;;  %v3073_v5 = vpop.permute.xlu1 %3072 }
 0x574   : > { %v4580_v44 = vmax.f32 %v4548_v8, 0.0  ;;  %3140 = vst.msk [vmem:[#allocation3 + $0xe0] sm:$0xff] %vm1000_vm5, %v3073_v5  ;;  %v3645_v47 = vpop.permute.xlu0 %3644 }
 0x575   : > { %4613 = vst.msk [vmem:[%s7243_s29 + $0x28] sm:$0xff] %vm279_vm0, %v4581_v16 }
 0x576   : > { %3714 = vst.msk [vmem:[#allocation3 + $0xd0] sm:$0xff] %vm1580_vm8, %v3645_v47 }
 0x577   : > { %4612 = vst.msk [vmem:[%s7243_s29 + $0x20] sm:$0xff] %vm279_vm0, %v4580_v44  ;;  %v3837_v55 = vpop.permute.xlu1 %3836 }
 0x578   : > { %3906 = vst.msk [vmem:[#allocation3 + $0xd0] sm:$0xff] %vm1773_vm9, %v3837_v55  ;;  %v3647_v12 = vpop.permute.xlu0 %3646  ;;  %v4129_v3 = vld [vmem:[#allocation3 + $0xc8] sm:$0xff] }
 0x579   : > { %3715 = vst.msk [vmem:[#allocation3 + $0xd8] sm:$0xff] %vm1580_vm8, %v3647_v12  ;;  %4979 = vmatmul.mubr.msk.f32.gmra.mrb[24].mxu1 %vm2040_vm11, %v4129_v3  ;;  %v7636_v12 = vld [vmem:[#allocation15_spill] sm:$0xff] }
 0x57b   : > { %v3265_v35 = vpop.permute.xlu1 %3264 }
 0x57c   : > { %3332 = vst.msk [vmem:[#allocation3 + $0xe0] sm:$0xff] %vm1193_vm6, %v3265_v35  ;;  %v3075_v6 = vpop.permute.xlu0 %3074  ;;  %v7637_v35 = vld [vmem:[#allocation14_spill] sm:$0xff] }
 0x57d   : > { %3141 = vst.msk [vmem:[#allocation3 + $0xe8] sm:$0xff] %vm1000_vm5, %v3075_v6 }
 0x57f   : > { %v4029_v18 = vpop.permute.xlu1 %4028 }
 0x580   : > { %4098 = vst.msk [vmem:[#allocation3 + $0xd0] sm:$0xff] %vm1966_vm10, %v4029_v18  ;;  %v4953_v27 = vpop.f32.mrb[6].mxu1  ;;  %v3839_v26 = vpop.permute.xlu0 %3838 }
 0x581   : > { %v4480_v0 = vmul.f32 %v4953_v27, %v7221_v1  ;;  %3907 = vst.msk [vmem:[#allocation3 + $0xd8] sm:$0xff] %vm1773_vm9, %v3839_v26  ;;  %v4337_v7 = vpop.f32.mrb[7].mxu1 }
 0x582   : > { %v4479_v46 = vmul.f32 %v7221_v1, %v4337_v7 }
 0x583   : > { %v4519_v54 = vadd.f32 %v7227_v20, %v4480_v0  ;;  %v3457_v24 = vpop.permute.xlu1 %3456 }
 0x584   : > { %v4518_v48 = vadd.f32 %v7227_v20, %v4479_v46  ;;  %3524 = vst.msk [vmem:[#allocation3 + $0xe0] sm:$0xff] %vm1386_vm7, %v3457_v24  ;;  %v3267_v37 = vpop.permute.xlu0 %3266 }
 0x585   : > { %v4551_v62 = vadd.f32 %v4519_v54, %v7632_v60  ;;  %3333 = vst.msk [vmem:[#allocation3 + $0xe8] sm:$0xff] %vm1193_vm6, %v3267_v37  ;;  %v7638_v60 = vld [vmem:[#allocation17_spill] sm:$0xff] }
 0x586   : > { %v4550_v56 = vadd.f32 %v4518_v48, %v7633_v21  ;;  %v7639_v21 = vld [vmem:[#allocation16_spill] sm:$0xff] }
 0x587   : > { %v4583_v33 = vmax.f32 %v4551_v62, 0.0  ;;  %v3459_v61 = vpop.permute.xlu1 %3458  ;;  %v4130_v13 = vld [vmem:[#allocation3 + $0xd0] sm:$0xff] }
 0x588   : > { %v4582_v17 = vmax.f32 %v4550_v56, 0.0  ;;  %3525 = vst.msk [vmem:[#allocation3 + $0xe8] sm:$0xff] %vm1386_vm7, %v3459_v61  ;;  %4981 = vmatprep.mubr.msk.f32.mxu1 %vm2040_vm11, %v4130_v13  ;;  %v4031_v11 = vpop.permute.xlu0 %4030 }
 0x589   : > { %4615 = vst.msk [vmem:[%s7243_s29 + $0x38] sm:$0xff] %vm279_vm0, %v4583_v33 }
 0x58a   : > { %4099 = vst.msk [vmem:[#allocation3 + $0xd8] sm:$0xff] %vm1966_vm10, %v4031_v11 }
 0x58b   : > { %4614 = vst.msk [vmem:[%s7243_s29 + $0x30] sm:$0xff] %vm279_vm0, %v4582_v17  ;;  %v3077_v14 = vpop.permute.xlu1 %3076 }
 0x58c   : > { %3142 = vst.msk [vmem:[#allocation3 + $0xf0] sm:$0xff] %vm1000_vm5, %v3077_v14  ;;  %v3649_v58 = vpop.permute.xlu0 %3648 }
 0x58d   : > { %3716 = vst.msk [vmem:[#allocation3 + $0xe0] sm:$0xff] %vm1580_vm8, %v3649_v58 }
 0x58f   : > { %v3841_v51 = vpop.permute.xlu1 %3840 }
 0x590   : > { %3908 = vst.msk [vmem:[#allocation3 + $0xe0] sm:$0xff] %vm1773_vm9, %v3841_v51  ;;  %v3651_v9 = vpop.permute.xlu0 %3650 }
 0x591   : > { %v4131_v29 = vld [vmem:[#allocation3 + $0xd8] sm:$0xff]  ;;  %3717 = vst.msk [vmem:[#allocation3 + $0xe8] sm:$0xff] %vm1580_vm8, %v3651_v9 }
 0x592   : > { %4982 = vmatmul.mubr.msk.f32.gmra.mrb[26].mxu1 %vm2040_vm11, %v4131_v29  ;;  %v7640_v9 = vld [vmem:[#allocation19_spill] sm:$0xff] }
 0x593   : > { %v3269_v38 = vpop.permute.xlu1 %3268 }
 0x594   : > { %3334 = vst.msk [vmem:[#allocation3 + $0xf0] sm:$0xff] %vm1193_vm6, %v3269_v38  ;;  %v4956_v31 = vpop.f32.mrb[8].mxu1  ;;  %v3079_v32 = vpop.permute.xlu0 %3078  ;;  %v7641_v38 = vld [vmem:[#allocation18_spill] sm:$0xff] }
 0x595   : > { %v4482_v42 = vmul.f32 %v4956_v31, %v7221_v1  ;;  %3143 = vst.msk [vmem:[#allocation3 + $0xf8] sm:$0xff] %vm1000_vm5, %v3079_v32  ;;  %v4347_v28 = vpop.f32.mrb[9].mxu1 }
 0x596   : > { %v4481_v23 = vmul.f32 %v7221_v1, %v4347_v28 }
 0x597   : > { %v4521_v36 = vadd.f32 %v7227_v20, %v4482_v42  ;;  %v4033_v41 = vpop.permute.xlu1 %4032 }
 0x598   : > { %v4520_v30 = vadd.f32 %v7227_v20, %v4481_v23  ;;  %4100 = vst.msk [vmem:[#allocation3 + $0xe0] sm:$0xff] %vm1966_vm10, %v4033_v41  ;;  %v3843_v39 = vpop.permute.xlu0 %3842 }
 0x599   : > { %v4553_v57 = vadd.f32 %v4521_v36, %v7634_v15  ;;  %3909 = vst.msk [vmem:[#allocation3 + $0xe8] sm:$0xff] %vm1773_vm9, %v3843_v39  ;;  %v7642_v15 = vld [vmem:[#allocation21_spill] sm:$0xff] }
 0x59a   : > { %v4552_v43 = vadd.f32 %v4520_v30, %v7635_v40  ;;  %v7643_v40 = vld [vmem:[#allocation20_spill] sm:$0xff] }
 0x59b   : > { %v4585_v52 = vmax.f32 %v4553_v57, 0.0  ;;  %v3461_v2 = vpop.permute.xlu1 %3460 }
 0x59c   : > { %v4584_v50 = vmax.f32 %v4552_v43, 0.0  ;;  %3526 = vst.msk [vmem:[#allocation3 + $0xf0] sm:$0xff] %vm1386_vm7, %v3461_v2  ;;  %v3271_v19 = vpop.permute.xlu0 %3270 }
 0x59d   : > { %4617 = vst.msk [vmem:[%s7243_s29 + $0x48] sm:$0xff] %vm279_vm0, %v4585_v52 }
 0x59e   : > { %3335 = vst.msk [vmem:[#allocation3 + $0xf8] sm:$0xff] %vm1193_vm6, %v3271_v19 }
 0x59f   : > { %4616 = vst.msk [vmem:[%s7243_s29 + $0x40] sm:$0xff] %vm279_vm0, %v4584_v50  ;;  %v3463_v53 = vpop.permute.xlu1 %3462  ;;  %v4132_v34 = vld [vmem:[#allocation3 + $0xe0] sm:$0xff] }
 0x5a0   : > { %3527 = vst.msk [vmem:[#allocation3 + $0xf8] sm:$0xff] %vm1386_vm7, %v3463_v53  ;;  %v4035_v22 = vpop.permute.xlu0 %4034  ;;  %4984 = vmatprep.mubr.msk.f32.mxu1 %vm2040_vm11, %v4132_v34 }
 0x5a1   : > { %4101 = vst.msk [vmem:[#allocation3 + $0xe8] sm:$0xff] %vm1966_vm10, %v4035_v22 }
 0x5a3   : > { %v3655_v63 = vpop.permute.xlu1 %3654 }
 0x5a4   : > { %v3653_v10 = vpop.permute.xlu0 %3652  ;;  %3719 = vst.msk [vmem:[#allocation3 + $0xf8] sm:$0xff] %vm1580_vm8, %v3655_v63 }
 0x5a5   : > { %3718 = vst.msk [vmem:[#allocation3 + $0xf0] sm:$0xff] %vm1580_vm8, %v3653_v10  ;;  %v7644_v10 = vld [vmem:[#allocation23_spill] sm:$0xff] }
 0x5a7   : > { %v3847_v4 = vpop.permute.xlu1 %3846 }
 0x5a8   : > { %v4959_v45 = vpop.f32.mrb[10].mxu1  ;;  %v3845_v25 = vpop.permute.xlu0 %3844  ;;  %v4133_v49 = vld [vmem:[#allocation3 + $0xe8] sm:$0xff]  ;;  %3911 = vst.msk [vmem:[#allocation3 + $0xf8] sm:$0xff] %vm1773_vm9, %v3847_v4 }
 0x5a9   : > { %v4484_v59 = vmul.f32 %v4959_v45, %v7221_v1  ;;  %3910 = vst.msk [vmem:[#allocation3 + $0xf0] sm:$0xff] %vm1773_vm9, %v3845_v25  ;;  %v4357_v8 = vpop.f32.mrb[11].mxu1  ;;  %4985 = vmatmul.mubr.msk.f32.gmra.mrb[28].mxu1 %vm2040_vm11, %v4133_v49  ;;  %v7645_v45 = vld [vmem:[#allocation22_spill] sm:$0xff] }
 0x5aa   : > { %v4483_v16 = vmul.f32 %v7221_v1, %v4357_v8 }
 0x5ab   : > { %v4523_v5 = vadd.f32 %v7227_v20, %v4484_v59  ;;  %v4039_v44 = vpop.permute.xlu1 %4038 }
 0x5ac   : > { %v4522_v47 = vadd.f32 %v7227_v20, %v4483_v16  ;;  %v4037_v55 = vpop.permute.xlu0 %4036  ;;  %4103 = vst.msk [vmem:[#allocation3 + $0xf8] sm:$0xff] %vm1966_vm10, %v4039_v44 }
 0x5ad   : > { %v4555_v3 = vadd.f32 %v4523_v5, %v7636_v12  ;;  %4102 = vst.msk [vmem:[#allocation3 + $0xf0] sm:$0xff] %vm1966_vm10, %v4037_v55  ;;  %v7646_v12 = vld [vmem:[#allocation25_spill] sm:$0xff] }
 0x5ae   : > { %v4554_v6 = vadd.f32 %v4522_v47, %v7637_v35  ;;  %v7647_v35 = vld [vmem:[#allocation24_spill] sm:$0xff] }
 0x5af   : > { %v4587_v18 = vmax.f32 %v4555_v3, 0.0 }
 0x5b0   : > { %v4586_v27 = vmax.f32 %v4554_v6, 0.0 }
 0x5b1   : > { %4619 = vst.msk [vmem:[%s7243_s29 + $0x58] sm:$0xff] %vm279_vm0, %v4587_v18 }
 0x5b2   : > { %4618 = vst.msk [vmem:[%s7243_s29 + $0x50] sm:$0xff] %vm279_vm0, %v4586_v27 }
 0x5b3   : > { %v4135_v26 = vld [vmem:[#allocation3 + $0xf8] sm:$0xff] }
 0x5b4   : > { %v4134_v0 = vld [vmem:[#allocation3 + $0xf0] sm:$0xff] }
 0x5b5   : > { %4987 = vmatprep.mubr.msk.f32.mxu1 %vm2040_vm11, %v4134_v0 }
 0x5b6   : > { %4988 = vmatmul.mubr.msk.f32.gmra.mrb[30].mxu1 %vm2040_vm11, %v4135_v26 }
 0x5bc   : > { %v4962_v7 = vpop.f32.mrb[12].mxu1 }
 0x5bd   : > { %v4486_v46 = vmul.f32 %v4962_v7, %v7221_v1  ;;  %v4367_v54 = vpop.f32.mrb[13].mxu1 }
 0x5be   : > { %v4485_v24 = vmul.f32 %v7221_v1, %v4367_v54 }
 0x5bf   : > { %v4525_v48 = vadd.f32 %v7227_v20, %v4486_v46 }
 0x5c0   : > { %v4524_v37 = vadd.f32 %v7227_v20, %v4485_v24 }
 0x5c1   : > { %v4557_v62 = vadd.f32 %v4525_v48, %v7638_v60  ;;  %v7648_v48 = vld [vmem:[#allocation27_spill] sm:$0xff]  ;;  %v7649_v60 = vld [vmem:[#allocation26_spill] sm:$0xff] }
 0x5c2   : > { %v4556_v56 = vadd.f32 %v4524_v37, %v7639_v21 }
 0x5c3   : > { %v4589_v33 = vmax.f32 %v4557_v62, 0.0 }
 0x5c4   : > { %v4588_v61 = vmax.f32 %v4556_v56, 0.0 }
 0x5c5   : > { %4621 = vst.msk [vmem:[%s7243_s29 + $0x68] sm:$0xff] %vm279_vm0, %v4589_v33 }
 0x5c6   : > { %4620 = vst.msk [vmem:[%s7243_s29 + $0x60] sm:$0xff] %vm279_vm0, %v4588_v61 }
 0x5d4   : > { %v4965_v13 = vpop.f32.mrb[14].mxu1 }
 0x5d5   : > { %v4488_v17 = vmul.f32 %v4965_v13, %v7221_v1  ;;  %v4377_v11 = vpop.f32.mrb[15].mxu1 }
 0x5d6   : > { %v4487_v14 = vmul.f32 %v7221_v1, %v4377_v11 }
 0x5d7   : > { %v4527_v58 = vadd.f32 %v7227_v20, %v4488_v17 }
 0x5d8   : > { %v4526_v51 = vadd.f32 %v7227_v20, %v4487_v14 }
 0x5d9   : > { %v4559_v29 = vadd.f32 %v4527_v58, %v7640_v9  ;;  %v7650_v58 = vld [vmem:[#allocation29_spill] sm:$0xff]  ;;  %v7651_v9 = vld [vmem:[#allocation28_spill] sm:$0xff] }
 0x5da   : > { %v4558_v31 = vadd.f32 %v4526_v51, %v7641_v38 }
 0x5db   : > { %v4591_v32 = vmax.f32 %v4559_v29, 0.0 }
 0x5dc   : > { %v4590_v42 = vmax.f32 %v4558_v31, 0.0 }
 0x5dd   : > { %4623 = vst.msk [vmem:[%s7243_s29 + $0x78] sm:$0xff] %vm279_vm0, %v4591_v32 }
 0x5de   : > { %4622 = vst.msk [vmem:[%s7243_s29 + $0x70] sm:$0xff] %vm279_vm0, %v4590_v42 }
 0x5ec   : > { %v4968_v28 = vpop.f32.mrb[16].mxu1 }
 0x5ed   : > { %v4490_v23 = vmul.f32 %v4968_v28, %v7221_v1  ;;  %v4387_v36 = vpop.f32.mrb[17].mxu1 }
 0x5ee   : > { %v4489_v41 = vmul.f32 %v7221_v1, %v4387_v36 }
 0x5ef   : > { %v4529_v30 = vadd.f32 %v7227_v20, %v4490_v23 }
 0x5f0   : > { %v4528_v39 = vadd.f32 %v7227_v20, %v4489_v41 }
 0x5f1   : > { %v4561_v57 = vadd.f32 %v4529_v30, %v7642_v15  ;;  %v7652_v30 = vld [vmem:[#allocation31_spill] sm:$0xff]  ;;  %v7653_v15 = vld [vmem:[#allocation30_spill] sm:$0xff] }
 0x5f2   : > { %v4560_v43 = vadd.f32 %v4528_v39, %v7643_v40 }
 0x5f3   : > { %v4593_v52 = vmax.f32 %v4561_v57, 0.0 }
 0x5f4   : > { %v4592_v2 = vmax.f32 %v4560_v43, 0.0 }
 0x5f5   : > { %4625 = vst.msk [vmem:[%s7243_s29 + $0x88] sm:$0xff] %vm279_vm0, %v4593_v52 }
 0x5f6   : > { %4624 = vst.msk [vmem:[%s7243_s29 + $0x80] sm:$0xff] %vm279_vm0, %v4592_v2 }
 0x604   : > { %v4971_v50 = vpop.f32.mrb[18].mxu1 }
 0x605   : > { %v4492_v19 = vmul.f32 %v4971_v50, %v7221_v1  ;;  %v4397_v53 = vpop.f32.mrb[19].mxu1 }
 0x606   : > { %v4491_v34 = vmul.f32 %v7221_v1, %v4397_v53 }
 0x607   : > { %v4531_v22 = vadd.f32 %v7227_v20, %v4492_v19 }
 0x608   : > { %v4530_v63 = vadd.f32 %v7227_v20, %v4491_v34 }
 0x609   : > { %v4563_v4 = vadd.f32 %v4531_v22, %v7644_v10  ;;  %v7654_v22 = vld [vmem:[#allocation33_spill] sm:$0xff]  ;;  %v7655_v10 = vld [vmem:[#allocation32_spill] sm:$0xff] }
 0x60a   : > { %v4562_v25 = vadd.f32 %v4530_v63, %v7645_v45 }
 0x60b   : > { %v4595_v49 = vmax.f32 %v4563_v4, 0.0 }
 0x60c   : > { %v4594_v59 = vmax.f32 %v4562_v25, 0.0 }
 0x60d   : > { %4627 = vst.msk [vmem:[%s7243_s29 + $0x98] sm:$0xff] %vm279_vm0, %v4595_v49 }
 0x60e   : > { %4626 = vst.msk [vmem:[%s7243_s29 + $0x90] sm:$0xff] %vm279_vm0, %v4594_v59 }
 0x61c   : > { %v4974_v8 = vpop.f32.mrb[20].mxu1 }
 0x61d   : > { %v4494_v16 = vmul.f32 %v4974_v8, %v7221_v1  ;;  %v4407_v5 = vpop.f32.mrb[21].mxu1 }
 0x61e   : > { %v4493_v44 = vmul.f32 %v7221_v1, %v4407_v5 }
 0x61f   : > { %v4533_v47 = vadd.f32 %v7227_v20, %v4494_v16 }
 0x620   : > { %v4532_v55 = vadd.f32 %v7227_v20, %v4493_v44 }
 0x621   : > { %v4565_v3 = vadd.f32 %v4533_v47, %v7646_v12  ;;  %v7656_v47 = vld [vmem:[#allocation37_spill] sm:$0xff]  ;;  %v7657_v12 = vld [vmem:[#allocation35_spill] sm:$0xff] }
 0x622   : > { %v4564_v6 = vadd.f32 %v4532_v55, %v7647_v35 }
 0x623   : > { %v4597_v18 = vmax.f32 %v4565_v3, 0.0 }
 0x624   : > { %v4596_v27 = vmax.f32 %v4564_v6, 0.0 }
 0x625   : > { %4629 = vst.msk [vmem:[%s7243_s29 + $0xa8] sm:$0xff] %vm279_vm0, %v4597_v18 }
 0x626   : > { %4628 = vst.msk [vmem:[%s7243_s29 + $0xa0] sm:$0xff] %vm279_vm0, %v4596_v27 }
 0x634   : > { %v4977_v26 = vpop.f32.mrb[22].mxu1 }
 0x635   : > { %v4496_v0 = vmul.f32 %v4977_v26, %v7221_v1  ;;  %v4417_v7 = vpop.f32.mrb[23].mxu1 }
 0x636   : > { %v4495_v46 = vmul.f32 %v7221_v1, %v4417_v7 }
 0x637   : > { %v4535_v54 = vadd.f32 %v7227_v20, %v4496_v0 }
 0x638   : > { %v4534_v24 = vadd.f32 %v7227_v20, %v4495_v46 }
 0x639   : > { %v4567_v37 = vadd.f32 %v4535_v54, %v7648_v48 }
 0x63a   : > { %v4566_v62 = vadd.f32 %v4534_v24, %v7649_v60 }
 0x63b   : > { %v4599_v21 = vmax.f32 %v4567_v37, 0.0 }
 0x63c   : > { %v4598_v56 = vmax.f32 %v4566_v62, 0.0 }
 0x63d   : > { %4631 = vst.msk [vmem:[%s7243_s29 + $0xb8] sm:$0xff] %vm279_vm0, %v4599_v21 }
 0x63e   : > { %4630 = vst.msk [vmem:[%s7243_s29 + $0xb0] sm:$0xff] %vm279_vm0, %v4598_v56 }
 0x64c   : > { %v4980_v33 = vpop.f32.mrb[24].mxu1 }
 0x64d   : > { %v4498_v61 = vmul.f32 %v4980_v33, %v7221_v1  ;;  %v4427_v13 = vpop.f32.mrb[25].mxu1 }
 0x64e   : > { %v4497_v17 = vmul.f32 %v7221_v1, %v4427_v13 }
 0x64f   : > { %v4537_v11 = vadd.f32 %v7227_v20, %v4498_v61 }
 0x650   : > { %v4536_v14 = vadd.f32 %v7227_v20, %v4497_v17 }
 0x651   : > { %v4569_v51 = vadd.f32 %v4537_v11, %v7650_v58 }
 0x652   : > { %v4568_v29 = vadd.f32 %v4536_v14, %v7651_v9 }
 0x653   : > { %v4601_v38 = vmax.f32 %v4569_v51, 0.0 }
 0x654   : > { %v4600_v31 = vmax.f32 %v4568_v29, 0.0 }
 0x655   : > { %4633 = vst.msk [vmem:[%s7243_s29 + $0xc8] sm:$0xff] %vm279_vm0, %v4601_v38 }
 0x656   : > { %4632 = vst.msk [vmem:[%s7243_s29 + $0xc0] sm:$0xff] %vm279_vm0, %v4600_v31 }
 0x665   : > { %v4983_v32 = vpop.f32.mrb[26].mxu1 }
 0x666   : > { %v4500_v42 = vmul.f32 %v4983_v32, %v7221_v1  ;;  %v4437_v28 = vpop.f32.mrb[27].mxu1 }
 0x667   : > { %v4499_v23 = vmul.f32 %v7221_v1, %v4437_v28 }
 0x668   : > { %v4539_v36 = vadd.f32 %v7227_v20, %v4500_v42 }
 0x669   : > { %v4538_v41 = vadd.f32 %v7227_v20, %v4499_v23 }
 0x66a   : > { %v4571_v39 = vadd.f32 %v4539_v36, %v7652_v30 }
 0x66b   : > { %v4570_v57 = vadd.f32 %v4538_v41, %v7653_v15 }
 0x66c   : > { %v4603_v40 = vmax.f32 %v4571_v39, 0.0 }
 0x66d   : > { %v4602_v43 = vmax.f32 %v4570_v57, 0.0 }
 0x66e   : > { %4635 = vst.msk [vmem:[%s7243_s29 + $0xd8] sm:$0xff] %vm279_vm0, %v4603_v40 }
 0x66f   : > { %4634 = vst.msk [vmem:[%s7243_s29 + $0xd0] sm:$0xff] %vm279_vm0, %v4602_v43 }
 0x67c   : > { %v4986_v52 = vpop.f32.mrb[28].mxu1 }
 0x67d   : > { %v4502_v2 = vmul.f32 %v4986_v52, %v7221_v1  ;;  %v4447_v50 = vpop.f32.mrb[29].mxu1 }
 0x67e   : > { %v4501_v19 = vmul.f32 %v7221_v1, %v4447_v50 }
 0x67f   : > { %v4541_v53 = vadd.f32 %v7227_v20, %v4502_v2 }
 0x680   : > { %v4540_v34 = vadd.f32 %v7227_v20, %v4501_v19 }
 0x681   : > { %v4573_v63 = vadd.f32 %v4541_v53, %v7654_v22 }
 0x682   : > { %v4572_v4 = vadd.f32 %v4540_v34, %v7655_v10 }
 0x683   : > { %v4605_v45 = vmax.f32 %v4573_v63, 0.0 }
 0x684   : > { %v4604_v25 = vmax.f32 %v4572_v4, 0.0 }
 0x685   : > { %4637 = vst.msk [vmem:[%s7243_s29 + $0xe8] sm:$0xff] %vm279_vm0, %v4605_v45 }
 0x686   : > { %4636 = vst.msk [vmem:[%s7243_s29 + $0xe0] sm:$0xff] %vm279_vm0, %v4604_v25 }
 0x689   : > { %v4989_v49 = vpop.f32.mrb[30].mxu1 }
 0x68a   : > { %v4504_v59 = vmul.f32 %v4989_v49, %v7221_v1  ;;  %v4457_v8 = vpop.f32.mrb[31].mxu1 }
 0x68b   : > { %v4503_v16 = vmul.f32 %v7221_v1, %v4457_v8 }
 0x68c   : > { %v4543_v5 = vadd.f32 %v7227_v20, %v4504_v59 }
 0x68d   : > { %v4542_v44 = vadd.f32 %v7227_v20, %v4503_v16 }
 0x68e   : > { %v4575_v55 = vadd.f32 %v4543_v5, %v7656_v47 }
 0x68f   : > { %v4574_v3 = vadd.f32 %v4542_v44, %v7657_v12 }
 0x690   : > { %v4607_v35 = vmax.f32 %v4575_v55, 0.0 }
 0x691   : > { %v4606_v6 = vmax.f32 %v4574_v3, 0.0 }
 0x692   : > { %4639 = vst.msk [vmem:[%s7243_s29 + $0xf8] sm:$0xff] %vm279_vm0, %v4607_v35 }
 0x693   : > { %4638 = vst.msk [vmem:[%s7243_s29 + $0xf0] sm:$0xff] %vm279_vm0, %v4606_v6 }
 0x694 PF: > { %s17_s24 = sadd.s32 1, %s5045_s24  }
 0x695   : > { %p14_p4 = scmp.ge.s32.totalorder %s17_s24, 4  }
 0x697   :  { %16 = sbr.rel (!%p14_p4) target bundleno = 1 (0x1), region = 81 }

</bundles_post_ra>
